<compile_context>
chip_gen: v5e
topology: v5e:2x2
jax: 0.10.0
libtpu: 0.0.40
codegen_flags: <defaults>
</compile_context>

<pallas_src>
import math

import jax
import jax.numpy as jnp
from jax import lax
from jax.experimental import pallas as pl
from jax.experimental.pallas import tpu as pltpu  # noqa: F401

# Full-f32 matmuls for the eager reference (and interpret-mode kernel dots);
# the TPU default (bf16 passes) is what caused the previous >1e-3 mismatch.
jax.config.update("jax_default_matmul_precision", "highest")

D_MODEL = 32
NHEAD = 4
HEAD_DIM = D_MODEL // NHEAD
LN_EPS = 1e-5
_HIGHEST = lax.Precision.HIGHEST


def cross_attn_kernel(tgt_ref, mem_ref, qpos_ref, pos_ref, w_ref, b_ref, out_ref):
    # tgt_ref/qpos_ref: (L, N*E); mem_ref/pos_ref: (S, N*E)
    # w_ref: (E, 4E) = [wq*scale | wk | wv | wo] (pre-transposed so x @ W)
    # b_ref: (8, E)  = [bq*scale, bk, bv, bo, gamma, beta, 0, 0]
    # out_ref: (L, N*E)
    E = D_MODEL
    N = tgt_ref.shape[1] // E

    w = w_ref[...]                       # (E, 4E) single lane-dense load
    b = b_ref[...]                       # (8, E)
    wq = w[:, 0 * E:1 * E]
    wk = w[:, 1 * E:2 * E]
    wv = w[:, 2 * E:3 * E]
    wo = w[:, 3 * E:4 * E]
    bq = b[0:1, :]
    bk = b[1:2, :]
    bv = b[2:3, :]
    bo = b[3:4, :]
    gamma = b[4:5, :]
    beta = b[5:6, :]

    cols = []
    for n in range(N):                   # static unroll over batch (N tiny)
        lo_n, hi_n = n * E, (n + 1) * E
        tgt_n = tgt_ref[:, lo_n:hi_n]    # (L, E)
        mem_n = mem_ref[:, lo_n:hi_n]    # (S, E)
        q_in = tgt_n + qpos_ref[:, lo_n:hi_n]   # with_pos_embed(tgt, query_pos)
        k_in = mem_n + pos_ref[:, lo_n:hi_n]    # with_pos_embed(memory, pos)

        # Projections (wq/bq already carry the 1/sqrt(head_dim) scale).
        q = jnp.dot(q_in, wq, preferred_element_type=jnp.float32,
                    precision=_HIGHEST) + bq                             # (L, E)
        k = jnp.dot(k_in, wk, preferred_element_type=jnp.float32,
                    precision=_HIGHEST) + bk                             # (S, E)
        v = jnp.dot(mem_n, wv, preferred_element_type=jnp.float32,
                    precision=_HIGHEST) + bv                             # (S, E)

        heads = []
        for h in range(NHEAD):           # static unroll over heads
            lo, hi = h * HEAD_DIM, (h + 1) * HEAD_DIM
            # scores = qh @ kh.T (contract head_dim of both; no transpose)
            s = lax.dot_general(q[:, lo:hi], k[:, lo:hi],
                                (((1,), (1,)), ((), ())),
                                precision=_HIGHEST,
                                preferred_element_type=jnp.float32)      # (L, S)
            s = s - jnp.max(s, axis=-1, keepdims=True)
            p = jnp.exp(s)
            p = p / jnp.sum(p, axis=-1, keepdims=True)                   # exact softmax
            heads.append(jnp.dot(p, v[:, lo:hi],
                                 preferred_element_type=jnp.float32,
                                 precision=_HIGHEST))                    # (L, Dh)
        attn = jnp.concatenate(heads, axis=-1)                           # (L, E)

        tgt2 = jnp.dot(attn, wo, preferred_element_type=jnp.float32,
                       precision=_HIGHEST) + bo

        # residual (dropout p=0.0 -> identity) + LayerNorm
        x = tgt_n + tgt2
        mean = jnp.mean(x, axis=-1, keepdims=True)
        var = jnp.mean((x - mean) ** 2, axis=-1, keepdims=True)
        y = (x - mean) * lax.rsqrt(var + LN_EPS)
        cols.append(y * gamma + beta)

    out_ref[...] = jnp.concatenate(cols, axis=-1)                        # (L, N*E)


def cross_attention_layer(tgt, memory, params, query_pos, pos):
    """tgt/query_pos: (L, N, E); memory/pos: (S, N, E). Returns (L, N, E)."""
    L, N, E = tgt.shape
    S = memory.shape[0]
    assert E == D_MODEL

    scale = 1.0 / math.sqrt(HEAD_DIM)

    # Free row-major reshapes (no transposes, no HBM copy kernels).
    tgt2 = tgt.reshape(L, N * E)
    mem2 = memory.reshape(S, N * E)
    qpos2 = query_pos.reshape(L, N * E)
    pos2 = pos.reshape(S, N * E)

    # Packed, lane-dense parameter slabs (scale folded into wq / bq).
    w_packed = jnp.concatenate(
        [params["wq"].T * scale, params["wk"].T, params["wv"].T, params["wo"].T],
        axis=1)                                                  # (E, 4E) = (32, 128)
    zero = jnp.zeros((E,), jnp.float32)
    b_packed = jnp.stack(
        [params["bq"] * scale, params["bk"], params["bv"], params["bo"],
         params["gamma"], params["beta"], zero, zero], axis=0)   # (8, E)

    out2 = pl.pallas_call(
        cross_attn_kernel,
        out_shape=jax.ShapeDtypeStruct((L, N * E), jnp.float32),
    )(tgt2, mem2, qpos2, pos2, w_packed, b_packed)

    return out2.reshape(L, N, E)         # free reshape back to seq-first layout


def reference(tgt, memory, query_pos, pos, p):
    """Pure-JAX reference matching PyTorch semantics (seq-first inputs)."""
    tgt_b = jnp.transpose(tgt, (1, 0, 2))
    mem_b = jnp.transpose(memory, (1, 0, 2))
    qpos_b = jnp.transpose(query_pos, (1, 0, 2))
    pos_b = jnp.transpose(pos, (1, 0, 2))

    q = (tgt_b + qpos_b) @ p["wq"].T + p["bq"]
    k = (mem_b + pos_b) @ p["wk"].T + p["bk"]
    v = mem_b @ p["wv"].T + p["bv"]
    N, L, E = q.shape
    S = k.shape[1]
    qh = q.reshape(N, L, NHEAD, HEAD_DIM).transpose(0, 2, 1, 3)
    kh = k.reshape(N, S, NHEAD, HEAD_DIM).transpose(0, 2, 1, 3)
    vh = v.reshape(N, S, NHEAD, HEAD_DIM).transpose(0, 2, 1, 3)
    scores = jnp.einsum("nhld,nhsd->nhls", qh, kh,
                        precision=_HIGHEST) / math.sqrt(HEAD_DIM)
    attn = jax.nn.softmax(scores, axis=-1)
    o = jnp.einsum("nhls,nhsd->nhld", attn, vh,
                   precision=_HIGHEST).transpose(0, 2, 1, 3).reshape(N, L, E)
    o = o @ p["wo"].T + p["bo"]
    x = tgt_b + o
    mean = x.mean(-1, keepdims=True)
    var = ((x - mean) ** 2).mean(-1, keepdims=True)
    y = (x - mean) / jnp.sqrt(var + LN_EPS) * p["gamma"] + p["beta"]
    return jnp.transpose(y, (1, 0, 2))


def init_params(key, d_model):
    """Mirror nn.MultiheadAttention + _reset_parameters (xavier_uniform on
    weights, zeros on biases) and nn.LayerNorm defaults."""
    k_in, k_out = jax.random.split(key, 2)
    a_in = math.sqrt(6.0 / (3 * d_model + d_model))
    in_proj_w = jax.random.uniform(k_in, (3 * d_model, d_model),
                                   jnp.float32, -a_in, a_in)
    a_out = math.sqrt(6.0 / (2 * d_model))
    wo = jax.random.uniform(k_out, (d_model, d_model), jnp.float32, -a_out, a_out)
    zeros = jnp.zeros((d_model,), jnp.float32)
    return {
        "wq": in_proj_w[:d_model],
        "wk": in_proj_w[d_model:2 * d_model],
        "wv": in_proj_w[2 * d_model:],
        "bq": zeros, "bk": zeros, "bv": zeros,
        "wo": wo, "bo": zeros,
        "gamma": jnp.ones((d_model,), jnp.float32),
        "beta": zeros,
    }


if __name__ == "__main__":
    L, S, N, E = 8, 16, 2, D_MODEL   # tgt seq, memory seq, batch, d_model

    key = jax.random.PRNGKey(0)
    kp, kt, km, kq, kpos = jax.random.split(key, 5)
    params = init_params(kp, E)

    tgt = jax.random.normal(kt, (L, N, E), jnp.float32)
    memory = jax.random.normal(km, (S, N, E), jnp.float32)
    query_pos = jax.random.normal(kq, (L, N, E), jnp.float32)
    pos = jax.random.normal(kpos, (S, N, E), jnp.float32)

    out = jax.jit(cross_attention_layer)(tgt, memory, params, query_pos, pos)
    out = jax.block_until_ready(out)

    ref = jax.block_until_ready(reference(tgt, memory, query_pos, pos, params))
    # Kernel and reference now use the same (full-f32) matmul precision and an
    # exact softmax, so they agree to ~1e-6; assert with comfortable margin.
    if not jnp.allclose(out, ref, atol=2e-4, rtol=2e-4):
        raise AssertionError("Pallas kernel output mismatch vs reference")

    print("KERNEL_OK")
</pallas_src>

<mosaic_0001>
module attributes {stable_mosaic.version = 11 : i64} {
  func.func @cross_attn_kernel(%arg0: memref<8x64xf32, #tpu.memory_space<vmem>>, %arg1: memref<16x64xf32, #tpu.memory_space<vmem>>, %arg2: memref<8x64xf32, #tpu.memory_space<vmem>>, %arg3: memref<16x64xf32, #tpu.memory_space<vmem>>, %arg4: memref<32x128xf32, #tpu.memory_space<vmem>>, %arg5: memref<8x32xf32, #tpu.memory_space<vmem>>, %arg6: memref<8x64xf32, #tpu.memory_space<vmem>>) attributes {dimension_semantics = [], scalar_prefetch = 0 : i64, scratch_operands = 0 : i64, tpu.core_type = #tpu.core_type<tc>} {
    %c0 = arith.constant 0 : index
    %c0_0 = arith.constant 0 : index
    %0 = vector.load %arg4[%c0, %c0_0] : memref<32x128xf32, #tpu.memory_space<vmem>>, vector<32x128xf32>
    %c0_1 = arith.constant 0 : index
    %c0_2 = arith.constant 0 : index
    %1 = vector.load %arg5[%c0_1, %c0_2] : memref<8x32xf32, #tpu.memory_space<vmem>>, vector<8x32xf32>
    %2 = vector.extract_strided_slice %0 {offsets = [0, 0], sizes = [32, 32], strides = [1, 1]} : vector<32x128xf32> to vector<32x32xf32>
    %3 = vector.extract_strided_slice %0 {offsets = [0, 32], sizes = [32, 32], strides = [1, 1]} : vector<32x128xf32> to vector<32x32xf32>
    %4 = vector.extract_strided_slice %0 {offsets = [0, 64], sizes = [32, 32], strides = [1, 1]} : vector<32x128xf32> to vector<32x32xf32>
    %5 = vector.extract_strided_slice %0 {offsets = [0, 96], sizes = [32, 32], strides = [1, 1]} : vector<32x128xf32> to vector<32x32xf32>
    %6 = vector.extract_strided_slice %1 {offsets = [0, 0], sizes = [1, 32], strides = [1, 1]} : vector<8x32xf32> to vector<1x32xf32>
    %7 = vector.extract_strided_slice %1 {offsets = [1, 0], sizes = [1, 32], strides = [1, 1]} : vector<8x32xf32> to vector<1x32xf32>
    %8 = vector.extract_strided_slice %1 {offsets = [2, 0], sizes = [1, 32], strides = [1, 1]} : vector<8x32xf32> to vector<1x32xf32>
    %9 = vector.extract_strided_slice %1 {offsets = [3, 0], sizes = [1, 32], strides = [1, 1]} : vector<8x32xf32> to vector<1x32xf32>
    %10 = vector.extract_strided_slice %1 {offsets = [4, 0], sizes = [1, 32], strides = [1, 1]} : vector<8x32xf32> to vector<1x32xf32>
    %11 = vector.extract_strided_slice %1 {offsets = [5, 0], sizes = [1, 32], strides = [1, 1]} : vector<8x32xf32> to vector<1x32xf32>
    %c0_3 = arith.constant 0 : index
    %c0_4 = arith.constant 0 : index
    %12 = vector.load %arg0[%c0_3, %c0_4] : memref<8x64xf32, #tpu.memory_space<vmem>>, vector<8x32xf32>
    %c0_5 = arith.constant 0 : index
    %c0_6 = arith.constant 0 : index
    %13 = vector.load %arg1[%c0_5, %c0_6] : memref<16x64xf32, #tpu.memory_space<vmem>>, vector<16x32xf32>
    %c0_7 = arith.constant 0 : index
    %c0_8 = arith.constant 0 : index
    %14 = vector.load %arg2[%c0_7, %c0_8] : memref<8x64xf32, #tpu.memory_space<vmem>>, vector<8x32xf32>
    %15 = arith.addf %12, %14 : vector<8x32xf32>
    %c0_9 = arith.constant 0 : index
    %c0_10 = arith.constant 0 : index
    %16 = vector.load %arg3[%c0_9, %c0_10] : memref<16x64xf32, #tpu.memory_space<vmem>>, vector<16x32xf32>
    %17 = arith.addf %13, %16 : vector<16x32xf32>
    %cst = arith.constant dense<0.000000e+00> : vector<8x32xf32>
    %18 = tpu.matmul %15, %2, %cst {dimension_numbers = #tpu.dot_dimension_numbers<[1], [0], [0], [1], [0, 0, 1, 1], [], []>, precision = #tpu.contract_precision<fp32>} : vector<8x32xf32>, vector<32x32xf32>, vector<8x32xf32> -> vector<8x32xf32>
    %19 = vector.broadcast %6 : vector<1x32xf32> to vector<8x32xf32>
    %20 = arith.addf %18, %19 : vector<8x32xf32>
    %cst_11 = arith.constant dense<0.000000e+00> : vector<16x32xf32>
    %21 = tpu.matmul %17, %3, %cst_11 {dimension_numbers = #tpu.dot_dimension_numbers<[1], [0], [0], [1], [0, 0, 1, 1], [], []>, precision = #tpu.contract_precision<fp32>} : vector<16x32xf32>, vector<32x32xf32>, vector<16x32xf32> -> vector<16x32xf32>
    %22 = vector.broadcast %7 : vector<1x32xf32> to vector<16x32xf32>
    %23 = arith.addf %21, %22 : vector<16x32xf32>
    %cst_12 = arith.constant dense<0.000000e+00> : vector<16x32xf32>
    %24 = tpu.matmul %13, %4, %cst_12 {dimension_numbers = #tpu.dot_dimension_numbers<[1], [0], [0], [1], [0, 0, 1, 1], [], []>, precision = #tpu.contract_precision<fp32>} : vector<16x32xf32>, vector<32x32xf32>, vector<16x32xf32> -> vector<16x32xf32>
    %25 = vector.broadcast %8 : vector<1x32xf32> to vector<16x32xf32>
    %26 = arith.addf %24, %25 : vector<16x32xf32>
    %27 = vector.extract_strided_slice %20 {offsets = [0, 0], sizes = [8, 8], strides = [1, 1]} : vector<8x32xf32> to vector<8x8xf32>
    %28 = vector.extract_strided_slice %23 {offsets = [0, 0], sizes = [16, 8], strides = [1, 1]} : vector<16x32xf32> to vector<16x8xf32>
    %cst_13 = arith.constant dense<0.000000e+00> : vector<8x16xf32>
    %29 = tpu.matmul %27, %28, %cst_13 {dimension_numbers = #tpu.dot_dimension_numbers<[1], [1], [0], [0], [0, 0, 1, 0], [], []>, precision = #tpu.contract_precision<fp32>} : vector<8x8xf32>, vector<16x8xf32>, vector<8x16xf32> -> vector<8x16xf32>
    %cst_14 = arith.constant dense<0xFF800000> : vector<8xf32>
    %30 = vector.multi_reduction <maximumf>, %29, %cst_14 [1] : vector<8x16xf32> to vector<8xf32>
    %31 = vector.shape_cast %30 : vector<8xf32> to vector<8x1xf32>
    %32 = vector.broadcast %31 : vector<8x1xf32> to vector<8x16xf32>
    %33 = arith.subf %29, %32 : vector<8x16xf32>
    %34 = math.exp %33 : vector<8x16xf32>
    %cst_15 = arith.constant dense<0.000000e+00> : vector<8xf32>
    %35 = vector.multi_reduction <add>, %34, %cst_15 [1] : vector<8x16xf32> to vector<8xf32>
    %36 = vector.shape_cast %35 : vector<8xf32> to vector<8x1xf32>
    %37 = vector.broadcast %36 : vector<8x1xf32> to vector<8x16xf32>
    %38 = arith.divf %34, %37 : vector<8x16xf32>
    %39 = vector.extract_strided_slice %26 {offsets = [0, 0], sizes = [16, 8], strides = [1, 1]} : vector<16x32xf32> to vector<16x8xf32>
    %cst_16 = arith.constant dense<0.000000e+00> : vector<8x8xf32>
    %40 = tpu.matmul %38, %39, %cst_16 {dimension_numbers = #tpu.dot_dimension_numbers<[1], [0], [0], [1], [0, 0, 1, 1], [], []>, precision = #tpu.contract_precision<fp32>} : vector<8x16xf32>, vector<16x8xf32>, vector<8x8xf32> -> vector<8x8xf32>
    %41 = vector.extract_strided_slice %20 {offsets = [0, 8], sizes = [8, 8], strides = [1, 1]} : vector<8x32xf32> to vector<8x8xf32>
    %42 = vector.extract_strided_slice %23 {offsets = [0, 8], sizes = [16, 8], strides = [1, 1]} : vector<16x32xf32> to vector<16x8xf32>
    %cst_17 = arith.constant dense<0.000000e+00> : vector<8x16xf32>
    %43 = tpu.matmul %41, %42, %cst_17 {dimension_numbers = #tpu.dot_dimension_numbers<[1], [1], [0], [0], [0, 0, 1, 0], [], []>, precision = #tpu.contract_precision<fp32>} : vector<8x8xf32>, vector<16x8xf32>, vector<8x16xf32> -> vector<8x16xf32>
    %cst_18 = arith.constant dense<0xFF800000> : vector<8xf32>
    %44 = vector.multi_reduction <maximumf>, %43, %cst_18 [1] : vector<8x16xf32> to vector<8xf32>
    %45 = vector.shape_cast %44 : vector<8xf32> to vector<8x1xf32>
    %46 = vector.broadcast %45 : vector<8x1xf32> to vector<8x16xf32>
    %47 = arith.subf %43, %46 : vector<8x16xf32>
    %48 = math.exp %47 : vector<8x16xf32>
    %cst_19 = arith.constant dense<0.000000e+00> : vector<8xf32>
    %49 = vector.multi_reduction <add>, %48, %cst_19 [1] : vector<8x16xf32> to vector<8xf32>
    %50 = vector.shape_cast %49 : vector<8xf32> to vector<8x1xf32>
    %51 = vector.broadcast %50 : vector<8x1xf32> to vector<8x16xf32>
    %52 = arith.divf %48, %51 : vector<8x16xf32>
    %53 = vector.extract_strided_slice %26 {offsets = [0, 8], sizes = [16, 8], strides = [1, 1]} : vector<16x32xf32> to vector<16x8xf32>
    %cst_20 = arith.constant dense<0.000000e+00> : vector<8x8xf32>
    %54 = tpu.matmul %52, %53, %cst_20 {dimension_numbers = #tpu.dot_dimension_numbers<[1], [0], [0], [1], [0, 0, 1, 1], [], []>, precision = #tpu.contract_precision<fp32>} : vector<8x16xf32>, vector<16x8xf32>, vector<8x8xf32> -> vector<8x8xf32>
    %55 = vector.extract_strided_slice %20 {offsets = [0, 16], sizes = [8, 8], strides = [1, 1]} : vector<8x32xf32> to vector<8x8xf32>
    %56 = vector.extract_strided_slice %23 {offsets = [0, 16], sizes = [16, 8], strides = [1, 1]} : vector<16x32xf32> to vector<16x8xf32>
    %cst_21 = arith.constant dense<0.000000e+00> : vector<8x16xf32>
    %57 = tpu.matmul %55, %56, %cst_21 {dimension_numbers = #tpu.dot_dimension_numbers<[1], [1], [0], [0], [0, 0, 1, 0], [], []>, precision = #tpu.contract_precision<fp32>} : vector<8x8xf32>, vector<16x8xf32>, vector<8x16xf32> -> vector<8x16xf32>
    %cst_22 = arith.constant dense<0xFF800000> : vector<8xf32>
    %58 = vector.multi_reduction <maximumf>, %57, %cst_22 [1] : vector<8x16xf32> to vector<8xf32>
    %59 = vector.shape_cast %58 : vector<8xf32> to vector<8x1xf32>
    %60 = vector.broadcast %59 : vector<8x1xf32> to vector<8x16xf32>
    %61 = arith.subf %57, %60 : vector<8x16xf32>
    %62 = math.exp %61 : vector<8x16xf32>
    %cst_23 = arith.constant dense<0.000000e+00> : vector<8xf32>
    %63 = vector.multi_reduction <add>, %62, %cst_23 [1] : vector<8x16xf32> to vector<8xf32>
    %64 = vector.shape_cast %63 : vector<8xf32> to vector<8x1xf32>
    %65 = vector.broadcast %64 : vector<8x1xf32> to vector<8x16xf32>
    %66 = arith.divf %62, %65 : vector<8x16xf32>
    %67 = vector.extract_strided_slice %26 {offsets = [0, 16], sizes = [16, 8], strides = [1, 1]} : vector<16x32xf32> to vector<16x8xf32>
    %cst_24 = arith.constant dense<0.000000e+00> : vector<8x8xf32>
    %68 = tpu.matmul %66, %67, %cst_24 {dimension_numbers = #tpu.dot_dimension_numbers<[1], [0], [0], [1], [0, 0, 1, 1], [], []>, precision = #tpu.contract_precision<fp32>} : vector<8x16xf32>, vector<16x8xf32>, vector<8x8xf32> -> vector<8x8xf32>
    %69 = vector.extract_strided_slice %20 {offsets = [0, 24], sizes = [8, 8], strides = [1, 1]} : vector<8x32xf32> to vector<8x8xf32>
    %70 = vector.extract_strided_slice %23 {offsets = [0, 24], sizes = [16, 8], strides = [1, 1]} : vector<16x32xf32> to vector<16x8xf32>
    %cst_25 = arith.constant dense<0.000000e+00> : vector<8x16xf32>
    %71 = tpu.matmul %69, %70, %cst_25 {dimension_numbers = #tpu.dot_dimension_numbers<[1], [1], [0], [0], [0, 0, 1, 0], [], []>, precision = #tpu.contract_precision<fp32>} : vector<8x8xf32>, vector<16x8xf32>, vector<8x16xf32> -> vector<8x16xf32>
    %cst_26 = arith.constant dense<0xFF800000> : vector<8xf32>
    %72 = vector.multi_reduction <maximumf>, %71, %cst_26 [1] : vector<8x16xf32> to vector<8xf32>
    %73 = vector.shape_cast %72 : vector<8xf32> to vector<8x1xf32>
    %74 = vector.broadcast %73 : vector<8x1xf32> to vector<8x16xf32>
    %75 = arith.subf %71, %74 : vector<8x16xf32>
    %76 = math.exp %75 : vector<8x16xf32>
    %cst_27 = arith.constant dense<0.000000e+00> : vector<8xf32>
    %77 = vector.multi_reduction <add>, %76, %cst_27 [1] : vector<8x16xf32> to vector<8xf32>
    %78 = vector.shape_cast %77 : vector<8xf32> to vector<8x1xf32>
    %79 = vector.broadcast %78 : vector<8x1xf32> to vector<8x16xf32>
    %80 = arith.divf %76, %79 : vector<8x16xf32>
    %81 = vector.extract_strided_slice %26 {offsets = [0, 24], sizes = [16, 8], strides = [1, 1]} : vector<16x32xf32> to vector<16x8xf32>
    %cst_28 = arith.constant dense<0.000000e+00> : vector<8x8xf32>
    %82 = tpu.matmul %80, %81, %cst_28 {dimension_numbers = #tpu.dot_dimension_numbers<[1], [0], [0], [1], [0, 0, 1, 1], [], []>, precision = #tpu.contract_precision<fp32>} : vector<8x16xf32>, vector<16x8xf32>, vector<8x8xf32> -> vector<8x8xf32>
    %83 = tpu.concatenate %40, %54, %68, %82 in 1 : vector<8x8xf32>, vector<8x8xf32>, vector<8x8xf32>, vector<8x8xf32> -> vector<8x32xf32>
    %cst_29 = arith.constant dense<0.000000e+00> : vector<8x32xf32>
    %84 = tpu.matmul %83, %5, %cst_29 {dimension_numbers = #tpu.dot_dimension_numbers<[1], [0], [0], [1], [0, 0, 1, 1], [], []>, precision = #tpu.contract_precision<fp32>} : vector<8x32xf32>, vector<32x32xf32>, vector<8x32xf32> -> vector<8x32xf32>
    %85 = vector.broadcast %9 : vector<1x32xf32> to vector<8x32xf32>
    %86 = arith.addf %84, %85 : vector<8x32xf32>
    %87 = arith.addf %12, %86 : vector<8x32xf32>
    %cst_30 = arith.constant dense<0.000000e+00> : vector<8xf32>
    %88 = vector.multi_reduction <add>, %87, %cst_30 [1] : vector<8x32xf32> to vector<8xf32>
    %89 = vector.shape_cast %88 : vector<8xf32> to vector<8x1xf32>
    %cst_31 = arith.constant 3.200000e+01 : f32
    %90 = vector.broadcast %cst_31 : f32 to vector<8x1xf32>
    %91 = arith.divf %89, %90 : vector<8x1xf32>
    %92 = vector.broadcast %91 : vector<8x1xf32> to vector<8x32xf32>
    %93 = arith.subf %87, %92 : vector<8x32xf32>
    %94 = arith.mulf %93, %93 : vector<8x32xf32>
    %cst_32 = arith.constant dense<0.000000e+00> : vector<8xf32>
    %95 = vector.multi_reduction <add>, %94, %cst_32 [1] : vector<8x32xf32> to vector<8xf32>
    %96 = vector.shape_cast %95 : vector<8xf32> to vector<8x1xf32>
    %cst_33 = arith.constant 3.200000e+01 : f32
    %97 = vector.broadcast %cst_33 : f32 to vector<8x1xf32>
    %98 = arith.divf %96, %97 : vector<8x1xf32>
    %99 = vector.broadcast %91 : vector<8x1xf32> to vector<8x32xf32>
    %100 = arith.subf %87, %99 : vector<8x32xf32>
    %cst_34 = arith.constant 9.99999974E-6 : f32
    %101 = vector.broadcast %cst_34 : f32 to vector<8x1xf32>
    %102 = arith.addf %98, %101 : vector<8x1xf32>
    %103 = math.rsqrt %102 : vector<8x1xf32>
    %104 = vector.broadcast %103 : vector<8x1xf32> to vector<8x32xf32>
    %105 = arith.mulf %100, %104 : vector<8x32xf32>
    %106 = vector.broadcast %10 : vector<1x32xf32> to vector<8x32xf32>
    %107 = arith.mulf %105, %106 : vector<8x32xf32>
    %108 = vector.broadcast %11 : vector<1x32xf32> to vector<8x32xf32>
    %109 = arith.addf %107, %108 : vector<8x32xf32>
    %c0_35 = arith.constant 0 : index
    %c32 = arith.constant 32 : index
    %110 = vector.load %arg0[%c0_35, %c32] : memref<8x64xf32, #tpu.memory_space<vmem>>, vector<8x32xf32>
    %c0_36 = arith.constant 0 : index
    %c32_37 = arith.constant 32 : index
    %111 = vector.load %arg1[%c0_36, %c32_37] : memref<16x64xf32, #tpu.memory_space<vmem>>, vector<16x32xf32>
    %c0_38 = arith.constant 0 : index
    %c32_39 = arith.constant 32 : index
    %112 = vector.load %arg2[%c0_38, %c32_39] : memref<8x64xf32, #tpu.memory_space<vmem>>, vector<8x32xf32>
    %113 = arith.addf %110, %112 : vector<8x32xf32>
    %c0_40 = arith.constant 0 : index
    %c32_41 = arith.constant 32 : index
    %114 = vector.load %arg3[%c0_40, %c32_41] : memref<16x64xf32, #tpu.memory_space<vmem>>, vector<16x32xf32>
    %115 = arith.addf %111, %114 : vector<16x32xf32>
    %cst_42 = arith.constant dense<0.000000e+00> : vector<8x32xf32>
    %116 = tpu.matmul %113, %2, %cst_42 {dimension_numbers = #tpu.dot_dimension_numbers<[1], [0], [0], [1], [0, 0, 1, 1], [], []>, precision = #tpu.contract_precision<fp32>} : vector<8x32xf32>, vector<32x32xf32>, vector<8x32xf32> -> vector<8x32xf32>
    %117 = vector.broadcast %6 : vector<1x32xf32> to vector<8x32xf32>
    %118 = arith.addf %116, %117 : vector<8x32xf32>
    %cst_43 = arith.constant dense<0.000000e+00> : vector<16x32xf32>
    %119 = tpu.matmul %115, %3, %cst_43 {dimension_numbers = #tpu.dot_dimension_numbers<[1], [0], [0], [1], [0, 0, 1, 1], [], []>, precision = #tpu.contract_precision<fp32>} : vector<16x32xf32>, vector<32x32xf32>, vector<16x32xf32> -> vector<16x32xf32>
    %120 = vector.broadcast %7 : vector<1x32xf32> to vector<16x32xf32>
    %121 = arith.addf %119, %120 : vector<16x32xf32>
    %cst_44 = arith.constant dense<0.000000e+00> : vector<16x32xf32>
    %122 = tpu.matmul %111, %4, %cst_44 {dimension_numbers = #tpu.dot_dimension_numbers<[1], [0], [0], [1], [0, 0, 1, 1], [], []>, precision = #tpu.contract_precision<fp32>} : vector<16x32xf32>, vector<32x32xf32>, vector<16x32xf32> -> vector<16x32xf32>
    %123 = vector.broadcast %8 : vector<1x32xf32> to vector<16x32xf32>
    %124 = arith.addf %122, %123 : vector<16x32xf32>
    %125 = vector.extract_strided_slice %118 {offsets = [0, 0], sizes = [8, 8], strides = [1, 1]} : vector<8x32xf32> to vector<8x8xf32>
    %126 = vector.extract_strided_slice %121 {offsets = [0, 0], sizes = [16, 8], strides = [1, 1]} : vector<16x32xf32> to vector<16x8xf32>
    %cst_45 = arith.constant dense<0.000000e+00> : vector<8x16xf32>
    %127 = tpu.matmul %125, %126, %cst_45 {dimension_numbers = #tpu.dot_dimension_numbers<[1], [1], [0], [0], [0, 0, 1, 0], [], []>, precision = #tpu.contract_precision<fp32>} : vector<8x8xf32>, vector<16x8xf32>, vector<8x16xf32> -> vector<8x16xf32>
    %cst_46 = arith.constant dense<0xFF800000> : vector<8xf32>
    %128 = vector.multi_reduction <maximumf>, %127, %cst_46 [1] : vector<8x16xf32> to vector<8xf32>
    %129 = vector.shape_cast %128 : vector<8xf32> to vector<8x1xf32>
    %130 = vector.broadcast %129 : vector<8x1xf32> to vector<8x16xf32>
    %131 = arith.subf %127, %130 : vector<8x16xf32>
    %132 = math.exp %131 : vector<8x16xf32>
    %cst_47 = arith.constant dense<0.000000e+00> : vector<8xf32>
    %133 = vector.multi_reduction <add>, %132, %cst_47 [1] : vector<8x16xf32> to vector<8xf32>
    %134 = vector.shape_cast %133 : vector<8xf32> to vector<8x1xf32>
    %135 = vector.broadcast %134 : vector<8x1xf32> to vector<8x16xf32>
    %136 = arith.divf %132, %135 : vector<8x16xf32>
    %137 = vector.extract_strided_slice %124 {offsets = [0, 0], sizes = [16, 8], strides = [1, 1]} : vector<16x32xf32> to vector<16x8xf32>
    %cst_48 = arith.constant dense<0.000000e+00> : vector<8x8xf32>
    %138 = tpu.matmul %136, %137, %cst_48 {dimension_numbers = #tpu.dot_dimension_numbers<[1], [0], [0], [1], [0, 0, 1, 1], [], []>, precision = #tpu.contract_precision<fp32>} : vector<8x16xf32>, vector<16x8xf32>, vector<8x8xf32> -> vector<8x8xf32>
    %139 = vector.extract_strided_slice %118 {offsets = [0, 8], sizes = [8, 8], strides = [1, 1]} : vector<8x32xf32> to vector<8x8xf32>
    %140 = vector.extract_strided_slice %121 {offsets = [0, 8], sizes = [16, 8], strides = [1, 1]} : vector<16x32xf32> to vector<16x8xf32>
    %cst_49 = arith.constant dense<0.000000e+00> : vector<8x16xf32>
    %141 = tpu.matmul %139, %140, %cst_49 {dimension_numbers = #tpu.dot_dimension_numbers<[1], [1], [0], [0], [0, 0, 1, 0], [], []>, precision = #tpu.contract_precision<fp32>} : vector<8x8xf32>, vector<16x8xf32>, vector<8x16xf32> -> vector<8x16xf32>
    %cst_50 = arith.constant dense<0xFF800000> : vector<8xf32>
    %142 = vector.multi_reduction <maximumf>, %141, %cst_50 [1] : vector<8x16xf32> to vector<8xf32>
    %143 = vector.shape_cast %142 : vector<8xf32> to vector<8x1xf32>
    %144 = vector.broadcast %143 : vector<8x1xf32> to vector<8x16xf32>
    %145 = arith.subf %141, %144 : vector<8x16xf32>
    %146 = math.exp %145 : vector<8x16xf32>
    %cst_51 = arith.constant dense<0.000000e+00> : vector<8xf32>
    %147 = vector.multi_reduction <add>, %146, %cst_51 [1] : vector<8x16xf32> to vector<8xf32>
    %148 = vector.shape_cast %147 : vector<8xf32> to vector<8x1xf32>
    %149 = vector.broadcast %148 : vector<8x1xf32> to vector<8x16xf32>
    %150 = arith.divf %146, %149 : vector<8x16xf32>
    %151 = vector.extract_strided_slice %124 {offsets = [0, 8], sizes = [16, 8], strides = [1, 1]} : vector<16x32xf32> to vector<16x8xf32>
    %cst_52 = arith.constant dense<0.000000e+00> : vector<8x8xf32>
    %152 = tpu.matmul %150, %151, %cst_52 {dimension_numbers = #tpu.dot_dimension_numbers<[1], [0], [0], [1], [0, 0, 1, 1], [], []>, precision = #tpu.contract_precision<fp32>} : vector<8x16xf32>, vector<16x8xf32>, vector<8x8xf32> -> vector<8x8xf32>
    %153 = vector.extract_strided_slice %118 {offsets = [0, 16], sizes = [8, 8], strides = [1, 1]} : vector<8x32xf32> to vector<8x8xf32>
    %154 = vector.extract_strided_slice %121 {offsets = [0, 16], sizes = [16, 8], strides = [1, 1]} : vector<16x32xf32> to vector<16x8xf32>
    %cst_53 = arith.constant dense<0.000000e+00> : vector<8x16xf32>
    %155 = tpu.matmul %153, %154, %cst_53 {dimension_numbers = #tpu.dot_dimension_numbers<[1], [1], [0], [0], [0, 0, 1, 0], [], []>, precision = #tpu.contract_precision<fp32>} : vector<8x8xf32>, vector<16x8xf32>, vector<8x16xf32> -> vector<8x16xf32>
    %cst_54 = arith.constant dense<0xFF800000> : vector<8xf32>
    %156 = vector.multi_reduction <maximumf>, %155, %cst_54 [1] : vector<8x16xf32> to vector<8xf32>
    %157 = vector.shape_cast %156 : vector<8xf32> to vector<8x1xf32>
    %158 = vector.broadcast %157 : vector<8x1xf32> to vector<8x16xf32>
    %159 = arith.subf %155, %158 : vector<8x16xf32>
    %160 = math.exp %159 : vector<8x16xf32>
    %cst_55 = arith.constant dense<0.000000e+00> : vector<8xf32>
    %161 = vector.multi_reduction <add>, %160, %cst_55 [1] : vector<8x16xf32> to vector<8xf32>
    %162 = vector.shape_cast %161 : vector<8xf32> to vector<8x1xf32>
    %163 = vector.broadcast %162 : vector<8x1xf32> to vector<8x16xf32>
    %164 = arith.divf %160, %163 : vector<8x16xf32>
    %165 = vector.extract_strided_slice %124 {offsets = [0, 16], sizes = [16, 8], strides = [1, 1]} : vector<16x32xf32> to vector<16x8xf32>
    %cst_56 = arith.constant dense<0.000000e+00> : vector<8x8xf32>
    %166 = tpu.matmul %164, %165, %cst_56 {dimension_numbers = #tpu.dot_dimension_numbers<[1], [0], [0], [1], [0, 0, 1, 1], [], []>, precision = #tpu.contract_precision<fp32>} : vector<8x16xf32>, vector<16x8xf32>, vector<8x8xf32> -> vector<8x8xf32>
    %167 = vector.extract_strided_slice %118 {offsets = [0, 24], sizes = [8, 8], strides = [1, 1]} : vector<8x32xf32> to vector<8x8xf32>
    %168 = vector.extract_strided_slice %121 {offsets = [0, 24], sizes = [16, 8], strides = [1, 1]} : vector<16x32xf32> to vector<16x8xf32>
    %cst_57 = arith.constant dense<0.000000e+00> : vector<8x16xf32>
    %169 = tpu.matmul %167, %168, %cst_57 {dimension_numbers = #tpu.dot_dimension_numbers<[1], [1], [0], [0], [0, 0, 1, 0], [], []>, precision = #tpu.contract_precision<fp32>} : vector<8x8xf32>, vector<16x8xf32>, vector<8x16xf32> -> vector<8x16xf32>
    %cst_58 = arith.constant dense<0xFF800000> : vector<8xf32>
    %170 = vector.multi_reduction <maximumf>, %169, %cst_58 [1] : vector<8x16xf32> to vector<8xf32>
    %171 = vector.shape_cast %170 : vector<8xf32> to vector<8x1xf32>
    %172 = vector.broadcast %171 : vector<8x1xf32> to vector<8x16xf32>
    %173 = arith.subf %169, %172 : vector<8x16xf32>
    %174 = math.exp %173 : vector<8x16xf32>
    %cst_59 = arith.constant dense<0.000000e+00> : vector<8xf32>
    %175 = vector.multi_reduction <add>, %174, %cst_59 [1] : vector<8x16xf32> to vector<8xf32>
    %176 = vector.shape_cast %175 : vector<8xf32> to vector<8x1xf32>
    %177 = vector.broadcast %176 : vector<8x1xf32> to vector<8x16xf32>
    %178 = arith.divf %174, %177 : vector<8x16xf32>
    %179 = vector.extract_strided_slice %124 {offsets = [0, 24], sizes = [16, 8], strides = [1, 1]} : vector<16x32xf32> to vector<16x8xf32>
    %cst_60 = arith.constant dense<0.000000e+00> : vector<8x8xf32>
    %180 = tpu.matmul %178, %179, %cst_60 {dimension_numbers = #tpu.dot_dimension_numbers<[1], [0], [0], [1], [0, 0, 1, 1], [], []>, precision = #tpu.contract_precision<fp32>} : vector<8x16xf32>, vector<16x8xf32>, vector<8x8xf32> -> vector<8x8xf32>
    %181 = tpu.concatenate %138, %152, %166, %180 in 1 : vector<8x8xf32>, vector<8x8xf32>, vector<8x8xf32>, vector<8x8xf32> -> vector<8x32xf32>
    %cst_61 = arith.constant dense<0.000000e+00> : vector<8x32xf32>
    %182 = tpu.matmul %181, %5, %cst_61 {dimension_numbers = #tpu.dot_dimension_numbers<[1], [0], [0], [1], [0, 0, 1, 1], [], []>, precision = #tpu.contract_precision<fp32>} : vector<8x32xf32>, vector<32x32xf32>, vector<8x32xf32> -> vector<8x32xf32>
    %183 = vector.broadcast %9 : vector<1x32xf32> to vector<8x32xf32>
    %184 = arith.addf %182, %183 : vector<8x32xf32>
    %185 = arith.addf %110, %184 : vector<8x32xf32>
    %cst_62 = arith.constant dense<0.000000e+00> : vector<8xf32>
    %186 = vector.multi_reduction <add>, %185, %cst_62 [1] : vector<8x32xf32> to vector<8xf32>
    %187 = vector.shape_cast %186 : vector<8xf32> to vector<8x1xf32>
    %cst_63 = arith.constant 3.200000e+01 : f32
    %188 = vector.broadcast %cst_63 : f32 to vector<8x1xf32>
    %189 = arith.divf %187, %188 : vector<8x1xf32>
    %190 = vector.broadcast %189 : vector<8x1xf32> to vector<8x32xf32>
    %191 = arith.subf %185, %190 : vector<8x32xf32>
    %192 = arith.mulf %191, %191 : vector<8x32xf32>
    %cst_64 = arith.constant dense<0.000000e+00> : vector<8xf32>
    %193 = vector.multi_reduction <add>, %192, %cst_64 [1] : vector<8x32xf32> to vector<8xf32>
    %194 = vector.shape_cast %193 : vector<8xf32> to vector<8x1xf32>
    %cst_65 = arith.constant 3.200000e+01 : f32
    %195 = vector.broadcast %cst_65 : f32 to vector<8x1xf32>
    %196 = arith.divf %194, %195 : vector<8x1xf32>
    %197 = vector.broadcast %189 : vector<8x1xf32> to vector<8x32xf32>
    %198 = arith.subf %185, %197 : vector<8x32xf32>
    %cst_66 = arith.constant 9.99999974E-6 : f32
    %199 = vector.broadcast %cst_66 : f32 to vector<8x1xf32>
    %200 = arith.addf %196, %199 : vector<8x1xf32>
    %201 = math.rsqrt %200 : vector<8x1xf32>
    %202 = vector.broadcast %201 : vector<8x1xf32> to vector<8x32xf32>
    %203 = arith.mulf %198, %202 : vector<8x32xf32>
    %204 = vector.broadcast %10 : vector<1x32xf32> to vector<8x32xf32>
    %205 = arith.mulf %203, %204 : vector<8x32xf32>
    %206 = vector.broadcast %11 : vector<1x32xf32> to vector<8x32xf32>
    %207 = arith.addf %205, %206 : vector<8x32xf32>
    %208 = tpu.concatenate %109, %207 in 1 : vector<8x32xf32>, vector<8x32xf32> -> vector<8x64xf32>
    %c0_67 = arith.constant 0 : index
    %c0_68 = arith.constant 0 : index
    %209 = vector.load %arg6[%c0_67, %c0_68] : memref<8x64xf32, #tpu.memory_space<vmem>>, vector<8x64xf32>
    tpu.vector_store %arg6[%c0_67, %c0_68], %208 {strides = array<i32>} : memref<8x64xf32, #tpu.memory_space<vmem>>, vector<8x64xf32>,
    return
  }
}

</mosaic_0001>

<bundles_post_ra>
// kernel: cross_attention_layer.1
= control target key start
LH: loop header
LB: loop body
LE: loop exit
PB: predicated region body
PF: predicated region fallthrough
CT: control target
= control target key end

     0   :  { %s4793_s27 = smov 96   ;;  %s4794_s30 = smov 64   ;;  %vm38_vm0 = vcmask 261120   ;;  %vm701_vm1 = vcmask 64512   ;;  %vm870_vm2 = vcmask 130048   ;;  %s5763_s4 = inlined_call_operand.vmem [shape: f32[32,128], index: 4, kind: input, shape index: {}]   ;;  %s5764_s0 = inlined_call_operand.vmem [shape: f32[8,64], index: 0, kind: input, shape index: {}]   ;;  %s5765_s2 = inlined_call_operand.vmem [shape: f32[8,64], index: 2, kind: input, shape index: {}]   ;;  %s5766_s1 = inlined_call_operand.vmem [shape: f32[16,64], index: 1, kind: input, shape index: {}]   ;;  %s5767_s3 = inlined_call_operand.vmem [shape: f32[16,64], index: 3, kind: input, shape index: {}]   ;;  %s5768_s5 = inlined_call_operand.vmem [shape: f32[8,32], index: 5, kind: input, shape index: {}]   ;;  %s5769_s6 = inlined_call_operand.vmem [shape: f32[8,64], index: 6, kind: output, shape index: {}]  }
   0x1   :  { %v26_v0 = vld [vmem:[%s5763_s4 + $0x18] sm:$0xff]  ;;  %v24_v1 = vld [vmem:[%s5763_s4 + $0x8] sm:$0xff]  ;;  %v25_v2 = vld [vmem:[%s5763_s4 + $0x10] sm:$0xff]  ;;  %s4795_s19 = smov 120   ;;  %s4796_s20 = smov 112  }
   0x2   :  { %238 = vrot.lane.b32.xlu0 %v26_v0, %s4793_s27  ;;  %v4848_v3 = vand.u32 4294901760, %v26_v0  ;;  %234 = vrot.lane.b32.xlu1 %v24_v1, %s4793_s27  ;;  %v4851_v4 = vand.u32 4294901760, %v24_v1  ;;  %v4853_v5 = vand.u32 4294901760, %v25_v2  ;;  %v23_v6 = vld [vmem:[%s5763_s4] sm:$0xff]  ;;  %v4956_v37 = vld [vmem:[%s5766_s1 + $0x8] sm:$0xff]  ;;  %s4797_s21 = smov 104  }
   0x3   :  { %v4858_v7 = vand.u32 4294901760, %v23_v6  ;;  %473 = vrot.lane.b32.xlu2 %v26_v0, %s4794_s30  ;;  %v28_v24 = vld [vmem:[%s5764_s0] sm:$0xff]  ;;  %v34_v38 = vld [vmem:[%s5767_s3 + $0x8] sm:$0xff]  ;;  %s4798_s24 = smov 32   ;;  %s4799_s25 = smov 16  }
   0x4   :  { %v4862_v8 = vsub.f32 %v26_v0, %v4848_v3  ;;  %55 = vmatpush.msra.mxu0 %v4848_v3  ;;  %v4866_v9 = vsub.f32 %v25_v2, %v4853_v5  ;;  %v4869_v10 = vsub.f32 %v24_v1, %v4851_v4  ;;  %155 = vmatpush.msra.mxu3 %v4848_v3  ;;  %v31_v25 = vld [vmem:[%s5765_s2] sm:$0xff]  ;;  %s4800_s9 = smov 8  }
   0x5   :  { %v4873_v11 = vsub.f32 %v23_v6, %v4858_v7  ;;  %v4936_v26 = vadd.f32 %v31_v25, %v28_v24  ;;  %v4943_v33 = vld [vmem:[%s5766_s1] sm:$0xff]  ;;  %v4964_v40 = vadd.f32 %v34_v38, %v4956_v37 }
   0x6   :  { %5814 = vst [vmem:[#allocation2_spill] sm:$0xff] %v4869_v10  ;;  %v4876_v12 = vand.u32 4294901760, %v4862_v8  ;;  %v4879_v13 = vand.u32 4294901760, %v4866_v9  ;;  %57 = vmatpush.msra.mxu0 %v4853_v5  ;;  %v4883_v14 = vand.u32 4294901760, %v4869_v10  ;;  %126 = vmatpush.msra.mxu2 %v4862_v8  ;;  %v33_v34 = vld [vmem:[%s5767_s3] sm:$0xff] }
   0x7   :  { %5815 = vst [vmem:[#allocation3_spill] sm:$0xff] %v4873_v11  ;;  %v4887_v15 = vand.u32 4294901760, %v4873_v11  ;;  %157 = vmatpush.msra.mxu3 %v4853_v5  ;;  %v40_v27 = vsel %vm38_vm0, %v4936_v26, 0  ;;  %v4949_v35 = vadd.f32 %v33_v34, %v4943_v33  ;;  %v248_v45 = vsel %vm38_vm0, %v4964_v40, 0 }
   0x8   :  { %v86_v16 = vsub.f32 %v4862_v8, %v4876_v12  ;;  %v92_v17 = vsub.f32 %v4866_v9, %v4879_v13  ;;  %v98_v18 = vsub.f32 %v4869_v10, %v4883_v14  ;;  %59 = vmatpush.msra.mxu0 %v4851_v4  ;;  %129 = vmatpush.msra.mxu2 %v4866_v9  ;;  %v62_v28 = vand.u32 4294901760, %v40_v27 }
   0x9   :  { %159 = vmatpush.msra.mxu3 %v4851_v4  ;;  %v104_v21 = vsub.f32 %v4873_v11, %v4887_v15  ;;  %v245_v36 = vsel %vm38_vm0, %v4949_v35, 0  ;;  %v4978_v49 = vand.u32 4294901760, %v248_v45 }
   0xa   :  { %236 = vrot.lane.b32.xlu0 %v25_v2, %s4793_s27  ;;  %232 = vrot.lane.b32.xlu1 %v23_v6, %s4793_s27  ;;  %v4901_v19 = vand.u32 4294901760, %v86_v16  ;;  %v4903_v20 = vand.u32 4294901760, %v92_v17  ;;  %v4910_v22 = vand.u32 4294901760, %v98_v18  ;;  %v63_v29 = vsub.f32 %v40_v27, %v62_v28 }
   0xb   :  { %61 = vmatpush.msra.mxu0 %v4858_v7  ;;  %132 = vmatpush.msra.mxu2 %v4869_v10  ;;  %v4916_v23 = vand.u32 4294901760, %v104_v21  ;;  %v4961_v39 = vand.u32 4294901760, %v245_v36  ;;  %v279_v56 = vsub.f32 %v248_v45, %v4978_v49 }
   0xc   :  { %88 = vmatpush.msra.mxu1 %v4901_v19  ;;  %161 = vmatpush.msra.mxu3 %v4858_v7  ;;  %v64_v30 = vand.u32 4294901760, %v63_v29 }
   0xd   :  { %184 = vmatpush.msrb.mxu0 %v4876_v12  ;;  %135 = vmatpush.msra.mxu2 %v4873_v11  ;;  %v271_v43 = vsub.f32 %v245_v36, %v4961_v39  ;;  %v280_v0 = vand.u32 4294901760, %v279_v56 }
   0xe   :  { %94 = vmatpush.msra.mxu1 %v4903_v20  ;;  %471 = vrot.lane.b32.xlu2 %v25_v2, %s4794_s30  ;;  %v65_v31 = vsub.f32 %v63_v29, %v64_v30 }
   0xf   :  { %188 = vmatpush.msrb.mxu0 %v4879_v13  ;;  %138 = vmatmul.f32.vlgmr.msra.gmra.mxu2 %v63_v29  ;;  %v272_v48 = vand.u32 4294901760, %v271_v43  ;;  %v281_v17 = vsub.f32 %v279_v56, %v280_v0 }
  0x10   :  { %100 = vmatpush.msra.mxu1 %v4910_v22  ;;  %165 = vmatmul.f32.vlgmr.msra.gmra.mxu3 %v64_v30  ;;  %v66_v32 = vand.u32 4294901760, %v65_v31 }
  0x11   :  { %192 = vmatpush.msrb.mxu0 %v4883_v14  ;;  %v273_v55 = vsub.f32 %v271_v43, %v272_v48  ;;  %v282_v29 = vand.u32 4294901760, %v281_v17 }
  0x12   :  { %106 = vmatpush.msra.mxu1 %v4916_v23  ;;  %469 = vrot.lane.b32.xlu0 %v24_v1, %s4794_s30 }
  0x13   :  { %196 = vmatpush.msrb.mxu0 %v4887_v15  ;;  %467 = vrot.lane.b32.xlu1 %v23_v6, %s4794_s30  ;;  %v274_v63 = vand.u32 4294901760, %v273_v55 }
  0x14   :  { %215 = vmatpush.msrb.mxu1 %v4848_v3  ;;  %67 = vmatmul.f32.vlgmr.msra.gmra.mxu0 %v66_v32 }
  0x15   :  { %108 = vmatmul.f32.vlgmr.msra.gmra.mxu1 %v62_v28 }
  0x16   :  { %217 = vmatpush.msrb.mxu1 %v4853_v5 }
  0x18   :  { %219 = vmatpush.msrb.mxu1 %v4851_v4 }
  0x1a   :  { %221 = vmatpush.msrb.mxu1 %v4858_v7 }
  0x1c   :  { %198 = vmatmul.f32.vlgmr.msrb.gmra.mxu0 %v62_v28 }
  0x1d   :  { %223 = vmatmul.f32.vlgmr.msrb.gmra.mxu1 %v62_v28 }
  0x5d   :  { %v474_v18 = vpop.permute.xlu2 %473 }
  0x5e   :  { %v5030_v25 = vand.u32 4294901760, %v474_v18 }
  0x60   :  { %5825 = vst [vmem:[#allocation13_spill] sm:$0xff] %v5030_v25  ;;  %v5037_v28 = vsub.f32 %v474_v18, %v5030_v25 }
  0x62   :  { %5826 = vst [vmem:[#allocation14_spill] sm:$0xff] %v5037_v28  ;;  %v5045_v31 = vand.u32 4294901760, %v5037_v28 }
  0x64   :  { %5828 = vst [vmem:[#allocation16_spill] sm:$0xff] %v5045_v31  ;;  %v537_v32 = vsub.f32 %v5037_v28, %v5045_v31 }
  0x68   :  { %v472_v34 = vpop.permute.xlu2 %471 }
  0x69   :  { %v5053_v38 = vand.u32 4294901760, %v472_v34 }
  0x6b   :  { %5829 = vst [vmem:[#allocation17_spill] sm:$0xff] %v5053_v38 }
  0x74   :  { %v239_v41 = vpop.permute.xlu0 %238  ;;  %v235_v42 = vpop.permute.xlu1 %234 }
  0x75   :  { %v4967_v44 = vand.u32 4294901760, %v239_v41  ;;  %v4974_v47 = vand.u32 4294901760, %v235_v42 }
  0x77   :  { %v4972_v46 = vsub.f32 %v239_v41, %v4967_v44  ;;  %5816 = vst [vmem:[#allocation4_spill] sm:$0xff] %v4974_v47  ;;  %263 = vmatpush.msrb.mxu2 %v4967_v44  ;;  %380 = vmatpush.msra.mxu1 %v4967_v44  ;;  %v4985_v51 = vsub.f32 %v235_v42, %v4974_v47  ;;  %v5055_v41 = vand.u32 4294901760, %v537_v32 }
  0x79   :  { %346 = vmatpush.msra.mxu0 %v4972_v46  ;;  %v4982_v50 = vand.u32 4294901760, %v4972_v46  ;;  %5818 = vst [vmem:[#allocation6_spill] sm:$0xff] %v4985_v51  ;;  %v5005_v62 = vand.u32 4294901760, %v4985_v51 }
  0x7a   :  { %5830 = vst [vmem:[#allocation18_spill] sm:$0xff] %v5055_v41 }
  0x7b   :  { %5817 = vst [vmem:[#allocation5_spill] sm:$0xff] %v4982_v50  ;;  %v302_v52 = vsub.f32 %v4972_v46, %v4982_v50  ;;  %v314_v16 = vsub.f32 %v4985_v51, %v5005_v62 }
  0x7c   :  { %v237_v53 = vpop.permute.xlu0 %236  ;;  %v233_v54 = vpop.permute.xlu1 %232  ;;  %5822 = vst [vmem:[#allocation10_spill] sm:$0xff] %v5005_v62 }
  0x7d   :  { %v4990_v57 = vand.u32 4294901760, %v237_v53  ;;  %v4992_v58 = vand.u32 4294901760, %v233_v54  ;;  %v4994_v59 = vand.u32 4294901760, %v302_v52  ;;  %v5034_v27 = vand.u32 4294901760, %v314_v16 }
  0x7e   :  { %v480_v16 = vsel %vm38_vm0, %v4943_v33, 0 }
  0x7f   :  { %5819 = vst [vmem:[#allocation7_spill] sm:$0xff] %v4990_v57  ;;  %v4997_v60 = vsub.f32 %v237_v53, %v4990_v57  ;;  %v5000_v61 = vsub.f32 %v233_v54, %v4992_v58  ;;  %265 = vmatpush.msrb.mxu2 %v4990_v57  ;;  %304 = vmatpush.msrb.mxu3 %v4994_v59  ;;  %v505_v18 = vand.u32 4294901760, %v480_v16 }
  0x80   :  { %5820 = vst [vmem:[#allocation8_spill] sm:$0xff] %v4992_v58  ;;  %382 = vmatpush.msra.mxu1 %v4990_v57 }
  0x81   :  { %5821 = vst [vmem:[#allocation9_spill] sm:$0xff] %v5000_v61  ;;  %267 = vmatpush.msrb.mxu2 %v4974_v47  ;;  %349 = vmatpush.msra.mxu0 %v4997_v60  ;;  %v5011_v1 = vand.u32 4294901760, %v4997_v60  ;;  %v5014_v2 = vand.u32 4294901760, %v5000_v61 }
  0x82   :  { %384 = vmatpush.msra.mxu1 %v4974_v47 }
  0x83   :  { %5823 = vst [vmem:[#allocation11_spill] sm:$0xff] %v5011_v1  ;;  %269 = vmatpush.msrb.mxu2 %v4992_v58  ;;  %352 = vmatpush.msra.mxu0 %v4985_v51  ;;  %v308_v6 = vsub.f32 %v4997_v60, %v5011_v1  ;;  %v320_v24 = vsub.f32 %v5000_v61, %v5014_v2 }
  0x84   :  { %5824 = vst [vmem:[#allocation12_spill] sm:$0xff] %v5014_v2  ;;  %386 = vmatpush.msra.mxu1 %v4992_v58  ;;  %275 = vmatmul.f32.vlgmr.msrb.gmra.mxu2 %v274_v63  ;;  %v470_v36 = vpop.permute.xlu0 %469 }
  0x85   :  { %415 = vmatpush.msra.mxu2 %v4982_v50  ;;  %355 = vmatpush.msra.mxu0 %v5000_v61  ;;  %v5026_v21 = vand.u32 4294901760, %v308_v6  ;;  %v5042_v30 = vand.u32 4294901760, %v320_v24  ;;  %v468_v42 = vpop.permute.xlu1 %467  ;;  %v5062_v45 = vand.u32 4294901760, %v470_v36 }
  0x86   :  { %358 = vmatmul.f32.vlgmr.msra.gmra.mxu0 %v271_v43  ;;  %390 = vmatmul.f32.vlgmr.msra.gmra.mxu1 %v272_v48  ;;  %v5060_v43 = vsub.f32 %v472_v34, %v5053_v38  ;;  %v5067_v48 = vand.u32 4294901760, %v468_v42  ;;  %v483_v34 = vsel %vm38_vm0, %v4956_v37, 0 }
  0x87   :  { %419 = vmatpush.msra.mxu2 %v5011_v1  ;;  %310 = vmatpush.msrb.mxu3 %v5026_v21  ;;  %5827 = vst [vmem:[#allocation15_spill] sm:$0xff] %v5042_v30  ;;  %v5076_v53 = vsub.f32 %v470_v36, %v5062_v45  ;;  %v513_v36 = vand.u32 4294901760, %v483_v34 }
  0x88   :  { %498 = vmatpush.msrb.mxu0 %v5030_v25  ;;  %5831 = vst [vmem:[#allocation19_spill] sm:$0xff] %v5060_v43  ;;  %539 = vmatpush.msrb.mxu1 %v5055_v41  ;;  %v5071_v52 = vand.u32 4294901760, %v5060_v43 }
  0x89   :  { %423 = vmatpush.msra.mxu2 %v5005_v62  ;;  %316 = vmatpush.msrb.mxu3 %v5034_v27  ;;  %5832 = vst [vmem:[#allocation20_spill] sm:$0xff] %v5062_v45  ;;  %v5101_v63 = vand.u32 4294901760, %v5076_v53 }
  0x8a   :  { %500 = vmatpush.msrb.mxu0 %v5053_v38  ;;  %5833 = vst [vmem:[#allocation21_spill] sm:$0xff] %v5067_v48  ;;  %v543_v54 = vsub.f32 %v5060_v43, %v5071_v52 }
  0x8b   :  { %427 = vmatpush.msra.mxu2 %v5014_v2  ;;  %322 = vmatpush.msrb.mxu3 %v5042_v30  ;;  %5834 = vst [vmem:[#allocation22_spill] sm:$0xff] %v5071_v52 }
  0x8c   :  { %283 = vmatmul.f32.gmra.mxu2 %v282_v29  ;;  %324 = vmatmul.f32.vlgmr.msrb.gmra.mxu3 %v4961_v39  ;;  %5835 = vst [vmem:[#allocation23_spill] sm:$0xff] %v5076_v53  ;;  %v5083_v55 = vand.u32 4294901760, %v543_v54 }
  0x8d   :  { %450 = vmatpush.msra.mxu3 %v4967_v44  ;;  %581 = vmatpush.msrb.mxu2 %v5037_v28  ;;  %5838 = vst [vmem:[#allocation26_spill] sm:$0xff] %v5101_v63 }
  0x8e   :  { %363 = vmatmul.f32.gmra.mxu0 %v279_v56  ;;  %396 = vmatmul.f32.gmra.mxu1 %v280_v0  ;;  %5836 = vst [vmem:[#allocation24_spill] sm:$0xff] %v5083_v55  ;;  %v5088_v56 = vsub.f32 %v468_v42, %v5067_v48  ;;  %v549_v0 = vsub.f32 %v5076_v53, %v5101_v63 }
  0x8f   :  { %452 = vmatpush.msra.mxu3 %v4990_v57  ;;  %502 = vmatpush.msrb.mxu0 %v5062_v45  ;;  %v514_v42 = vsub.f32 %v483_v34, %v513_v36 }
  0x90   :  { %584 = vmatpush.msrb.mxu2 %v5060_v43  ;;  %5837 = vst [vmem:[#allocation25_spill] sm:$0xff] %v5088_v56  ;;  %545 = vmatpush.msrb.mxu1 %v5083_v55  ;;  %v5106_v6 = vand.u32 4294901760, %v549_v0  ;;  %v5111_v17 = vand.u32 4294901760, %v5088_v56 }
  0x91   :  { %454 = vmatpush.msra.mxu3 %v4974_v47  ;;  %504 = vmatpush.msrb.mxu0 %v5067_v48  ;;  %v515_v54 = vand.u32 4294901760, %v514_v42  ;;  %v68_v37 = vpop.f32.mrf.mxu0 }
  0x92   :  { %587 = vmatpush.msrb.mxu2 %v5076_v53  ;;  %5839 = vst [vmem:[#allocation27_spill] sm:$0xff] %v5106_v6  ;;  %551 = vmatpush.msrb.mxu1 %v5106_v6 }
  0x93   :  { %456 = vmatpush.msra.mxu3 %v4992_v58  ;;  %650 = vmatpush.msra.mxu0 %v5045_v31  ;;  %5840 = vst [vmem:[#allocation28_spill] sm:$0xff] %v5111_v17  ;;  %v516_v0 = vsub.f32 %v514_v42, %v515_v54  ;;  %v166_v34 = vpop.f32.mrf.mxu3 }
  0x94   :  { %328 = vmatmul.f32.gmra.mxu3 %v4978_v49  ;;  %429 = vmatmul.f32.vlgmr.msra.gmra.mxu2 %v4961_v39 }
  0x95   :  { %615 = vmatpush.msrb.mxu3 %v5030_v25  ;;  %590 = vmatpush.msrb.mxu2 %v5088_v56 }
  0x96   :  { %654 = vmatpush.msra.mxu0 %v5071_v52 }
  0x97   :  { %617 = vmatpush.msrb.mxu3 %v5053_v38 }
  0x98   :  { %658 = vmatpush.msra.mxu0 %v5101_v63 }
  0x99   :  { %619 = vmatpush.msrb.mxu3 %v5062_v45 }
  0x9a   :  { %662 = vmatpush.msra.mxu0 %v5111_v17 }
  0x9b   :  { %621 = vmatpush.msrb.mxu3 %v5067_v48 }
  0x9c   :  { %433 = vmatmul.f32.gmra.mxu2 %v4978_v49  ;;  %458 = vmatmul.f32.vlgmr.msra.gmra.mxu3 %v4961_v39  ;;  %v555_v39 = vsub.f32 %v5088_v56, %v5111_v17 }
  0x9e   :  { %v5117_v24 = vand.u32 4294901760, %v555_v39  ;;  %v139_v39 = vpop.f32.mrf.mxu2 }
  0xa0   :  { %5841 = vst [vmem:[#allocation29_spill] sm:$0xff] %v5117_v24  ;;  %557 = vmatpush.msrb.mxu1 %v5117_v24 }
  0xa1   :  { %559 = vmatmul.f32.vlgmr.msrb.gmra.mxu1 %v505_v18 }
  0xa2   :  { %685 = vmatpush.msra.mxu1 %v5030_v25 }
  0xa4   :  { %462 = vmatmul.f32.gmra.mxu3 %v4978_v49  ;;  %v506_v49 = vsub.f32 %v480_v16, %v505_v18  ;;  %687 = vmatpush.msra.mxu1 %v5053_v38  ;;  %v517_v16 = vand.u32 4294901760, %v516_v0  ;;  %v199_v0 = vpop.f32.mrf.mxu0 }
  0xa6   :  { %v507_v29 = vand.u32 4294901760, %v506_v49  ;;  %593 = vmatmul.f32.vlgmr.msrb.gmra.mxu2 %v506_v49  ;;  %689 = vmatpush.msra.mxu1 %v5062_v45 }
  0xa8   :  { %v508_v32 = vsub.f32 %v506_v49, %v507_v29  ;;  %691 = vmatpush.msra.mxu1 %v5067_v48  ;;  %v5129_v49 = vld [vmem:[%s5768_s5] sm:$0xff] }
  0xa9   :  { %563 = vmatmul.f32.gmra.mxu1 %v513_v36  ;;  %5842 = vst [vmem:[#allocation30_spill] sm:$0xff] %v5129_v49 }
  0xaa   :  { %v509_v33 = vand.u32 4294901760, %v508_v32  ;;  %v109_v32 = vpop.f32.mrf.mxu1 }
  0xac   :  { %625 = vmatmul.f32.vlgmr.msrb.gmra.mxu3 %v507_v29  ;;  %510 = vmatmul.f32.vlgmr.msrb.gmra.mxu0 %v509_v33  ;;  %v5779_v29 = vperm.slane %v5129_v49, 0 }
  0xae   :  { %598 = vmatmul.f32.gmra.mxu2 %v514_v42  ;;  %v69_v33 = vadd.f32 %v68_v37, %v5779_v29 }
  0xb1   :  { %693 = vmatmul.f32.vlgmr.msra.gmra.mxu1 %v505_v18 }
  0xb4   :  { %631 = vmatmul.f32.gmra.mxu3 %v515_v54  ;;  %518 = vmatmul.f32.gmra.mxu0 %v517_v16  ;;  %v110_v54 = vadd.f32 %v109_v32, %v69_v33 }
  0xb6   :  { %v140_v16 = vadd.f32 %v139_v39, %v110_v54 }
  0xb8   :  { %v167_v17 = vadd.f32 %v166_v34, %v140_v16 }
  0xb9   :  { %697 = vmatmul.f32.gmra.mxu1 %v513_v36 }
  0xba   :  { %v200_v2 = vadd.f32 %v199_v0, %v167_v17 }
  0xbc   :  { %664 = vmatmul.f32.vlgmr.msra.gmra.mxu0 %v505_v18  ;;  %v5135_v18 = vperm.slane %v5129_v49, 1 }
  0xbe   :  { %5843 = vst [vmem:[#allocation31_spill] sm:$0xff] %v5135_v18 }
  0xc4   :  { %668 = vmatmul.f32.gmra.mxu0 %v513_v36  ;;  %v224_v36 = vpop.f32.mrf.mxu1 }
  0xc5   :  { %v5139_v33 = vadd.f32 %v224_v36, %v200_v2 }
 0x103   :  { %v359_v28 = vpop.f32.mrf.mxu0  ;;  %v391_v52 = vpop.f32.mrf.mxu1 }
 0x107   :  { %v276_v42 = vpop.f32.mrf.mxu2 }
 0x108   :  { %v277_v43 = vadd.f32 %v276_v42, %v5135_v18  ;;  %v703_v42 = vsel %vm701_vm1, %v5139_v33, 0 }
 0x109   :  { %v729_v17 = vand.u32 4294901760, %v703_v42 }
 0x10b   :  { %v364_v39 = vpop.f32.mrf.mxu0 }
 0x10f   :  { %v284_v56 = vpop.f32.mrf.mxu2  ;;  %v325_v53 = vpop.f32.mrf.mxu3 }
 0x110   :  { %v326_v63 = vadd.f32 %v325_v53, %v277_v43  ;;  %v285_v37 = vadd.f32 %v284_v56, %v5135_v18  ;;  %v397_v53 = vpop.f32.mrf.mxu1 }
 0x112   :  { %v360_v29 = vadd.f32 %v359_v28, %v326_v63  ;;  %v730_v28 = vsub.f32 %v703_v42, %v729_v17 }
 0x114   :  { %v392_v31 = vadd.f32 %v391_v52, %v360_v29 }
 0x117   :  { %v329_v62 = vpop.f32.mrf.mxu3  ;;  %v430_v32 = vpop.f32.mrf.mxu2 }
 0x118   :  { %v330_v24 = vadd.f32 %v329_v62, %v285_v37  ;;  %v431_v54 = vadd.f32 %v430_v32, %v392_v31 }
 0x11a   :  { %v365_v16 = vadd.f32 %v364_v39, %v330_v24  ;;  %v731_v24 = vand.u32 4294901760, %v730_v28 }
 0x11c   :  { %v398_v56 = vadd.f32 %v397_v53, %v365_v16  ;;  %v732_v39 = vsub.f32 %v730_v28, %v731_v24 }
 0x11e   :  { %v733_v16 = vand.u32 4294901760, %v732_v39 }
 0x11f   :  { %v459_v34 = vpop.f32.mrf.mxu3  ;;  %v434_v0 = vpop.f32.mrf.mxu2 }
 0x120   :  { %v5143_v43 = vadd.f32 %v459_v34, %v431_v54  ;;  %v435_v63 = vadd.f32 %v434_v0, %v398_v56 }
 0x122   :  { %v706_v2 = vsel %vm701_vm1, %v5143_v43, 0 }
 0x123   :  { %v727_v62 = vand.u32 4294901760, %v706_v2 }
 0x125   :  { %v759_v37 = vsub.f32 %v706_v2, %v727_v62  ;;  %v560_v2 = vpop.f32.mrf.mxu1 }
 0x127   :  { %v463_v52 = vpop.f32.mrf.mxu3  ;;  %v760_v42 = vand.u32 4294901760, %v759_v37 }
 0x128   :  { %v5147_v29 = vadd.f32 %v463_v52, %v435_v63 }
 0x129   :  { %v761_v0 = vsub.f32 %v759_v37, %v760_v42  ;;  %v511_v63 = vpop.f32.mrf.mxu0 }
 0x12a   :  { %1061 = vrot.lane.b32.xlu1 %v5147_v29, %s4795_s19  ;;  %v709_v31 = vsel %vm701_vm1, %v5147_v29, 0 }
 0x12b   :  { %v725_v36 = vand.u32 4294901760, %v709_v31  ;;  %v762_v56 = vand.u32 4294901760, %v761_v0 }
 0x12d   :  { %726 = vmatpush.xpose.msra.mxu2 %v725_v36  ;;  %810 = vmatpush.xpose.msrb.mxu1 %v725_v36  ;;  %v753_v32 = vsub.f32 %v709_v31, %v725_v36  ;;  %v564_v52 = vpop.f32.mrf.mxu1  ;;  %v594_v31 = vpop.f32.mrf.mxu2 }
 0x12f   :  { %785 = vmatpush.xpose.msrb.mxu0 %v753_v32  ;;  %v754_v54 = vand.u32 4294901760, %v753_v32 }
 0x131   :  { %728 = vmatpush.xpose.msra.mxu2 %v727_v62  ;;  %812 = vmatpush.xpose.msrb.mxu1 %v727_v62  ;;  %v755_v34 = vsub.f32 %v753_v32, %v754_v54  ;;  %v626_v32 = vpop.f32.mrf.mxu3 }
 0x132   :  { %1059 = vrot.lane.b32.xlu1 %v5143_v43, %s4795_s19 }
 0x133   :  { %788 = vmatpush.xpose.msrb.mxu0 %v759_v37  ;;  %v756_v53 = vand.u32 4294901760, %v755_v34  ;;  %v5158_v37 = vperm.slane %v5129_v49, 2 }
 0x134   :  { %734 = vmatmul.f32.vlgmr.msra.gmra.mxu2 %v733_v16  ;;  %816 = vmatmul.f32.vlgmr.msrb.gmra.mxu1 %v731_v24  ;;  %v519_v24 = vpop.f32.mrf.mxu0 }
 0x135   :  { %837 = vmatpush.xpose.msrb.mxu2 %v754_v54  ;;  %757 = vmatpush.xpose.msra.mxu3 %v756_v53  ;;  %5844 = vst [vmem:[#allocation32_spill] sm:$0xff] %v5158_v37  ;;  %v599_v34 = vpop.f32.mrf.mxu2 }
 0x136   :  { %791 = vmatmul.f32.vlgmr.msrb.gmra.mxu0 %v730_v28  ;;  %v512_v28 = vadd.f32 %v511_v63, %v5158_v37 }
 0x138   :  { %v561_v39 = vadd.f32 %v560_v2, %v512_v28 }
 0x139   :  { %841 = vmatpush.xpose.msrb.mxu2 %v760_v42  ;;  %763 = vmatpush.xpose.msra.mxu3 %v762_v56  ;;  %v694_v42 = vpop.f32.mrf.mxu1  ;;  %v632_v53 = vpop.f32.mrf.mxu3 }
 0x13a   :  { %1057 = vrot.lane.b32.xlu1 %v5139_v33, %s4795_s19  ;;  %v595_v16 = vadd.f32 %v594_v31, %v561_v39 }
 0x13c   :  { %765 = vmatmul.f32.vlgmr.msra.gmra.mxu3 %v729_v17  ;;  %843 = vmatmul.f32.vlgmr.msrb.gmra.mxu2 %v729_v17  ;;  %v627_v0 = vadd.f32 %v626_v32, %v595_v16 }
 0x13d   :  { %862 = vmatpush.xpose.msrb.mxu3 %v725_v36  ;;  %v520_v36 = vadd.f32 %v519_v24, %v5158_v37 }
 0x13f   :  { %v565_v54 = vadd.f32 %v564_v52, %v520_v36 }
 0x141   :  { %864 = vmatpush.xpose.msrb.mxu3 %v727_v62  ;;  %v665_v62 = vpop.f32.mrf.mxu0  ;;  %v698_v49 = vpop.f32.mrf.mxu1 }
 0x142   :  { %v666_v18 = vadd.f32 %v665_v62, %v627_v0 }
 0x144   :  { %866 = vmatmul.f32.vlgmr.msrb.gmra.mxu3 %v729_v17  ;;  %v600_v17 = vadd.f32 %v599_v34, %v565_v54  ;;  %v5162_v48 = vadd.f32 %v694_v42, %v666_v18 }
 0x146   :  { %v633_v56 = vadd.f32 %v632_v53, %v600_v17  ;;  %v914_v52 = vand.u32 4294901760, %v5162_v48 }
 0x148   :  { %v946_v31 = vsub.f32 %v5162_v48, %v914_v52 }
 0x149   :  { %v669_v1 = vpop.f32.mrf.mxu0 }
 0x14a   :  { %v670_v6 = vadd.f32 %v669_v1, %v633_v56  ;;  %v947_v18 = vand.u32 4294901760, %v946_v31 }
 0x14c   :  { %v5164_v63 = vadd.f32 %v698_v49, %v670_v6  ;;  %v948_v49 = vsub.f32 %v946_v31, %v947_v18 }
 0x14e   :  { %v912_v24 = vand.u32 4294901760, %v5164_v63  ;;  %v949_v32 = vand.u32 4294901760, %v948_v49 }
 0x150   :  { %v940_v2 = vsub.f32 %v5164_v63, %v912_v24  ;;  %997 = vmatpush.msra.mxu3 %v912_v24  ;;  %913 = vmatpush.msra.mxu0 %v912_v24 }
 0x152   :  { %972 = vmatpush.msra.mxu2 %v940_v2  ;;  %999 = vmatpush.msra.mxu3 %v914_v52  ;;  %v941_v28 = vand.u32 4294901760, %v940_v2 }
 0x153   :  { %915 = vmatpush.msra.mxu0 %v914_v52 }
 0x154   :  { %975 = vmatpush.msra.mxu2 %v946_v31  ;;  %v942_v1 = vsub.f32 %v940_v2, %v941_v28 }
 0x155   :  { %1024 = vmatpush.msrb.mxu0 %v941_v28 }
 0x156   :  { %v943_v6 = vand.u32 4294901760, %v942_v1 }
 0x157   :  { %1028 = vmatpush.msrb.mxu0 %v947_v18 }
 0x158   :  { %944 = vmatpush.msra.mxu1 %v943_v6 }
 0x15a   :  { %950 = vmatpush.msra.mxu1 %v949_v32 }
 0x15c   :  { %1049 = vmatpush.msrb.mxu1 %v912_v24 }
 0x15e   :  { %1051 = vmatpush.msrb.mxu1 %v914_v52 }
 0x19c   :  { %v1062_v36 = vpop.permute.xlu1 %1061 }
 0x19d   :  { %v1067_v39 = vsel %vm701_vm1, %v1062_v36, 0 }
 0x19e   :  { %v5171_v54 = vand.u32 4294901760, %v1067_v39 }
 0x1a0   :  { %v5174_v42 = vsub.f32 %v1067_v39, %v5171_v54  ;;  %1084 = vmatpush.xpose.msrb.mxu2 %v5171_v54 }
 0x1a2   :  { %v5790_v34 = vand.u32 4294901760, %v5174_v42 }
 0x1a4   :  { %v1113_v16 = vsub.f32 %v5174_v42, %v5790_v34  ;;  %v1060_v62 = vpop.permute.xlu1 %1059 }
 0x1a5   :  { %v1065_v17 = vsel %vm701_vm1, %v1060_v62, 0 }
 0x1a6   :  { %v1114_v53 = vand.u32 4294901760, %v1113_v16  ;;  %v5182_v0 = vand.u32 4294901760, %v1065_v17 }
 0x1a8   :  { %v5185_v56 = vsub.f32 %v1065_v17, %v5182_v0  ;;  %1086 = vmatpush.xpose.msrb.mxu2 %v5182_v0  ;;  %1115 = vmatpush.xpose.msrb.mxu3 %v1114_v53 }
 0x1aa   :  { %v5789_v24 = vand.u32 4294901760, %v5185_v56 }
 0x1ac   :  { %v1119_v2 = vsub.f32 %v5185_v56, %v5789_v24 }
 0x1ae   :  { %v1120_v52 = vand.u32 4294901760, %v1119_v2 }
 0x1b0   :  { %1121 = vmatpush.xpose.msrb.mxu3 %v1120_v52 }
 0x1b1   :  { %v817_v49 = vpop.f32.mrf.mxu1 }
 0x1b3   :  { %v792_v18 = vpop.f32.mrf.mxu0 }
 0x1b7   :  { %v735_v31 = vpop.f32.mrf.mxu2 }
 0x1bf   :  { %v766_v28 = vpop.f32.mrf.mxu3  ;;  %v844_v36 = vpop.f32.mrf.mxu2 }
 0x1c0   :  { %v767_v1 = vadd.f32 %v766_v28, %v735_v31 }
 0x1c2   :  { %v793_v6 = vadd.f32 %v792_v18, %v767_v1 }
 0x1c4   :  { %v818_v32 = vadd.f32 %v817_v49, %v793_v6  ;;  %v1058_v49 = vpop.permute.xlu1 %1057 }
 0x1c6   :  { %v845_v39 = vadd.f32 %v844_v36, %v818_v32 }
 0x1c7   :  { %v867_v16 = vpop.f32.mrf.mxu3 }
 0x1c8   :  { %v868_v62 = vadd.f32 %v867_v16, %v845_v39  ;;  %v1063_v39 = vsel %vm701_vm1, %v1058_v49, 0 }
 0x1ca   :  { %v871_v17 = vsel %vm870_vm2, %v868_v62, -inf }
 0x1cb   :  { %872 = vmax.xlane.f32.xlu2 %v871_v17 }
 0x1e3   :  { %1256 = vrot.lane.b32.xlu2 %v5164_v63, %s4795_s19 }
 0x23e   :  { %v873_v53 = vpop.xlane.xlu2 %872 }
 0x23f   :  { %v874_v2 = vsub.f32 %v868_v62, %v873_v53 }
 0x241   :  { %v875_v52 = vmul.f32 1.442695, %v874_v2  ;;  %v5201_v2 = vand.u32 4294901760, %v1063_v39 }
 0x243   :  { %4746 = vpow2.f32 %v875_v52 }
 0x246   :  { %v1257_v16 = vpop.permute.xlu2 %1256 }
 0x247   :  { %v1277_v52 = vand.u32 4294901760, %v1257_v16 }
 0x249   :  { %v4747_v31 = vpop.eup %4746  ;;  %v1305_v50 = vsub.f32 %v1257_v16, %v1277_v52 }
 0x24a   :  { %v877_v28 = vsel %vm870_vm2, %v4747_v31, 0.0 }
 0x24b   :  { %878 = vadd.xlane.f32.xlu0 %v877_v28  ;;  %v1306_v41 = vand.u32 4294901760, %v1305_v50 }
 0x25f   :  { %1426 = vrot.lane.b32.xlu0 %v5147_v29, %s4796_s20 }
 0x267   :  { %1254 = vrot.lane.b32.xlu0 %v5162_v48, %s4795_s19 }
 0x2be   :  { %v879_v1 = vpop.xlane.xlu0 %878 }
 0x2bf   :  { %4748 = vrcp.f32 %v879_v1  ;;  %v891_v36 = vand.u32 2147483648, %v879_v1  ;;  %v889_v17 = vand.u32 2147483647, %v879_v1  ;;  %vm885_vm4 = vweird.f32 %v879_v1 }
 0x2c1   :  { %v892_v28 = vor.u32 1.1754944e-38, %v891_v36  ;;  %vm890_vm6 = vcmp.eq.f32.partialorder %v889_v17, 8.507059e+37 }
 0x2c5   :  { %v4749_v18 = vpop.eup %4748 }
 0x2c6   :  { %v881_v6 = vmul.f32 %v4749_v18, %v879_v1  ;;  %vm886_vm3 = vweird.f32 %v4749_v18 }
 0x2c7   :  { %vm887_vm5 = vmor %vm885_vm4, %vm886_vm3 }
 0x2c8   :  { %v882_v32 = vsub.f32 1.0, %v881_v6  ;;  %v1088_v6 = vsub.f32 %v1063_v39, %v5201_v2 }
 0x2ca   :  { %v883_v62 = vmul.f32 %v4749_v18, %v882_v32  ;;  %v1089_v45 = vand.u32 4294901760, %v1088_v6 }
 0x2cc   :  { %v884_v53 = vadd.f32 %v4749_v18, %v883_v62 }
 0x2ce   :  { %v888_v24 = vsel %vm887_vm5, %v4749_v18, %v884_v53 }
 0x2cf   :  { %v893_v34 = vsel %vm890_vm6, %v892_v28, %v888_v24  ;;  %v1090_v24 = vsub.f32 %v1088_v6, %v1089_v45  ;;  %v5846_v28 = vand.u32 4294901760, %v5185_v56  ;;  %vm2162_vm6 = vcmask 195584  }
 0x2d0   :  { %v894_v37 = vmul.f32 %v4747_v31, %v893_v34  ;;  %v5845_v34 = vand.u32 4294901760, %v5174_v42  ;;  %v1307_v31 = vsub.f32 %v1305_v50, %v1306_v41 }
 0x2d1   :  { %v1427_v55 = vpop.permute.xlu0 %1426 }
 0x2d2   :  { %v896_v49 = vsel %vm870_vm2, %v894_v37, 0  ;;  %v1432_v1 = vsel %vm701_vm1, %v1427_v55, 0 }
 0x2d3   :  { %v916_v32 = vand.u32 4294901760, %v896_v49  ;;  %v5207_v36 = vand.u32 4294901760, %v1432_v1 }
 0x2d5   :  { %952 = vmatmul.f32.vlgmr.msra.gmra.mxu1 %v916_v32  ;;  %v917_v62 = vsub.f32 %v896_v49, %v916_v32  ;;  %v5214_v17 = vsub.f32 %v1432_v1, %v5207_v36  ;;  %v1091_v49 = vand.u32 4294901760, %v1090_v24 }
 0x2d6   :  { %1168 = vmatpush.xpose.msra.mxu1 %v5171_v54 }
 0x2d7   :  { %978 = vmatmul.f32.vlgmr.msra.gmra.mxu2 %v917_v62  ;;  %v918_v18 = vand.u32 4294901760, %v917_v62 }
 0x2d8   :  { %1195 = vmatpush.xpose.msra.mxu2 %v5845_v34  ;;  %v1308_v34 = vand.u32 4294901760, %v1307_v31 }
 0x2d9   :  { %1003 = vmatmul.f32.vlgmr.msra.gmra.mxu3 %v918_v18  ;;  %v1255_v37 = vpop.permute.xlu0 %1254  ;;  %v919_v39 = vsub.f32 %v917_v62, %v918_v18 }
 0x2da   :  { %1170 = vmatpush.xpose.msra.mxu1 %v5182_v0  ;;  %1220 = vmatpush.xpose.msra.mxu3 %v5171_v54  ;;  %v1279_v55 = vand.u32 4294901760, %v1255_v37  ;;  %v5800_v54 = vand.u32 4294901760, %v5214_v17 }
 0x2db   :  { %v920_v16 = vand.u32 4294901760, %v919_v39 }
 0x2dc   :  { %v1311_v53 = vsub.f32 %v1255_v37, %v1279_v55  ;;  %1199 = vmatpush.xpose.msra.mxu2 %v5846_v28  ;;  %v1478_v18 = vsub.f32 %v5214_v17, %v5800_v54 }
 0x2dd   :  { %921 = vmatmul.f32.vlgmr.msra.gmra.mxu0 %v920_v16  ;;  %1053 = vmatmul.f32.vlgmr.msrb.gmra.mxu1 %v916_v32 }
 0x2de   :  { %v1312_v38 = vand.u32 4294901760, %v1311_v53  ;;  %1143 = vmatpush.xpose.msra.mxu0 %v5174_v42  ;;  %1222 = vmatpush.xpose.msra.mxu3 %v5182_v0 }
 0x2df   :  { %1309 = vmatpush.msrb.mxu1 %v1308_v34  ;;  %1092 = vmatmul.f32.vlgmr.msrb.gmra.mxu2 %v1091_v49 }
 0x2e0   :  { %1337 = vmatpush.msrb.mxu2 %v1305_v50  ;;  %v1313_v1 = vsub.f32 %v1311_v53, %v1312_v38  ;;  %v1479_v50 = vand.u32 4294901760, %v1478_v18 }
 0x2e1   :  { %1123 = vmatmul.f32.vlgmr.msrb.gmra.mxu3 %v5201_v2 }
 0x2e2   :  { %1146 = vmatpush.xpose.msra.mxu0 %v5185_v56  ;;  %1340 = vmatpush.msrb.mxu2 %v1311_v53  ;;  %v1314_v62 = vand.u32 4294901760, %v1313_v1 }
 0x2e3   :  { %1362 = vmatpush.msrb.mxu3 %v1277_v52 }
 0x2e4   :  { %1315 = vmatpush.msrb.mxu1 %v1314_v62 }
 0x2e5   :  { %1364 = vmatpush.msrb.mxu3 %v1279_v55  ;;  %1030 = vmatmul.f32.vlgmr.msrb.gmra.mxu0 %v916_v32 }
 0x2e6   :  { %1174 = vmatmul.f32.vlgmr.msra.gmra.mxu1 %v1089_v45  ;;  %1278 = vmatpush.msrb.mxu0 %v1277_v52 }
 0x2e7   :  { %1414 = vmatpush.msra.mxu1 %v1277_v52  ;;  %1201 = vmatmul.f32.vlgmr.msra.gmra.mxu2 %v5201_v2 }
 0x2e8   :  { %1280 = vmatpush.msrb.mxu0 %v1279_v55  ;;  %1449 = vmatpush.xpose.msra.mxu2 %v5207_v36 }
 0x2e9   :  { %1416 = vmatpush.msra.mxu1 %v1279_v55  ;;  %1224 = vmatmul.f32.vlgmr.msra.gmra.mxu3 %v5201_v2 }
 0x2ea   :  { %1480 = vmatpush.xpose.msra.mxu3 %v1479_v50 }
 0x2ed   :  { %1149 = vmatmul.f32.vlgmr.msra.gmra.mxu0 %v1088_v6 }
 0x2ee   :  { %1389 = vmatpush.msra.mxu0 %v1306_v41 }
 0x2f0   :  { %1393 = vmatpush.msra.mxu0 %v1312_v38 }
 0x352   :  { %v5229_v42 = vpop.f32.mrf.mxu1 }
 0x35a   :  { %v5231_v0 = vpop.f32.mrf.mxu0  ;;  %v5233_v45 = vpop.f32.mrf.mxu2 }
 0x35b   :  { %v5237_v52 = vpop.f32.mrf.mxu1 }
 0x35c   :  { %v5235_v56 = vpop.f32.mrf.mxu3 }
 0x362   :  { %v5239_v32 = vpop.f32.mrf.mxu0  ;;  %v1093_v24 = vpop.f32.mrf.mxu2 }
 0x363   :  { %v1175_v6 = vpop.f32.mrf.mxu1 }
 0x364   :  { %v1124_v31 = vpop.f32.mrf.mxu3 }
 0x365   :  { %v1125_v37 = vadd.f32 %v1124_v31, %v1093_v24 }
 0x36a   :  { %v1150_v2 = vpop.f32.mrf.mxu0  ;;  %v1202_v38 = vpop.f32.mrf.mxu2 }
 0x36b   :  { %v1151_v39 = vadd.f32 %v1150_v2, %v1125_v37 }
 0x36c   :  { %v1225_v16 = vpop.f32.mrf.mxu3 }
 0x36d   :  { %v1176_v41 = vadd.f32 %v1175_v6, %v1151_v39 }
 0x36f   :  { %v1203_v55 = vadd.f32 %v1202_v38, %v1176_v41 }
 0x371   :  { %v1226_v53 = vadd.f32 %v1225_v16, %v1203_v55 }
 0x373   :  { %v1228_v28 = vsel %vm870_vm2, %v1226_v53, -inf }
 0x374   :  { %1229 = vmax.xlane.f32.xlu1 %v1228_v28 }
 0x38d   :  { %1422 = vrot.lane.b32.xlu1 %v5139_v33, %s4796_s20 }
 0x395   :  { %1619 = vrot.lane.b32.xlu1 %v5164_v63, %s4796_s20 }
 0x39d   :  { %1789 = vrot.lane.b32.xlu1 %v5147_v29, %s4797_s21 }
 0x3a5   :  { %1617 = vrot.lane.b32.xlu1 %v5162_v48, %s4796_s20 }
 0x3e7   :  { %v1230_v49 = vpop.xlane.xlu1 %1229 }
 0x3e8   :  { %v1231_v34 = vsub.f32 %v1226_v53, %v1230_v49 }
 0x3ea   :  { %v1232_v1 = vmul.f32 1.442695, %v1231_v34 }
 0x3ec   :  { %4750 = vpow2.f32 %v1232_v1 }
 0x3f2   :  { %v4751_v62 = vpop.eup %4750 }
 0x3f3   :  { %v1234_v18 = vsel %vm870_vm2, %v4751_v62, 0.0 }
 0x3f4   :  { %1235 = vadd.xlane.f32.xlu2 %v1234_v18 }
 0x3ff   :  { %v1423_v50 = vpop.permute.xlu1 %1422 }
 0x400   :  { %v1428_v55 = vsel %vm701_vm1, %v1423_v50, 0 }
 0x401   :  { %v5255_v54 = vand.u32 4294901760, %v1428_v55 }
 0x403   :  { %v1453_v11 = vsub.f32 %v1428_v55, %v5255_v54 }
 0x405   :  { %v1454_v51 = vand.u32 4294901760, %v1453_v11 }
 0x407   :  { %v1620_v24 = vpop.permute.xlu1 %1619 }
 0x408   :  { %v1640_v25 = vand.u32 4294901760, %v1620_v24 }
 0x40c   :  { %1424 = vrot.lane.b32.xlu2 %v5143_v43, %s4796_s20 }
 0x40f   :  { %v1790_v37 = vpop.permute.xlu1 %1789 }
 0x410   :  { %v1795_v10 = vsel %vm701_vm1, %v1790_v37, 0 }
 0x417   :  { %v1618_v34 = vpop.permute.xlu1 %1617 }
 0x418   :  { %v1642_v47 = vand.u32 4294901760, %v1618_v34 }
 0x467   :  { %v1236_v31 = vpop.xlane.xlu2 %1235 }
 0x468   :  { %4752 = vrcp.f32 %v1236_v31  ;;  %v1248_v16 = vand.u32 2147483648, %v1236_v31  ;;  %v1246_v28 = vand.u32 2147483647, %v1236_v31  ;;  %vm1242_vm8 = vweird.f32 %v1236_v31 }
 0x46a   :  { %v1249_v58 = vor.u32 1.1754944e-38, %v1248_v16  ;;  %vm1247_vm10 = vcmp.eq.f32.partialorder %v1246_v28, 8.507059e+37 }
 0x46e   :  { %v4753_v29 = vpop.eup %4752 }
 0x46f   :  { %v1238_v2 = vmul.f32 %v4753_v29, %v1236_v31  ;;  %v1425_v39 = vpop.permute.xlu2 %1424  ;;  %vm1243_vm7 = vweird.f32 %v4753_v29  ;;  %v1674_v31 = vsub.f32 %v1618_v34, %v1642_v47 }
 0x470   :  { %v1430_v6 = vsel %vm701_vm1, %v1425_v39, 0  ;;  %vm1244_vm9 = vmor %vm1242_vm8, %vm1243_vm7 }
 0x471   :  { %v1239_v41 = vsub.f32 1.0, %v1238_v2  ;;  %v1450_v38 = vand.u32 4294901760, %v1430_v6  ;;  %v1675_v16 = vand.u32 4294901760, %v1674_v31 }
 0x473   :  { %v1240_v53 = vmul.f32 %v4753_v29, %v1239_v41  ;;  %v1482_v49 = vsub.f32 %v1430_v6, %v1450_v38  ;;  %1451 = vmatpush.xpose.msra.mxu2 %v1450_v38  ;;  %v1668_v6 = vsub.f32 %v1620_v24, %v1640_v25  ;;  %v5847_v24 = vand.u32 4294901760, %v5214_v17 }
 0x474   :  { %v1676_v34 = vsub.f32 %v1674_v31, %v1675_v16 }
 0x475   :  { %v1241_v1 = vadd.f32 %v4753_v29, %v1240_v53  ;;  %v1483_v18 = vand.u32 4294901760, %v1482_v49  ;;  %v1669_v30 = vand.u32 4294901760, %v1668_v6 }
 0x477   :  { %v1245_v39 = vsel %vm1244_vm9, %v4753_v29, %v1241_v1  ;;  %v1484_v2 = vsub.f32 %v1482_v49, %v1483_v18  ;;  %v1670_v55 = vsub.f32 %v1668_v6, %v1669_v30 }
 0x478   :  { %v1250_v50 = vsel %vm1247_vm10, %v1249_v58, %v1245_v39 }
 0x479   :  { %v1485_v61 = vand.u32 4294901760, %v1484_v2  ;;  %v1251_v41 = vmul.f32 %v4751_v62, %v1250_v50  ;;  %v5261_v62 = vand.u32 4294901760, %v1795_v10  ;;  %v1671_v2 = vand.u32 4294901760, %v1670_v55 }
 0x47a   :  { %v1677_v50 = vand.u32 4294901760, %v1676_v34 }
 0x47b   :  { %1486 = vmatpush.xpose.msra.mxu3 %v1485_v61  ;;  %v1261_v53 = vsel %vm870_vm2, %v1251_v41, 0  ;;  %v1455_v61 = vsub.f32 %v1453_v11, %v1454_v51  ;;  %v5267_v1 = vsub.f32 %v1795_v10, %v5261_v62 }
 0x47c   :  { %v1281_v57 = vand.u32 4294901760, %v1261_v53 }
 0x47d   :  { %v1456_v39 = vand.u32 4294901760, %v1455_v61  ;;  %v1840_v41 = vand.u32 4294901760, %v5267_v1 }
 0x47e   :  { %1317 = vmatmul.f32.vlgmr.msrb.gmra.mxu1 %v1281_v57  ;;  %v1282_v29 = vsub.f32 %v1261_v53, %v1281_v57 }
 0x47f   :  { %1533 = vmatpush.xpose.msrb.mxu1 %v5207_v36  ;;  %v1841_v10 = vsub.f32 %v5267_v1, %v1840_v41 }
 0x480   :  { %1343 = vmatmul.f32.vlgmr.msrb.gmra.mxu2 %v1282_v29  ;;  %v1283_v58 = vand.u32 4294901760, %v1282_v29 }
 0x481   :  { %1560 = vmatpush.xpose.msrb.mxu2 %v5847_v24 }
 0x482   :  { %1368 = vmatmul.f32.vlgmr.msrb.gmra.mxu3 %v1283_v58  ;;  %v1284_v28 = vsub.f32 %v1282_v29, %v1283_v58 }
 0x483   :  { %1535 = vmatpush.xpose.msrb.mxu1 %v1450_v38  ;;  %1585 = vmatpush.xpose.msrb.mxu3 %v5207_v36  ;;  %v1842_v36 = vand.u32 4294901760, %v1841_v10 }
 0x484   :  { %v1285_v37 = vand.u32 4294901760, %v1284_v28 }
 0x485   :  { %1564 = vmatpush.xpose.msrb.mxu2 %v1483_v18 }
 0x486   :  { %1286 = vmatmul.f32.vlgmr.msrb.gmra.mxu0 %v1285_v37  ;;  %1418 = vmatmul.f32.vlgmr.msra.gmra.mxu1 %v1281_v57 }
 0x487   :  { %1508 = vmatpush.xpose.msrb.mxu0 %v5214_v17  ;;  %1587 = vmatpush.xpose.msrb.mxu3 %v1450_v38 }
 0x488   :  { %1672 = vmatpush.msra.mxu1 %v1671_v2  ;;  %1457 = vmatmul.f32.vlgmr.msra.gmra.mxu2 %v1456_v39 }
 0x489   :  { %1700 = vmatpush.msra.mxu2 %v1668_v6 }
 0x48a   :  { %1678 = vmatpush.msra.mxu1 %v1677_v50  ;;  %1488 = vmatmul.f32.vlgmr.msra.gmra.mxu3 %v5255_v54 }
 0x48b   :  { %1511 = vmatpush.xpose.msrb.mxu0 %v1482_v49  ;;  %1703 = vmatpush.msra.mxu2 %v1674_v31 }
 0x48c   :  { %1725 = vmatpush.msra.mxu3 %v1640_v25 }
 0x48e   :  { %1727 = vmatpush.msra.mxu3 %v1642_v47  ;;  %1395 = vmatmul.f32.vlgmr.msra.gmra.mxu0 %v1281_v57 }
 0x48f   :  { %1539 = vmatmul.f32.vlgmr.msrb.gmra.mxu1 %v1454_v51  ;;  %1641 = vmatpush.msra.mxu0 %v1640_v25 }
 0x490   :  { %1777 = vmatpush.msrb.mxu1 %v1640_v25  ;;  %1566 = vmatmul.f32.vlgmr.msrb.gmra.mxu2 %v5255_v54 }
 0x491   :  { %1643 = vmatpush.msra.mxu0 %v1642_v47  ;;  %1812 = vmatpush.xpose.msrb.mxu2 %v5261_v62 }
 0x492   :  { %1779 = vmatpush.msrb.mxu1 %v1642_v47  ;;  %1589 = vmatmul.f32.vlgmr.msrb.gmra.mxu3 %v5255_v54 }
 0x493   :  { %1843 = vmatpush.xpose.msrb.mxu3 %v1842_v36 }
 0x496   :  { %1514 = vmatmul.f32.vlgmr.msrb.gmra.mxu0 %v1453_v11 }
 0x497   :  { %1752 = vmatpush.msrb.mxu0 %v1669_v30 }
 0x499   :  { %1756 = vmatpush.msrb.mxu0 %v1675_v16 }
 0x4fb   :  { %v5278_v17 = vpop.f32.mrf.mxu1 }
 0x503   :  { %v5280_v38 = vpop.f32.mrf.mxu0  ;;  %v5282_v51 = vpop.f32.mrf.mxu2 }
 0x504   :  { %v5286_v25 = vpop.f32.mrf.mxu1 }
 0x505   :  { %v5284_v57 = vpop.f32.mrf.mxu3 }
 0x50b   :  { %v5288_v49 = vpop.f32.mrf.mxu0  ;;  %v1458_v18 = vpop.f32.mrf.mxu2 }
 0x50c   :  { %v1540_v11 = vpop.f32.mrf.mxu1 }
 0x50d   :  { %v1489_v47 = vpop.f32.mrf.mxu3 }
 0x50e   :  { %v1490_v6 = vadd.f32 %v1489_v47, %v1458_v18 }
 0x513   :  { %v1515_v54 = vpop.f32.mrf.mxu0  ;;  %v1567_v31 = vpop.f32.mrf.mxu2 }
 0x514   :  { %v1516_v53 = vadd.f32 %v1515_v54, %v1490_v6 }
 0x515   :  { %v1590_v16 = vpop.f32.mrf.mxu3 }
 0x516   :  { %v1541_v30 = vadd.f32 %v1540_v11, %v1516_v53 }
 0x518   :  { %v1568_v29 = vadd.f32 %v1567_v31, %v1541_v30 }
 0x51a   :  { %v1591_v58 = vadd.f32 %v1590_v16, %v1568_v29 }
 0x51c   :  { %v1593_v24 = vsel %vm870_vm2, %v1591_v58, -inf }
 0x51d   :  { %1594 = vmax.xlane.f32.xlu0 %v1593_v24 }
 0x531   :  { %1787 = vrot.lane.b32.xlu0 %v5143_v43, %s4797_s21 }
 0x590   :  { %v1595_v61 = vpop.xlane.xlu0 %1594 }
 0x591   :  { %v1596_v55 = vsub.f32 %v1591_v58, %v1595_v61 }
 0x593   :  { %v1597_v28 = vmul.f32 1.442695, %v1596_v55 }
 0x595   :  { %4754 = vpow2.f32 %v1597_v28 }
 0x59b   :  { %v4755_v37 = vpop.eup %4754 }
 0x59c   :  { %v1599_v34 = vsel %vm870_vm2, %v4755_v37, 0.0 }
 0x59d   :  { %1600 = vadd.xlane.f32.xlu2 %v1599_v34 }
 0x5a3   :  { %v1788_v39 = vpop.permute.xlu0 %1787 }
 0x5a4   :  { %v1793_v2 = vsel %vm701_vm1, %v1788_v39, 0 }
 0x5a5   :  { %v1813_v50 = vand.u32 4294901760, %v1793_v2 }
 0x5a7   :  { %v5295_v10 = vsub.f32 %v1793_v2, %v1813_v50  ;;  %1814 = vmatpush.xpose.msrb.mxu2 %v1813_v50 }
 0x5a9   :  { %v1846_v36 = vand.u32 4294901760, %v5295_v10 }
 0x5ab   :  { %v1847_v18 = vsub.f32 %v5295_v10, %v1846_v36 }
 0x5ad   :  { %v1848_v43 = vand.u32 4294901760, %v1847_v18 }
 0x5af   :  { %1849 = vmatpush.xpose.msrb.mxu3 %v1848_v43 }
 0x5b5   :  { %1785 = vrot.lane.b32.xlu2 %v5139_v33, %s4797_s21 }
 0x5bd   :  { %1982 = vrot.lane.b32.xlu2 %v5164_v63, %s4797_s21 }
 0x5c5   :  { %1980 = vrot.lane.b32.xlu2 %v5162_v48, %s4797_s21 }
 0x610   :  { %v1601_v47 = vpop.xlane.xlu2 %1600 }
 0x611   :  { %4756 = vrcp.f32 %v1601_v47  ;;  %v1613_v30 = vand.u32 2147483648, %v1601_v47  ;;  %v1611_v29 = vand.u32 2147483647, %v1601_v47  ;;  %vm1607_vm12 = vweird.f32 %v1601_v47 }
 0x613   :  { %v1614_v33 = vor.u32 1.1754944e-38, %v1613_v30  ;;  %vm1612_vm14 = vcmp.eq.f32.partialorder %v1611_v29, 8.507059e+37 }
 0x617   :  { %v4757_v6 = vpop.eup %4756 }
 0x618   :  { %v1603_v54 = vmul.f32 %v4757_v6, %v1601_v47  ;;  %v1786_v53 = vpop.permute.xlu2 %1785  ;;  %vm1608_vm11 = vweird.f32 %v4757_v6 }
 0x619   :  { %v1791_v16 = vsel %vm701_vm1, %v1786_v53, 0  ;;  %vm1609_vm13 = vmor %vm1607_vm12, %vm1608_vm11 }
 0x61a   :  { %v1604_v11 = vsub.f32 1.0, %v1603_v54  ;;  %v1815_v63 = vand.u32 4294901760, %v1791_v16 }
 0x61c   :  { %v1605_v31 = vmul.f32 %v4757_v6, %v1604_v11  ;;  %v1816_v34 = vsub.f32 %v1791_v16, %v1815_v63 }
 0x61e   :  { %v1606_v58 = vadd.f32 %v4757_v6, %v1605_v31  ;;  %v1817_v43 = vand.u32 4294901760, %v1816_v34 }
 0x620   :  { %v1610_v24 = vsel %vm1609_vm13, %v4757_v6, %v1606_v58  ;;  %v1983_v48 = vpop.permute.xlu2 %1982  ;;  %v1818_v30 = vsub.f32 %v1816_v34, %v1817_v43 }
 0x621   :  { %v1615_v61 = vsel %vm1612_vm14, %v1614_v33, %v1610_v24  ;;  %v2003_v55 = vand.u32 4294901760, %v1983_v48 }
 0x622   :  { %v1616_v28 = vmul.f32 %v4755_v37, %v1615_v61  ;;  %v1819_v33 = vand.u32 4294901760, %v1818_v30  ;;  %v4784_v61 = vld [vmem:[%s5763_s4 + $0x18] sm:$0xff] }
 0x623   :  { %v2031_v39 = vsub.f32 %v1983_v48, %v2003_v55  ;;  %2171 = vrot.lane.b32.xlu2 %v4784_v61, %s4798_s24 }
 0x624   :  { %v1624_v2 = vsel %vm870_vm2, %v1616_v28, 0 }
 0x625   :  { %v1644_v18 = vand.u32 4294901760, %v1624_v2  ;;  %v2032_v54 = vand.u32 4294901760, %v2031_v39 }
 0x627   :  { %1680 = vmatmul.f32.vlgmr.msra.gmra.mxu1 %v1644_v18  ;;  %v1645_v53 = vsub.f32 %v1624_v2, %v1644_v18  ;;  %v2033_v37 = vsub.f32 %v2031_v39, %v2032_v54 }
 0x628   :  { %1896 = vmatpush.xpose.msra.mxu1 %v5261_v62  ;;  %v1981_v47 = vpop.permute.xlu2 %1980 }
 0x629   :  { %v2005_v11 = vand.u32 4294901760, %v1981_v47  ;;  %1706 = vmatmul.f32.vlgmr.msra.gmra.mxu2 %v1645_v53  ;;  %v1646_v6 = vand.u32 4294901760, %v1645_v53  ;;  %v2034_v24 = vand.u32 4294901760, %v2033_v37 }
 0x62a   :  { %1923 = vmatpush.xpose.msra.mxu2 %v1840_v41 }
 0x62b   :  { %v2037_v31 = vsub.f32 %v1981_v47, %v2005_v11  ;;  %1731 = vmatmul.f32.vlgmr.msra.gmra.mxu3 %v1646_v6  ;;  %v1647_v29 = vsub.f32 %v1645_v53, %v1646_v6 }
 0x62c   :  { %1898 = vmatpush.xpose.msra.mxu1 %v1813_v50  ;;  %1948 = vmatpush.xpose.msra.mxu3 %v5261_v62 }
 0x62d   :  { %v2038_v16 = vand.u32 4294901760, %v2037_v31  ;;  %v1648_v58 = vand.u32 4294901760, %v1647_v29 }
 0x62e   :  { %1927 = vmatpush.xpose.msra.mxu2 %v1846_v36 }
 0x62f   :  { %1649 = vmatmul.f32.vlgmr.msra.gmra.mxu0 %v1648_v58  ;;  %1781 = vmatmul.f32.vlgmr.msrb.gmra.mxu1 %v1644_v18  ;;  %v2039_v48 = vsub.f32 %v2037_v31, %v2038_v16 }
 0x630   :  { %1871 = vmatpush.xpose.msra.mxu0 %v5267_v1  ;;  %1950 = vmatpush.xpose.msra.mxu3 %v1813_v50 }
 0x631   :  { %2035 = vmatpush.msrb.mxu1 %v2034_v24  ;;  %1820 = vmatmul.f32.vlgmr.msrb.gmra.mxu2 %v1819_v33  ;;  %v2040_v41 = vand.u32 4294901760, %v2039_v48  ;;  %v4786_v48 = vld [vmem:[%s5763_s4 + $0x8] sm:$0xff] }
 0x632   :  { %2063 = vmatpush.msrb.mxu2 %v2031_v39 }
 0x633   :  { %1851 = vmatmul.f32.vlgmr.msrb.gmra.mxu3 %v1815_v63  ;;  %2041 = vmatpush.msrb.mxu1 %v2040_v41  ;;  %v1319_v41 = vadd.f32 %v5278_v17, %v5280_v38  ;;  %v4789_v17 = vld [vmem:[%s5766_s1 + $0x8] sm:$0xff] }
 0x634   :  { %1874 = vmatpush.xpose.msra.mxu0 %v5295_v10  ;;  %2066 = vmatpush.msrb.mxu2 %v2037_v31 }
 0x635   :  { %2088 = vmatpush.msrb.mxu3 %v2003_v55  ;;  %v1345_v61 = vadd.f32 %v5282_v51, %v1319_v41 }
 0x637   :  { %2090 = vmatpush.msrb.mxu3 %v2005_v11  ;;  %1758 = vmatmul.f32.vlgmr.msrb.gmra.mxu0 %v1644_v18 }
 0x638   :  { %1902 = vmatmul.f32.vlgmr.msra.gmra.mxu1 %v1817_v43  ;;  %2004 = vmatpush.msrb.mxu0 %v2003_v55 }
 0x639   :  { %2140 = vmatpush.msra.mxu1 %v2003_v55  ;;  %1929 = vmatmul.f32.vlgmr.msra.gmra.mxu2 %v1815_v63 }
 0x63a   :  { %2006 = vmatpush.msrb.mxu0 %v2005_v11 }
 0x63b   :  { %2142 = vmatpush.msra.mxu1 %v2005_v11  ;;  %1952 = vmatmul.f32.vlgmr.msra.gmra.mxu3 %v1815_v63 }
 0x63f   :  { %1877 = vmatmul.f32.vlgmr.msra.gmra.mxu0 %v1816_v34 }
 0x640   :  { %2115 = vmatpush.msra.mxu0 %v2032_v54 }
 0x642   :  { %2119 = vmatpush.msra.mxu0 %v2038_v16  ;;  %v4785_v16 = vld [vmem:[%s5763_s4 + $0x10] sm:$0xff] }
 0x67d   :  { %v2172_v30 = vpop.permute.xlu2 %2171 }
 0x67e   :  { %v5318_v31 = vand.u32 4294901760, %v2172_v30 }
 0x680   :  { %2193 = vmatpush.msra.mxu2 %v5318_v31 }
 0x6a4   :  { %v1681_v62 = vpop.f32.mrf.mxu1 }
 0x6ac   :  { %v1650_v1 = vpop.f32.mrf.mxu0  ;;  %v1707_v50 = vpop.f32.mrf.mxu2 }
 0x6ad   :  { %v1682_v36 = vadd.f32 %v1681_v62, %v1650_v1  ;;  %v1782_v2 = vpop.f32.mrf.mxu1  ;;  %v1370_v62 = vadd.f32 %v5284_v57, %v1345_v61 }
 0x6ae   :  { %v1732_v28 = vpop.f32.mrf.mxu3 }
 0x6af   :  { %v1708_v10 = vadd.f32 %v1707_v50, %v1682_v36  ;;  %v1397_v1 = vadd.f32 %v5288_v49, %v1370_v62  ;;  %v4787_v50 = vld [vmem:[%s5766_s1] sm:$0xff]  ;;  %s4801_s1 = smov 24  }
 0x6b1   :  { %v1733_v39 = vadd.f32 %v1732_v28, %v1708_v10  ;;  %v1420_v36 = vadd.f32 %v5286_v25, %v1397_v1 }
 0x6b4   :  { %v1759_v53 = vpop.f32.mrf.mxu0  ;;  %v1821_v43 = vpop.f32.mrf.mxu2 }
 0x6b5   :  { %v1760_v18 = vadd.f32 %v1759_v53, %v1733_v39  ;;  %v1903_v11 = vpop.f32.mrf.mxu1 }
 0x6b6   :  { %v1852_v55 = vpop.f32.mrf.mxu3 }
 0x6b7   :  { %v1783_v47 = vadd.f32 %v1782_v2, %v1760_v18  ;;  %v1853_v63 = vadd.f32 %v1852_v55, %v1821_v43 }
 0x6b9   :  { %2153 = vrot.lane.b32.xlu2 %v1783_v47, %s4799_s25 }
 0x6bc   :  { %v1878_v34 = vpop.f32.mrf.mxu0  ;;  %v1930_v37 = vpop.f32.mrf.mxu2 }
 0x6bd   :  { %v1879_v54 = vadd.f32 %v1878_v34, %v1853_v63 }
 0x6be   :  { %v1953_v58 = vpop.f32.mrf.mxu3 }
 0x6bf   :  { %v1904_v6 = vadd.f32 %v1903_v11, %v1879_v54 }
 0x6c1   :  { %v1931_v29 = vadd.f32 %v1930_v37, %v1904_v6  ;;  %2169 = vrot.lane.b32.xlu2 %v4785_v16, %s4798_s24 }
 0x6c3   :  { %v1954_v33 = vadd.f32 %v1953_v58, %v1931_v29  ;;  %v5357_v58 = vsub.f32 %v2172_v30, %v5318_v31 }
 0x6c5   :  { %v1956_v24 = vsel %vm870_vm2, %v1954_v33, -inf }
 0x6c6   :  { %1957 = vmax.xlane.f32.xlu1 %v1956_v24 }
 0x6c9   :  { %2167 = vrot.lane.b32.xlu2 %v4786_v48, %s4798_s24  ;;  %v5365_v48 = vand.u32 4294901760, %v5357_v58 }
 0x6cb   :  { %v2224_v62 = vsub.f32 %v5357_v58, %v5365_v48 }
 0x6d1   :  { %2399 = vrot.lane.b32.xlu2 %v4936_v26, %s4793_s27  ;;  %v4788_v26 = vld [vmem:[%s5763_s4] sm:$0xff] }
 0x6d9   :  { %2812 = vrot.lane.b32.xlu2 %v4787_v50, %s4793_s27  ;;  %v5373_v50 = vand.u32 4294901760, %v2224_v62 }
 0x6db   :  { %2226 = vmatpush.msra.mxu3 %v5373_v50 }
 0x6df   :  { %2149 = vrot.lane.b32.xlu1 %v1420_v36, %s4800_s9 }
 0x6e7   :  { %2165 = vrot.lane.b32.xlu1 %v4788_v26, %s4798_s24 }
 0x6ef   :  { %2588 = vrot.lane.b32.xlu1 %v4949_v35, %s4793_s27 }
 0x6f7   :  { %2814 = vrot.lane.b32.xlu1 %v4789_v17, %s4793_s27 }
 0x739   :  { %v1958_v38 = vpop.xlane.xlu1 %1957 }
 0x73a   :  { %v1959_v51 = vsub.f32 %v1954_v33, %v1958_v38  ;;  %v5360_v33 = vpop.permute.xlu2 %2153 }
 0x73c   :  { %v1960_v57 = vmul.f32 1.442695, %v1959_v51 }
 0x73e   :  { %4758 = vpow2.f32 %v1960_v57 }
 0x742   :  { %v2170_v41 = vpop.permute.xlu2 %2169 }
 0x743   :  { %v5369_v1 = vand.u32 4294901760, %v2170_v41 }
 0x744   :  { %v4759_v25 = vpop.eup %4758 }
 0x745   :  { %v1962_v49 = vsel %vm870_vm2, %v4759_v25, 0.0  ;;  %v5376_v36 = vsub.f32 %v2170_v41, %v5369_v1  ;;  %2195 = vmatpush.msra.mxu2 %v5369_v1 }
 0x746   :  { %1963 = vadd.xlane.f32.xlu0 %v1962_v49 }
 0x747   :  { %v5385_v17 = vand.u32 4294901760, %v5376_v36 }
 0x749   :  { %v2230_v38 = vsub.f32 %v5376_v36, %v5385_v17 }
 0x74a   :  { %v2168_v51 = vpop.permute.xlu2 %2167 }
 0x74b   :  { %v5390_v57 = vand.u32 4294901760, %v2168_v51 }
 0x74d   :  { %2197 = vmatpush.msra.mxu2 %v5390_v57 }
 0x751   :  { %v5362_v24 = vpop.permute.xlu1 %2149 }
 0x759   :  { %v2166_v61 = vpop.permute.xlu1 %2165 }
 0x75a   :  { %v5371_v30 = vand.u32 4294901760, %v2166_v61 }
 0x75c   :  { %v5382_v26 = vsub.f32 %v2166_v61, %v5371_v30  ;;  %2199 = vmatpush.msra.mxu2 %v5371_v30 }
 0x75e   :  { %v5395_v49 = vand.u32 4294901760, %v5382_v26 }
 0x7b9   :  { %v1964_v28 = vpop.xlane.xlu0 %1963 }
 0x7ba   :  { %4760 = vrcp.f32 %v1964_v28  ;;  %v1976_v35 = vand.u32 2147483648, %v1964_v28  ;;  %v1974_v18 = vand.u32 2147483647, %v1964_v28  ;;  %vm1970_vm3 = vweird.f32 %v1964_v28 }
 0x7bc   :  { %v1977_v47 = vor.u32 1.1754944e-38, %v1976_v35  ;;  %vm1975_vm5 = vcmp.eq.f32.partialorder %v1974_v18, 8.507059e+37  ;;  %v2242_v18 = vsub.f32 %v5382_v26, %v5395_v49 }
 0x7c0   :  { %v4761_v10 = vpop.eup %4760 }
 0x7c1   :  { %v1966_v39 = vmul.f32 %v4761_v10, %v1964_v28  ;;  %vm1971_vm15 = vweird.f32 %v4761_v10 }
 0x7c2   :  { %vm1972_vm4 = vmor %vm1970_vm3, %vm1971_vm15 }
 0x7c3   :  { %v1967_v2 = vsub.f32 1.0, %v1966_v39  ;;  %v5398_v39 = vsub.f32 %v2168_v51, %v5390_v57 }
 0x7c5   :  { %v1968_v53 = vmul.f32 %v4761_v10, %v1967_v2 }
 0x7c7   :  { %v1969_v43 = vadd.f32 %v4761_v10, %v1968_v53  ;;  %v5404_v53 = vand.u32 4294901760, %v5398_v39 }
 0x7c9   :  { %v1973_v55 = vsel %vm1972_vm4, %v4761_v10, %v1969_v43 }
 0x7ca   :  { %v1978_v63 = vsel %vm1975_vm5, %v1977_v47, %v1973_v55  ;;  %v2236_v47 = vsub.f32 %v5398_v39, %v5404_v53 }
 0x7cb   :  { %v1979_v34 = vmul.f32 %v4759_v25, %v1978_v63  ;;  %v5392_v25 = vand.u32 4294901760, %v2230_v38 }
 0x7cc   :  { %v5418_v63 = vand.u32 4294901760, %v2236_v47  ;;  %v5860_v47 = vld [vmem:[#allocation24_spill] sm:$0xff] }
 0x7cd   :  { %v1987_v54 = vsel %vm870_vm2, %v1979_v34, 0  ;;  %2232 = vmatpush.msra.mxu3 %v5392_v25  ;;  %v5420_v34 = vand.u32 4294901760, %v2242_v18  ;;  %v5859_v18 = vld [vmem:[#allocation20_spill] sm:$0xff] }
 0x7ce   :  { %v2007_v11 = vand.u32 4294901760, %v1987_v54 }
 0x7cf   :  { %2238 = vmatpush.msra.mxu3 %v5418_v63 }
 0x7d0   :  { %2043 = vmatmul.f32.vlgmr.msrb.gmra.mxu1 %v2007_v11  ;;  %v2008_v6 = vsub.f32 %v1987_v54, %v2007_v11 }
 0x7d1   :  { %2293 = vmatpush.msrb.mxu1 %v5318_v31  ;;  %2244 = vmatpush.msra.mxu3 %v5420_v34 }
 0x7d2   :  { %2069 = vmatmul.f32.vlgmr.msrb.gmra.mxu2 %v2008_v6  ;;  %v2009_v37 = vand.u32 4294901760, %v2008_v6 }
 0x7d3   :  { %2295 = vmatpush.msrb.mxu1 %v5369_v1  ;;  %2322 = vmatpush.msrb.mxu2 %v5365_v48 }
 0x7d4   :  { %2094 = vmatmul.f32.vlgmr.msrb.gmra.mxu3 %v2009_v37  ;;  %v2010_v29 = vsub.f32 %v2008_v6, %v2009_v37 }
 0x7d5   :  { %2297 = vmatpush.msrb.mxu1 %v5390_v57  ;;  %2326 = vmatpush.msrb.mxu2 %v5385_v17 }
 0x7d6   :  { %v2011_v16 = vand.u32 4294901760, %v2010_v29  ;;  %2353 = vmatpush.msrb.mxu3 %v5318_v31  ;;  %v2400_v29 = vpop.permute.xlu2 %2399 }
 0x7d7   :  { %2299 = vmatpush.msrb.mxu1 %v5371_v30  ;;  %2330 = vmatpush.msrb.mxu2 %v5404_v53  ;;  %v2401_v41 = vsel %vm38_vm0, %v2400_v29, 0  ;;  %v5867_v29 = vld [vmem:[#allocation10_spill] sm:$0xff] }
 0x7d8   :  { %2012 = vmatmul.f32.vlgmr.msrb.gmra.mxu0 %v2011_v16  ;;  %2144 = vmatmul.f32.vlgmr.msra.gmra.mxu1 %v2007_v11  ;;  %v5446_v62 = vand.u32 4294901760, %v2401_v41 }
 0x7d9   :  { %2264 = vmatpush.msrb.mxu0 %v5357_v58  ;;  %2449 = vmatpush.msra.mxu1 %v4901_v19 }
 0x7da   :  { %2334 = vmatpush.msrb.mxu2 %v5395_v49  ;;  %2355 = vmatpush.msrb.mxu3 %v5369_v1 }
 0x7db   :  { %2267 = vmatpush.msrb.mxu0 %v5376_v36  ;;  %2455 = vmatpush.msra.mxu1 %v4903_v20 }
 0x7dc   :  { %2357 = vmatpush.msrb.mxu3 %v5390_v57 }
 0x7dd   :  { %2270 = vmatpush.msrb.mxu0 %v5398_v39  ;;  %2461 = vmatpush.msra.mxu1 %v4910_v22  ;;  %v954_v22 = vadd.f32 %v5229_v42, %v5231_v0  ;;  %v5453_v0 = vsub.f32 %v2401_v41, %v5446_v62 }
 0x7de   :  { %2359 = vmatpush.msrb.mxu3 %v5371_v30 }
 0x7df   :  { %2273 = vmatpush.msrb.mxu0 %v5382_v26  ;;  %2467 = vmatpush.msra.mxu1 %v4916_v23  ;;  %v980_v23 = vadd.f32 %v5233_v45, %v954_v22  ;;  %v5864_v22 = vld [vmem:[#allocation11_spill] sm:$0xff] }
 0x7e0   :  { %2121 = vmatmul.f32.vlgmr.msra.gmra.mxu0 %v2007_v11 }
 0x7e1   :  { %2416 = vmatpush.msra.mxu0 %v4848_v3  ;;  %v1005_v37 = vadd.f32 %v5235_v56, %v980_v23  ;;  %v5865_v23 = vld [vmem:[#allocation29_spill] sm:$0xff] }
 0x7e3   :  { %2418 = vmatpush.msra.mxu0 %v4853_v5  ;;  %v1032_v16 = vadd.f32 %v5239_v32, %v1005_v37  ;;  %v5866_v37 = vld [vmem:[#allocation16_spill] sm:$0xff] }
 0x7e5   :  { %2420 = vmatpush.msra.mxu0 %v4851_v4  ;;  %v1055_v61 = vadd.f32 %v5237_v52, %v1032_v16  ;;  %v2425_v52 = vand.u32 4294901760, %v5453_v0  ;;  %v5868_v16 = vld [vmem:[#allocation22_spill] sm:$0xff] }
 0x7e7   :  { %2422 = vmatpush.msra.mxu0 %v4858_v7  ;;  %v2160_v38 = vsel %vm701_vm1, %v1055_v61, %v5362_v24  ;;  %v5869_v61 = vld [vmem:[#allocation12_spill] sm:$0xff] }
 0x7e8   :  { %v2161_v42 = vsel %vm870_vm2, %v2160_v38, %v5360_v33  ;;  %v5870_v38 = vld [vmem:[#allocation26_spill] sm:$0xff] }
 0x84d   :  { %v2044_v28 = vpop.f32.mrf.mxu1 }
 0x855   :  { %v2013_v10 = vpop.f32.mrf.mxu0  ;;  %v2070_v35 = vpop.f32.mrf.mxu2 }
 0x856   :  { %v2045_v2 = vadd.f32 %v2044_v28, %v2013_v10  ;;  %v2145_v6 = vpop.f32.mrf.mxu1  ;;  %v2426_v28 = vsub.f32 %v5453_v0, %v2425_v52 }
 0x857   :  { %v2095_v55 = vpop.f32.mrf.mxu3 }
 0x858   :  { %v2071_v43 = vadd.f32 %v2070_v35, %v2045_v2  ;;  %v2427_v2 = vand.u32 4294901760, %v2426_v28  ;;  %v5858_v35 = vld [vmem:[#allocation18_spill] sm:$0xff] }
 0x85a   :  { %v2096_v54 = vadd.f32 %v2095_v55, %v2071_v43 }
 0x85d   :  { %v2122_v11 = vpop.f32.mrf.mxu0 }
 0x85e   :  { %v2123_v19 = vadd.f32 %v2122_v11, %v2096_v54  ;;  %v5861_v54 = vld [vmem:[#allocation5_spill] sm:$0xff] }
 0x85f   :  { %v5862_v11 = vld [vmem:[#allocation21_spill] sm:$0xff] }
 0x860   :  { %v2146_v20 = vadd.f32 %v2145_v6, %v2123_v19  ;;  %v5863_v19 = vld [vmem:[#allocation27_spill] sm:$0xff] }
 0x862   :  { %2157 = vrot.lane.b32.xlu0 %v2146_v20, %s4801_s1 }
 0x86a   :  { %2590 = vrot.lane.b32.xlu0 %v4964_v40, %s4793_s27 }
 0x8d4   :  { %v2158_v40 = vpop.permute.xlu0 %2157 }
 0x8d5   :  { %v2163_v45 = vsel %vm2162_vm6, %v2161_v42, %v2158_v40  ;;  %v5871_v40 = vld [vmem:[#allocation14_spill] sm:$0xff]  ;;  %v5872_v42 = vld [vmem:[#allocation28_spill] sm:$0xff] }
 0x8d6   :  { %v2178_v56 = vsel %vm38_vm0, %v2163_v45, 0  ;;  %v5873_v45 = vld [vmem:[#allocation19_spill] sm:$0xff] }
 0x8d7   :  { %v2200_v32 = vand.u32 4294901760, %v2178_v56 }
 0x8d9   :  { %v2201_v51 = vsub.f32 %v2178_v56, %v2200_v32  ;;  %2246 = vmatmul.f32.vlgmr.msra.gmra.mxu3 %v2200_v32  ;;  %v5874_v56 = vld [vmem:[#allocation23_spill] sm:$0xff] }
 0x8da   :  { %2516 = vmatpush.msra.mxu3 %v4848_v3 }
 0x8db   :  { %2276 = vmatmul.f32.vlgmr.msrb.gmra.mxu0 %v2201_v51  ;;  %v2202_v24 = vand.u32 4294901760, %v2201_v51 }
 0x8dc   :  { %2518 = vmatpush.msra.mxu3 %v4853_v5  ;;  %2545 = vmatpush.msrb.mxu0 %v4876_v12  ;;  %v5851_v12 = vld [vmem:[#allocation7_spill] sm:$0xff] }
 0x8dd   :  { %2303 = vmatmul.f32.vlgmr.msrb.gmra.mxu1 %v2202_v24  ;;  %v2203_v33 = vsub.f32 %v2201_v51, %v2202_v24  ;;  %v2813_v51 = vpop.permute.xlu2 %2812 }
 0x8de   :  { %2520 = vmatpush.msra.mxu3 %v4851_v4  ;;  %2549 = vmatpush.msrb.mxu0 %v4879_v13  ;;  %v5853_v13 = vld [vmem:[#allocation9_spill] sm:$0xff]  ;;  %v2816_v24 = vsel %vm38_vm0, %v2813_v51, 0 }
 0x8df   :  { %2576 = vmatpush.msrb.mxu1 %v4848_v3  ;;  %v2204_v10 = vand.u32 4294901760, %v2203_v33  ;;  %v2589_v3 = vpop.permute.xlu1 %2588  ;;  %v2840_v28 = vand.u32 4294901760, %v2816_v24 }
 0x8e0   :  { %2522 = vmatpush.msra.mxu3 %v4858_v7  ;;  %2553 = vmatpush.msrb.mxu0 %v4883_v14  ;;  %v5854_v14 = vld [vmem:[#allocation4_spill] sm:$0xff] }
 0x8e1   :  { %2578 = vmatpush.msrb.mxu1 %v4853_v5  ;;  %2205 = vmatmul.f32.vlgmr.msra.gmra.mxu2 %v2204_v10  ;;  %v5848_v5 = vld [vmem:[#allocation2_spill] sm:$0xff]  ;;  %v2841_v33 = vsub.f32 %v2816_v24, %v2840_v28 }
 0x8e2   :  { %2361 = vmatmul.f32.vlgmr.msrb.gmra.mxu3 %v2200_v32  ;;  %2487 = vmatpush.msra.mxu2 %v4862_v8  ;;  %v5850_v8 = vld [vmem:[#allocation6_spill] sm:$0xff] }
 0x8e3   :  { %2650 = vmatpush.msrb.mxu3 %v4994_v59  ;;  %2557 = vmatpush.msrb.mxu0 %v4887_v15  ;;  %v2591_v59 = vpop.permute.xlu0 %2590  ;;  %v2842_v10 = vand.u32 4294901760, %v2841_v33 }
 0x8e4   :  { %2580 = vmatpush.msrb.mxu1 %v4851_v4  ;;  %2428 = vmatmul.f32.vlgmr.msra.gmra.mxu0 %v2427_v2  ;;  %v5849_v4 = vld [vmem:[#allocation15_spill] sm:$0xff] }
 0x8e5   :  { %2656 = vmatpush.msrb.mxu3 %v5026_v21  ;;  %2692 = vmatpush.msra.mxu0 %v4972_v46  ;;  %v5855_v46 = vld [vmem:[#allocation8_spill] sm:$0xff]  ;;  %v2843_v2 = vsub.f32 %v2841_v33, %v2842_v10 }
 0x8e6   :  { %2490 = vmatpush.msra.mxu2 %v4866_v9  ;;  %2582 = vmatpush.msrb.mxu1 %v4858_v7  ;;  %v2592_v9 = vsel %vm38_vm0, %v2589_v3, 0  ;;  %v5852_v7 = vld [vmem:[#allocation3_spill] sm:$0xff] }
 0x8e7   :  { %2469 = vmatmul.f32.vlgmr.msra.gmra.mxu1 %v5446_v62  ;;  %2662 = vmatpush.msrb.mxu3 %v5034_v27  ;;  %v2616_v15 = vand.u32 4294901760, %v2592_v9  ;;  %v5857_v27 = vld [vmem:[#allocation17_spill] sm:$0xff]  ;;  %v2815_v3 = vpop.permute.xlu1 %2814 }
 0x8e8   :  { %2695 = vmatpush.msra.mxu0 %v4997_v60  ;;  %2726 = vmatpush.msra.mxu1 %v4967_v44  ;;  %v5856_v60 = vld [vmem:[#allocation13_spill] sm:$0xff] }
 0x8e9   :  { %2493 = vmatpush.msra.mxu2 %v5848_v5  ;;  %2668 = vmatpush.msrb.mxu3 %v5849_v4  ;;  %v2617_v21 = vsub.f32 %v2592_v9, %v2616_v15  ;;  %v2818_v5 = vsel %vm38_vm0, %v2815_v3, 0  ;;  %v2844_v4 = vand.u32 4294901760, %v2843_v2 }
 0x8ea   :  { %2698 = vmatpush.msra.mxu0 %v5850_v8  ;;  %2728 = vmatpush.msra.mxu1 %v5851_v12  ;;  %v2848_v8 = vand.u32 4294901760, %v2818_v5 }
 0x8eb   :  { %2496 = vmatpush.msra.mxu2 %v5852_v7  ;;  %2526 = vmatmul.f32.vlgmr.msra.gmra.mxu3 %v2425_v52  ;;  %v2618_v43 = vand.u32 4294901760, %v2617_v21  ;;  %v5875_v52 = vld [vmem:[#allocation25_spill] sm:$0xff] }
 0x8ec   :  { %2336 = vmatmul.f32.vlgmr.msrb.gmra.mxu2 %v2200_v32  ;;  %2701 = vmatpush.msra.mxu0 %v5853_v13 }
 0x8ed   :  { %2609 = vmatpush.msrb.mxu2 %v4967_v44  ;;  %2730 = vmatpush.msra.mxu1 %v5854_v14  ;;  %v2619_v6 = vsub.f32 %v2617_v21, %v2618_v43 }
 0x8ee   :  { %2796 = vmatpush.msra.mxu3 %v4967_v44  ;;  %2559 = vmatmul.f32.vlgmr.msrb.gmra.mxu0 %v5446_v62  ;;  %v2594_v44 = vsel %vm38_vm0, %v2591_v59, 0 }
 0x8ef   :  { %2611 = vmatpush.msrb.mxu2 %v5851_v12  ;;  %2732 = vmatpush.msra.mxu1 %v5855_v46  ;;  %v2624_v55 = vand.u32 4294901760, %v2594_v44  ;;  %v2620_v41 = vand.u32 4294901760, %v2619_v6 }
 0x8f0   :  { %2798 = vmatpush.msra.mxu3 %v5851_v12  ;;  %2833 = vmatpush.msrb.mxu0 %v5856_v60  ;;  %v2849_v12 = vsub.f32 %v2818_v5, %v2848_v8 }
 0x8f1   :  { %2584 = vmatmul.f32.vlgmr.msrb.gmra.mxu1 %v5446_v62  ;;  %2613 = vmatpush.msrb.mxu2 %v5854_v14  ;;  %v2625_v20 = vsub.f32 %v2594_v44, %v2624_v55 }
 0x8f2   :  { %2800 = vmatpush.msra.mxu3 %v5854_v14  ;;  %2835 = vmatpush.msrb.mxu0 %v5857_v27  ;;  %v2850_v9 = vand.u32 4294901760, %v2849_v12 }
 0x8f3   :  { %2874 = vmatpush.msrb.mxu1 %v5858_v35  ;;  %2615 = vmatpush.msrb.mxu2 %v5855_v46  ;;  %v2626_v62 = vand.u32 4294901760, %v2625_v20 }
 0x8f4   :  { %2802 = vmatpush.msra.mxu3 %v5855_v46  ;;  %2837 = vmatpush.msrb.mxu0 %v5859_v18  ;;  %v2851_v7 = vsub.f32 %v2849_v12, %v2850_v9 }
 0x8f5   :  { %2880 = vmatpush.msrb.mxu1 %v5860_v47  ;;  %2499 = vmatmul.f32.vlgmr.msra.gmra.mxu2 %v5453_v0  ;;  %v2627_v0 = vsub.f32 %v2625_v20, %v2626_v62 }
 0x8f6   :  { %2670 = vmatmul.f32.vlgmr.msrb.gmra.mxu3 %v2616_v15  ;;  %2761 = vmatpush.msra.mxu2 %v5861_v54  ;;  %v2852_v13 = vand.u32 4294901760, %v2851_v7 }
 0x8f7   :  { %2839 = vmatpush.msrb.mxu0 %v5862_v11  ;;  %2886 = vmatpush.msrb.mxu1 %v5863_v19  ;;  %v2628_v32 = vand.u32 4294901760, %v2627_v0 }
 0x8f8   :  { %2950 = vmatpush.msrb.mxu3 %v5856_v60  ;;  %2704 = vmatmul.f32.vlgmr.msra.gmra.mxu0 %v2617_v21 }
 0x8f9   :  { %2765 = vmatpush.msra.mxu2 %v5864_v22  ;;  %2892 = vmatpush.msrb.mxu1 %v5865_v23  ;;  %v5876_v22 = vld [vmem:[#allocation30_spill] sm:$0xff] }
 0x8fa   :  { %2952 = vmatpush.msrb.mxu3 %v5857_v27  ;;  %2985 = vmatpush.msra.mxu0 %v5866_v37  ;;  %v5877_v23 = vperm.slane %v5876_v22, 0 }
 0x8fb   :  { %2736 = vmatmul.f32.vlgmr.msra.gmra.mxu1 %v2618_v43  ;;  %2769 = vmatpush.msra.mxu2 %v5867_v29 }
 0x8fc   :  { %2954 = vmatpush.msrb.mxu3 %v5859_v18  ;;  %2989 = vmatpush.msra.mxu0 %v5868_v16 }
 0x8fd   :  { %3020 = vmatpush.msra.mxu1 %v5856_v60  ;;  %2773 = vmatpush.msra.mxu2 %v5869_v61 }
 0x8fe   :  { %2956 = vmatpush.msrb.mxu3 %v5862_v11  ;;  %2993 = vmatpush.msra.mxu0 %v5870_v38 }
 0x8ff   :  { %3022 = vmatpush.msra.mxu1 %v5857_v27  ;;  %2621 = vmatmul.f32.vlgmr.msrb.gmra.mxu2 %v2620_v41 }
 0x900   :  { %2674 = vmatmul.f32.gmra.mxu3 %v2624_v55  ;;  %2916 = vmatpush.msrb.mxu2 %v5871_v40  ;;  %v5878_v40 = vld [vmem:[#allocation31_spill] sm:$0xff] }
 0x901   :  { %2997 = vmatpush.msra.mxu0 %v5872_v42  ;;  %3024 = vmatpush.msra.mxu1 %v5859_v18 }
 0x902   :  { %2709 = vmatmul.f32.gmra.mxu0 %v2625_v20  ;;  %2919 = vmatpush.msrb.mxu2 %v5873_v45 }
 0x903   :  { %3026 = vmatpush.msra.mxu1 %v5862_v11 }
 0x904   :  { %2742 = vmatmul.f32.gmra.mxu1 %v2626_v62  ;;  %2922 = vmatpush.msrb.mxu2 %v5874_v56 }
 0x906   :  { %2925 = vmatpush.msrb.mxu2 %v5875_v52 }
 0x907   :  { %2629 = vmatmul.f32.gmra.mxu2 %v2628_v32 }
 0x908   :  { %2804 = vmatmul.f32.vlgmr.msra.gmra.mxu3 %v2616_v15 }
 0x90a   :  { %2845 = vmatmul.f32.vlgmr.msrb.gmra.mxu0 %v2844_v4 }
 0x90c   :  { %2894 = vmatmul.f32.vlgmr.msrb.gmra.mxu1 %v2840_v28 }
 0x90f   :  { %2775 = vmatmul.f32.vlgmr.msra.gmra.mxu2 %v2616_v15  ;;  %v5534_v15 = vld [vmem:[%s5768_s5] sm:$0xff] }
 0x910   :  { %2808 = vmatmul.f32.gmra.mxu3 %v2624_v55  ;;  %v2164_v46 = vperm.slane %v5534_v15, 3 }
 0x912   :  { %2853 = vmatmul.f32.gmra.mxu0 %v2852_v13 }
 0x914   :  { %2898 = vmatmul.f32.gmra.mxu1 %v2848_v8 }
 0x917   :  { %2779 = vmatmul.f32.gmra.mxu2 %v2624_v55 }
 0x918   :  { %2960 = vmatmul.f32.vlgmr.msrb.gmra.mxu3 %v2842_v10 }
 0x91a   :  { %2999 = vmatmul.f32.vlgmr.msra.gmra.mxu0 %v2840_v28 }
 0x91c   :  { %3028 = vmatmul.f32.vlgmr.msra.gmra.mxu1 %v2840_v28 }
 0x91f   :  { %2928 = vmatmul.f32.vlgmr.msrb.gmra.mxu2 %v2841_v33 }
 0x920   :  { %2966 = vmatmul.f32.gmra.mxu3 %v2850_v9 }
 0x922   :  { %3003 = vmatmul.f32.gmra.mxu0 %v2848_v8 }
 0x924   :  { %3032 = vmatmul.f32.gmra.mxu1 %v2848_v8 }
 0x927   :  { %2933 = vmatmul.f32.gmra.mxu2 %v2849_v12 }
 0x958   :  { %v2277_v27 = vpop.f32.mrf.mxu0 }
 0x95a   :  { %v2304_v35 = vpop.f32.mrf.mxu1 }
 0x95c   :  { %v2247_v14 = vpop.f32.mrf.mxu3 }
 0x961   :  { %v2429_v19 = vpop.f32.mrf.mxu0 }
 0x962   :  { %v2430_v37 = vadd.f32 %v2429_v19, %v5877_v23 }
 0x964   :  { %v2206_v59 = vpop.f32.mrf.mxu2  ;;  %v2470_v20 = vpop.f32.mrf.mxu1 }
 0x965   :  { %v2207_v60 = vadd.f32 %v2206_v59, %v2164_v46  ;;  %v2362_v18 = vpop.f32.mrf.mxu3  ;;  %v2471_v41 = vadd.f32 %v2470_v20, %v2430_v37 }
 0x967   :  { %v2248_v21 = vadd.f32 %v2247_v14, %v2207_v60 }
 0x969   :  { %v2278_v44 = vadd.f32 %v2277_v27, %v2248_v21 }
 0x96b   :  { %v2305_v43 = vadd.f32 %v2304_v35, %v2278_v44  ;;  %v2560_v16 = vpop.f32.mrf.mxu0 }
 0x96e   :  { %v2527_v11 = vpop.f32.mrf.mxu3  ;;  %v2585_v62 = vpop.f32.mrf.mxu1 }
 0x96f   :  { %v2337_v47 = vpop.f32.mrf.mxu2 }
 0x970   :  { %v2338_v55 = vadd.f32 %v2337_v47, %v2305_v43 }
 0x972   :  { %v5539_v54 = vadd.f32 %v2362_v18, %v2338_v55 }
 0x975   :  { %v2705_v32 = vpop.f32.mrf.mxu0 }
 0x978   :  { %v2500_v6 = vpop.f32.mrf.mxu2  ;;  %v2737_v33 = vpop.f32.mrf.mxu1 }
 0x979   :  { %v2671_v29 = vpop.f32.mrf.mxu3  ;;  %v2501_v38 = vadd.f32 %v2500_v6, %v2471_v41 }
 0x97b   :  { %v2528_v0 = vadd.f32 %v2527_v11, %v2501_v38 }
 0x97d   :  { %v2561_v51 = vadd.f32 %v2560_v16, %v2528_v0 }
 0x97f   :  { %v5545_v10 = vadd.f32 %v2585_v62, %v2561_v51  ;;  %v2710_v9 = vpop.f32.mrf.mxu0 }
 0x981   :  { %v3037_v12 = vsel %vm701_vm1, %v5545_v10, 0  ;;  %v2743_v59 = vpop.f32.mrf.mxu1 }
 0x982   :  { %v2622_v61 = vpop.f32.mrf.mxu2  ;;  %v3063_v14 = vand.u32 4294901760, %v3037_v12 }
 0x983   :  { %v2623_v42 = vadd.f32 %v2622_v61, %v5878_v40  ;;  %v2675_v45 = vpop.f32.mrf.mxu3 }
 0x984   :  { %v3064_v44 = vsub.f32 %v3037_v12, %v3063_v14 }
 0x985   :  { %v2672_v56 = vadd.f32 %v2671_v29, %v2623_v42 }
 0x986   :  { %v3065_v11 = vand.u32 4294901760, %v3064_v44 }
 0x987   :  { %v2706_v28 = vadd.f32 %v2705_v32, %v2672_v56 }
 0x988   :  { %v3066_v22 = vsub.f32 %v3064_v44, %v3065_v11 }
 0x989   :  { %v2738_v3 = vadd.f32 %v2737_v33, %v2706_v28  ;;  %v2895_v38 = vpop.f32.mrf.mxu1 }
 0x98a   :  { %v2630_v52 = vpop.f32.mrf.mxu2  ;;  %v3067_v16 = vand.u32 4294901760, %v3066_v22 }
 0x98b   :  { %v2631_v24 = vadd.f32 %v2630_v52, %v5878_v40  ;;  %v2805_v5 = vpop.f32.mrf.mxu3  ;;  %v2846_v40 = vpop.f32.mrf.mxu0 }
 0x98d   :  { %v2676_v2 = vadd.f32 %v2675_v45, %v2631_v24  ;;  %v5879_v45 = vld [vmem:[#allocation32_spill] sm:$0xff] }
 0x98e   :  { %v2847_v56 = vadd.f32 %v2846_v40, %v5879_v45 }
 0x98f   :  { %v2711_v13 = vadd.f32 %v2710_v9, %v2676_v2 }
 0x990   :  { %v2896_v24 = vadd.f32 %v2895_v38, %v2847_v56 }
 0x991   :  { %v2744_v60 = vadd.f32 %v2743_v59, %v2711_v13  ;;  %v2899_v42 = vpop.f32.mrf.mxu1 }
 0x992   :  { %v2776_v4 = vpop.f32.mrf.mxu2 }
 0x993   :  { %v2777_v8 = vadd.f32 %v2776_v4, %v2738_v3  ;;  %v2809_v18 = vpop.f32.mrf.mxu3  ;;  %v2854_v32 = vpop.f32.mrf.mxu0 }
 0x994   :  { %v2855_v51 = vadd.f32 %v2854_v32, %v5879_v45 }
 0x995   :  { %v5549_v7 = vadd.f32 %v2805_v5, %v2777_v8 }
 0x996   :  { %v2900_v28 = vadd.f32 %v2899_v42, %v2855_v51 }
 0x997   :  { %v3040_v21 = vsel %vm701_vm1, %v5549_v7, 0 }
 0x998   :  { %v3061_v43 = vand.u32 4294901760, %v3040_v21 }
 0x999   :  { %v3029_v33 = vpop.f32.mrf.mxu1 }
 0x99a   :  { %v2780_v27 = vpop.f32.mrf.mxu2  ;;  %v3093_v6 = vsub.f32 %v3040_v21, %v3061_v43 }
 0x99b   :  { %v2781_v35 = vadd.f32 %v2780_v27, %v2744_v60  ;;  %v2961_v52 = vpop.f32.mrf.mxu3  ;;  %v3000_v5 = vpop.f32.mrf.mxu0 }
 0x99c   :  { %v3094_v37 = vand.u32 4294901760, %v3093_v6 }
 0x99d   :  { %v5553_v47 = vadd.f32 %v2809_v18, %v2781_v35 }
 0x99e   :  { %v3095_v61 = vsub.f32 %v3093_v6, %v3094_v37 }
 0x99f   :  { %3394 = vrot.lane.b32.xlu1 %v5553_v47, %s4795_s19  ;;  %v3043_v55 = vsel %vm701_vm1, %v5553_v47, 0 }
 0x9a0   :  { %v3059_v19 = vand.u32 4294901760, %v3043_v55  ;;  %v3096_v62 = vand.u32 4294901760, %v3095_v61 }
 0x9a1   :  { %v3033_v59 = vpop.f32.mrf.mxu1 }
 0x9a2   :  { %3060 = vmatpush.xpose.msra.mxu2 %v3059_v19  ;;  %3144 = vmatpush.xpose.msrb.mxu1 %v3059_v19  ;;  %v3087_v20 = vsub.f32 %v3043_v55, %v3059_v19  ;;  %v2929_v0 = vpop.f32.mrf.mxu2 }
 0x9a3   :  { %v2930_v3 = vadd.f32 %v2929_v0, %v2896_v24  ;;  %v2967_v8 = vpop.f32.mrf.mxu3 }
 0x9a4   :  { %3119 = vmatpush.xpose.msrb.mxu0 %v3087_v20  ;;  %v3088_v23 = vand.u32 4294901760, %v3087_v20 }
 0x9a5   :  { %v2962_v12 = vadd.f32 %v2961_v52, %v2930_v3 }
 0x9a6   :  { %3062 = vmatpush.xpose.msra.mxu2 %v3061_v43  ;;  %3146 = vmatpush.xpose.msrb.mxu1 %v3061_v43  ;;  %v3089_v29 = vsub.f32 %v3087_v20, %v3088_v23 }
 0x9a7   :  { %3392 = vrot.lane.b32.xlu1 %v5549_v7, %s4795_s19  ;;  %v3001_v13 = vadd.f32 %v3000_v5, %v2962_v12 }
 0x9a8   :  { %3122 = vmatpush.xpose.msrb.mxu0 %v3093_v6  ;;  %v3090_v41 = vand.u32 4294901760, %v3089_v29 }
 0x9a9   :  { %3068 = vmatmul.f32.vlgmr.msra.gmra.mxu2 %v3067_v16  ;;  %3150 = vmatmul.f32.vlgmr.msrb.gmra.mxu1 %v3065_v11  ;;  %v5565_v21 = vadd.f32 %v3029_v33, %v3001_v13 }
 0x9aa   :  { %3171 = vmatpush.xpose.msrb.mxu2 %v3088_v23  ;;  %3091 = vmatpush.xpose.msra.mxu3 %v3090_v41  ;;  %v2934_v2 = vpop.f32.mrf.mxu2 }
 0x9ab   :  { %3125 = vmatmul.f32.vlgmr.msrb.gmra.mxu0 %v3064_v44  ;;  %v2935_v4 = vadd.f32 %v2934_v2, %v2900_v28  ;;  %v3247_v18 = vand.u32 4294901760, %v5565_v21 }
 0x9ad   :  { %v2968_v9 = vadd.f32 %v2967_v8, %v2935_v4 }
 0x9ae   :  { %3175 = vmatpush.xpose.msrb.mxu2 %v3094_v37  ;;  %3097 = vmatpush.xpose.msra.mxu3 %v3096_v62 }
 0x9af   :  { %3390 = vrot.lane.b32.xlu1 %v5545_v10, %s4795_s19 }
 0x9b1   :  { %3099 = vmatmul.f32.vlgmr.msra.gmra.mxu3 %v3063_v14  ;;  %3177 = vmatmul.f32.vlgmr.msrb.gmra.mxu2 %v3063_v14 }
 0x9b2   :  { %3196 = vmatpush.xpose.msrb.mxu3 %v3059_v19 }
 0x9b6   :  { %3198 = vmatpush.xpose.msrb.mxu3 %v3061_v43  ;;  %v3279_v43 = vsub.f32 %v5565_v21, %v3247_v18 }
 0x9b8   :  { %v3280_v19 = vand.u32 4294901760, %v3279_v43 }
 0x9b9   :  { %3200 = vmatmul.f32.vlgmr.msrb.gmra.mxu3 %v3063_v14  ;;  %v3004_v14 = vpop.f32.mrf.mxu0 }
 0x9ba   :  { %v3005_v60 = vadd.f32 %v3004_v14, %v2968_v9  ;;  %v3281_v20 = vsub.f32 %v3279_v43, %v3280_v19 }
 0x9bc   :  { %v5567_v27 = vadd.f32 %v3033_v59, %v3005_v60  ;;  %v3282_v22 = vand.u32 4294901760, %v3281_v20 }
 0x9be   :  { %v3245_v44 = vand.u32 4294901760, %v5567_v27 }
 0x9c0   :  { %v3273_v35 = vsub.f32 %v5567_v27, %v3245_v44  ;;  %3246 = vmatpush.msra.mxu0 %v3245_v44  ;;  %3330 = vmatpush.msra.mxu3 %v3245_v44 }
 0x9c2   :  { %3305 = vmatpush.msra.mxu2 %v3273_v35  ;;  %v3274_v55 = vand.u32 4294901760, %v3273_v35  ;;  %3248 = vmatpush.msra.mxu0 %v3247_v18 }
 0x9c3   :  { %3332 = vmatpush.msra.mxu3 %v3247_v18 }
 0x9c4   :  { %3308 = vmatpush.msra.mxu2 %v3279_v43  ;;  %v3275_v11 = vsub.f32 %v3273_v35, %v3274_v55  ;;  %3357 = vmatpush.msrb.mxu0 %v3274_v55 }
 0x9c6   :  { %v3276_v6 = vand.u32 4294901760, %v3275_v11  ;;  %3361 = vmatpush.msrb.mxu0 %v3280_v19 }
 0x9c8   :  { %3277 = vmatpush.msra.mxu1 %v3276_v6 }
 0x9ca   :  { %3283 = vmatpush.msra.mxu1 %v3282_v22 }
 0x9cc   :  { %3382 = vmatpush.msrb.mxu1 %v3245_v44 }
 0x9ce   :  { %3384 = vmatpush.msrb.mxu1 %v3247_v18 }
 0xa11   :  { %v3395_v23 = vpop.permute.xlu1 %3394 }
 0xa12   :  { %v3400_v37 = vsel %vm701_vm1, %v3395_v23, 0 }
 0xa13   :  { %v5574_v29 = vand.u32 4294901760, %v3400_v37 }
 0xa15   :  { %v5577_v16 = vsub.f32 %v3400_v37, %v5574_v29  ;;  %3417 = vmatpush.xpose.msrb.mxu2 %v5574_v29 }
 0xa17   :  { %v3445_v41 = vand.u32 4294901760, %v5577_v16 }
 0xa19   :  { %v3446_v61 = vsub.f32 %v5577_v16, %v3445_v41  ;;  %v3393_v62 = vpop.permute.xlu1 %3392 }
 0xa1a   :  { %v3398_v38 = vsel %vm701_vm1, %v3393_v62, 0 }
 0xa1b   :  { %v3447_v40 = vand.u32 4294901760, %v3446_v61  ;;  %v5585_v42 = vand.u32 4294901760, %v3398_v38 }
 0xa1d   :  { %v5588_v0 = vsub.f32 %v3398_v38, %v5585_v42  ;;  %3419 = vmatpush.xpose.msrb.mxu2 %v5585_v42  ;;  %3448 = vmatpush.xpose.msrb.mxu3 %v3447_v40 }
 0xa1f   :  { %v3451_v45 = vand.u32 4294901760, %v5588_v0 }
 0xa21   :  { %v3452_v56 = vsub.f32 %v5588_v0, %v3451_v45  ;;  %v3391_v11 = vpop.permute.xlu1 %3390 }
 0xa22   :  { %v3396_v20 = vsel %vm701_vm1, %v3391_v11, 0 }
 0xa23   :  { %v3453_v32 = vand.u32 4294901760, %v3452_v56  ;;  %v3420_v62 = vand.u32 4294901760, %v3396_v20 }
 0xa25   :  { %3454 = vmatpush.xpose.msrb.mxu3 %v3453_v32 }
 0xa26   :  { %v3151_v2 = vpop.f32.mrf.mxu1 }
 0xa28   :  { %v3126_v28 = vpop.f32.mrf.mxu0 }
 0xa2c   :  { %v3069_v52 = vpop.f32.mrf.mxu2 }
 0xa34   :  { %v3100_v51 = vpop.f32.mrf.mxu3  ;;  %v3178_v5 = vpop.f32.mrf.mxu2 }
 0xa35   :  { %v3101_v24 = vadd.f32 %v3100_v51, %v3069_v52 }
 0xa37   :  { %v3127_v33 = vadd.f32 %v3126_v28, %v3101_v24  ;;  %v3421_v24 = vsub.f32 %v3396_v20, %v3420_v62 }
 0xa39   :  { %v3152_v3 = vadd.f32 %v3151_v2, %v3127_v33 }
 0xa3b   :  { %v3179_v4 = vadd.f32 %v3178_v5, %v3152_v3  ;;  %v3422_v5 = vand.u32 4294901760, %v3421_v24 }
 0xa3c   :  { %v3201_v8 = vpop.f32.mrf.mxu3 }
 0xa3d   :  { %v3202_v12 = vadd.f32 %v3201_v8, %v3179_v4 }
 0xa3f   :  { %v3204_v9 = vsel %vm870_vm2, %v3202_v12, -inf }
 0xa40   :  { %3205 = vmax.xlane.f32.xlu0 %v3204_v9 }
 0xa54   :  { %3589 = vrot.lane.b32.xlu0 %v5567_v27, %s4795_s19 }
 0xa5c   :  { %3587 = vrot.lane.b32.xlu0 %v5565_v21, %s4795_s19 }
 0xa64   :  { %3757 = vrot.lane.b32.xlu0 %v5549_v7, %s4796_s20 }
 0xab3   :  { %v3206_v13 = vpop.xlane.xlu0 %3205 }
 0xab4   :  { %v3207_v14 = vsub.f32 %v3202_v12, %v3206_v13  ;;  %v3423_v13 = vsub.f32 %v3421_v24, %v3422_v5 }
 0xab6   :  { %v3208_v59 = vmul.f32 1.442695, %v3207_v14 }
 0xab8   :  { %4762 = vpow2.f32 %v3208_v59 }
 0xabe   :  { %v4763_v60 = vpop.eup %4762 }
 0xabf   :  { %v3210_v44 = vsel %vm870_vm2, %v4763_v60, 0.0 }
 0xac0   :  { %3211 = vadd.xlane.f32.xlu2 %v3210_v44 }
 0xac6   :  { %v3590_v18 = vpop.permute.xlu0 %3589 }
 0xac7   :  { %v3610_v38 = vand.u32 4294901760, %v3590_v18 }
 0xac9   :  { %v3638_v28 = vsub.f32 %v3590_v18, %v3610_v38 }
 0xacb   :  { %v3639_v4 = vand.u32 4294901760, %v3638_v28 }
 0xacd   :  { %v3640_v14 = vsub.f32 %v3638_v28, %v3639_v4 }
 0xace   :  { %v3588_v37 = vpop.permute.xlu0 %3587 }
 0xacf   :  { %v3612_v32 = vand.u32 4294901760, %v3588_v37  ;;  %v3641_v18 = vand.u32 4294901760, %v3640_v14 }
 0xad1   :  { %v3644_v2 = vsub.f32 %v3588_v37, %v3612_v32 }
 0xad3   :  { %v3645_v12 = vand.u32 4294901760, %v3644_v2 }
 0xad5   :  { %v3646_v44 = vsub.f32 %v3644_v2, %v3645_v12 }
 0xb33   :  { %v3212_v35 = vpop.xlane.xlu2 %3211 }
 0xb34   :  { %4764 = vrcp.f32 %v3212_v35  ;;  %v3224_v6 = vand.u32 2147483648, %v3212_v35  ;;  %v3222_v23 = vand.u32 2147483647, %v3212_v35  ;;  %vm3218_vm8 = vweird.f32 %v3212_v35 }
 0xb36   :  { %v3225_v40 = vor.u32 1.1754944e-38, %v3224_v6  ;;  %vm3223_vm10 = vcmp.eq.f32.partialorder %v3222_v23, 8.507059e+37 }
 0xb3a   :  { %v4765_v43 = vpop.eup %4764 }
 0xb3b   :  { %v3214_v55 = vmul.f32 %v4765_v43, %v3212_v35  ;;  %vm3219_vm7 = vweird.f32 %v4765_v43  ;;  %v3424_v35 = vand.u32 4294901760, %v3423_v13 }
 0xb3c   :  { %vm3220_vm9 = vmor %vm3218_vm8, %vm3219_vm7 }
 0xb3d   :  { %v3215_v19 = vsub.f32 1.0, %v3214_v55 }
 0xb3f   :  { %v3216_v22 = vmul.f32 %v4765_v43, %v3215_v19 }
 0xb41   :  { %v3217_v61 = vadd.f32 %v4765_v43, %v3216_v22 }
 0xb43   :  { %v3221_v56 = vsel %vm3220_vm9, %v4765_v43, %v3217_v61 }
 0xb44   :  { %v3226_v52 = vsel %vm3223_vm10, %v3225_v40, %v3221_v56 }
 0xb45   :  { %v3227_v51 = vmul.f32 %v4763_v60, %v3226_v52 }
 0xb47   :  { %v3229_v33 = vsel %vm870_vm2, %v3227_v51, 0 }
 0xb48   :  { %v3249_v3 = vand.u32 4294901760, %v3229_v33 }
 0xb4a   :  { %3285 = vmatmul.f32.vlgmr.msra.gmra.mxu1 %v3249_v3  ;;  %v3250_v8 = vsub.f32 %v3229_v33, %v3249_v3 }
 0xb4b   :  { %3501 = vmatpush.xpose.msra.mxu1 %v5574_v29 }
 0xb4c   :  { %3311 = vmatmul.f32.vlgmr.msra.gmra.mxu2 %v3250_v8  ;;  %v3251_v9 = vand.u32 4294901760, %v3250_v8 }
 0xb4d   :  { %3528 = vmatpush.xpose.msra.mxu2 %v3445_v41  ;;  %v3647_v41 = vand.u32 4294901760, %v3646_v44 }
 0xb4e   :  { %3336 = vmatmul.f32.vlgmr.msra.gmra.mxu3 %v3251_v9  ;;  %v3252_v59 = vsub.f32 %v3250_v8, %v3251_v9 }
 0xb4f   :  { %3503 = vmatpush.xpose.msra.mxu1 %v5585_v42  ;;  %3553 = vmatpush.xpose.msra.mxu3 %v5574_v29 }
 0xb50   :  { %v3253_v60 = vand.u32 4294901760, %v3252_v59 }
 0xb51   :  { %3532 = vmatpush.xpose.msra.mxu2 %v3451_v45 }
 0xb52   :  { %3254 = vmatmul.f32.vlgmr.msra.gmra.mxu0 %v3253_v60  ;;  %3386 = vmatmul.f32.vlgmr.msrb.gmra.mxu1 %v3249_v3 }
 0xb53   :  { %3476 = vmatpush.xpose.msra.mxu0 %v5577_v16  ;;  %3555 = vmatpush.xpose.msra.mxu3 %v5585_v42 }
 0xb54   :  { %3642 = vmatpush.msrb.mxu1 %v3641_v18  ;;  %3425 = vmatmul.f32.vlgmr.msrb.gmra.mxu2 %v3424_v35 }
 0xb55   :  { %3670 = vmatpush.msrb.mxu2 %v3638_v28 }
 0xb56   :  { %3648 = vmatpush.msrb.mxu1 %v3647_v41  ;;  %3456 = vmatmul.f32.vlgmr.msrb.gmra.mxu3 %v3420_v62 }
 0xb57   :  { %3479 = vmatpush.xpose.msra.mxu0 %v5588_v0  ;;  %3673 = vmatpush.msrb.mxu2 %v3644_v2 }
 0xb58   :  { %3695 = vmatpush.msrb.mxu3 %v3610_v38 }
 0xb5a   :  { %3697 = vmatpush.msrb.mxu3 %v3612_v32  ;;  %3363 = vmatmul.f32.vlgmr.msrb.gmra.mxu0 %v3249_v3 }
 0xb5b   :  { %3507 = vmatmul.f32.vlgmr.msra.gmra.mxu1 %v3422_v5  ;;  %3611 = vmatpush.msrb.mxu0 %v3610_v38 }
 0xb5c   :  { %3747 = vmatpush.msra.mxu1 %v3610_v38  ;;  %3534 = vmatmul.f32.vlgmr.msra.gmra.mxu2 %v3420_v62 }
 0xb5d   :  { %3613 = vmatpush.msrb.mxu0 %v3612_v32 }
 0xb5e   :  { %3749 = vmatpush.msra.mxu1 %v3612_v32  ;;  %3557 = vmatmul.f32.vlgmr.msra.gmra.mxu3 %v3420_v62 }
 0xb62   :  { %3482 = vmatmul.f32.vlgmr.msra.gmra.mxu0 %v3421_v24 }
 0xb63   :  { %3722 = vmatpush.msra.mxu0 %v3639_v4 }
 0xb65   :  { %3726 = vmatpush.msra.mxu0 %v3645_v12  ;;  %v3758_v12 = vpop.permute.xlu0 %3757 }
 0xb66   :  { %v3763_v13 = vsel %vm701_vm1, %v3758_v12, 0 }
 0xbc7   :  { %v3286_v29 = vpop.f32.mrf.mxu1 }
 0xbcf   :  { %v3255_v16 = vpop.f32.mrf.mxu0  ;;  %v3312_v42 = vpop.f32.mrf.mxu2 }
 0xbd0   :  { %v3287_v45 = vadd.f32 %v3286_v29, %v3255_v16  ;;  %v3387_v11 = vpop.f32.mrf.mxu1 }
 0xbd1   :  { %v3337_v43 = vpop.f32.mrf.mxu3 }
 0xbd2   :  { %v3313_v0 = vadd.f32 %v3312_v42, %v3287_v45 }
 0xbd4   :  { %v3338_v55 = vadd.f32 %v3337_v43, %v3313_v0 }
 0xbd7   :  { %v3364_v19 = vpop.f32.mrf.mxu0  ;;  %v3426_v20 = vpop.f32.mrf.mxu2 }
 0xbd8   :  { %v3365_v6 = vadd.f32 %v3364_v19, %v3338_v55  ;;  %v3508_v38 = vpop.f32.mrf.mxu1 }
 0xbd9   :  { %v3457_v23 = vpop.f32.mrf.mxu3 }
 0xbda   :  { %v5615_v22 = vadd.f32 %v3387_v11, %v3365_v6  ;;  %v3458_v37 = vadd.f32 %v3457_v23, %v3426_v20 }
 0xbdf   :  { %v3483_v61 = vpop.f32.mrf.mxu0  ;;  %v3535_v56 = vpop.f32.mrf.mxu2 }
 0xbe0   :  { %v3484_v62 = vadd.f32 %v3483_v61, %v3458_v37 }
 0xbe1   :  { %v3558_v52 = vpop.f32.mrf.mxu3 }
 0xbe2   :  { %v3509_v40 = vadd.f32 %v3508_v38, %v3484_v62 }
 0xbe4   :  { %v3536_v32 = vadd.f32 %v3535_v56, %v3509_v40 }
 0xbe6   :  { %v3559_v51 = vadd.f32 %v3558_v52, %v3536_v32 }
 0xbe8   :  { %v3561_v24 = vsel %vm870_vm2, %v3559_v51, -inf }
 0xbe9   :  { %3562 = vmax.xlane.f32.xlu1 %v3561_v24 }
 0xc02   :  { %3755 = vrot.lane.b32.xlu1 %v5545_v10, %s4796_s20 }
 0xc0a   :  { %3952 = vrot.lane.b32.xlu1 %v5567_v27, %s4796_s20 }
 0xc12   :  { %4122 = vrot.lane.b32.xlu1 %v5553_v47, %s4797_s21 }
 0xc1a   :  { %3950 = vrot.lane.b32.xlu1 %v5565_v21, %s4796_s20 }
 0xc22   :  { %4118 = vrot.lane.b32.xlu1 %v5545_v10, %s4797_s21  ;;  %v5632_v10 = vand.u32 4294901760, %v3763_v13 }
 0xc24   :  { %v5636_v18 = vsub.f32 %v3763_v13, %v5632_v10 }
 0xc26   :  { %v3816_v0 = vand.u32 4294901760, %v5636_v18 }
 0xc28   :  { %v3817_v32 = vsub.f32 %v5636_v18, %v3816_v0 }
 0xc5c   :  { %v3563_v28 = vpop.xlane.xlu1 %3562 }
 0xc5d   :  { %v3564_v33 = vsub.f32 %v3559_v51, %v3563_v28 }
 0xc5f   :  { %v3565_v2 = vmul.f32 1.442695, %v3564_v33 }
 0xc61   :  { %4766 = vpow2.f32 %v3565_v2  ;;  %v3818_v2 = vand.u32 4294901760, %v3817_v32 }
 0xc67   :  { %v4767_v3 = vpop.eup %4766 }
 0xc68   :  { %v3567_v5 = vsel %vm870_vm2, %v4767_v3, 0.0 }
 0xc69   :  { %3568 = vadd.xlane.f32.xlu2 %v3567_v5 }
 0xc74   :  { %v3756_v4 = vpop.permute.xlu1 %3755 }
 0xc75   :  { %v3761_v29 = vsel %vm701_vm1, %v3756_v4, 0 }
 0xc76   :  { %v5640_v6 = vand.u32 4294901760, %v3761_v29 }
 0xc78   :  { %v3786_v52 = vsub.f32 %v3761_v29, %v5640_v6 }
 0xc7a   :  { %v3787_v5 = vand.u32 4294901760, %v3786_v52 }
 0xc7c   :  { %v3953_v8 = vpop.permute.xlu1 %3952 }
 0xc7d   :  { %v3973_v20 = vand.u32 4294901760, %v3953_v8 }
 0xc7f   :  { %v4001_v51 = vsub.f32 %v3953_v8, %v3973_v20  ;;  %v3788_v8 = vsub.f32 %v3786_v52, %v3787_v5 }
 0xc81   :  { %3759 = vrot.lane.b32.xlu2 %v5553_v47, %s4796_s20  ;;  %v4002_v4 = vand.u32 4294901760, %v4001_v51  ;;  %v3789_v29 = vand.u32 4294901760, %v3788_v8 }
 0xc84   :  { %v4123_v14 = vpop.permute.xlu1 %4122 }
 0xc85   :  { %v4128_v12 = vsel %vm701_vm1, %v4123_v14, 0 }
 0xc8c   :  { %v3951_v55 = vpop.permute.xlu1 %3950 }
 0xc8d   :  { %v3975_v62 = vand.u32 4294901760, %v3951_v55 }
 0xc8f   :  { %v4007_v28 = vsub.f32 %v3951_v55, %v3975_v62 }
 0xcdc   :  { %v3569_v9 = vpop.xlane.xlu2 %3568 }
 0xcdd   :  { %4768 = vrcp.f32 %v3569_v9  ;;  %v3581_v16 = vand.u32 2147483648, %v3569_v9  ;;  %v3579_v45 = vand.u32 2147483647, %v3569_v9  ;;  %vm3575_vm12 = vweird.f32 %v3569_v9 }
 0xcdf   :  { %v3582_v23 = vor.u32 1.1754944e-38, %v3581_v16  ;;  %vm3580_vm14 = vcmp.eq.f32.partialorder %v3579_v45, 8.507059e+37 }
 0xce3   :  { %v4769_v59 = vpop.eup %4768 }
 0xce4   :  { %v3571_v60 = vmul.f32 %v4769_v59, %v3569_v9  ;;  %v3760_v44 = vpop.permute.xlu2 %3759  ;;  %vm3576_vm11 = vweird.f32 %v4769_v59 }
 0xce5   :  { %v3765_v35 = vsel %vm701_vm1, %v3760_v44, 0  ;;  %vm3577_vm13 = vmor %vm3575_vm12, %vm3576_vm11 }
 0xce6   :  { %v3572_v41 = vsub.f32 1.0, %v3571_v60  ;;  %v3781_v47 = vand.u32 4294901760, %v3765_v35  ;;  %v4003_v60 = vsub.f32 %v4001_v51, %v4002_v4 }
 0xce8   :  { %v3573_v42 = vmul.f32 %v4769_v59, %v3572_v41  ;;  %v3809_v43 = vsub.f32 %v3765_v35, %v3781_v47  ;;  %3782 = vmatpush.xpose.msra.mxu2 %v3781_v47  ;;  %v4004_v16 = vand.u32 4294901760, %v4003_v60 }
 0xcea   :  { %v3574_v11 = vadd.f32 %v4769_v59, %v3573_v42  ;;  %v3810_v19 = vand.u32 4294901760, %v3809_v43 }
 0xcec   :  { %v3578_v37 = vsel %vm3577_vm13, %v4769_v59, %v3574_v11  ;;  %v3811_v61 = vsub.f32 %v3809_v43, %v3810_v19  ;;  %3784 = vmatpush.xpose.msra.mxu2 %v5632_v10  ;;  %v5647_v59 = vand.u32 4294901760, %v4128_v12 }
 0xced   :  { %v3583_v38 = vsel %vm3580_vm14, %v3582_v23, %v3578_v37 }
 0xcee   :  { %v3584_v40 = vmul.f32 %v4767_v3, %v3583_v38  ;;  %v3812_v56 = vand.u32 4294901760, %v3811_v61  ;;  %v4008_v3 = vand.u32 4294901760, %v4007_v28  ;;  %v5651_v14 = vsub.f32 %v4128_v12, %v5647_v59 }
 0xcf0   :  { %3813 = vmatpush.xpose.msra.mxu3 %v3812_v56  ;;  %v3594_v24 = vsel %vm870_vm2, %v3584_v40, 0  ;;  %v4009_v41 = vsub.f32 %v4007_v28, %v4008_v3  ;;  %v4173_v45 = vand.u32 4294901760, %v5651_v14 }
 0xcf1   :  { %v3614_v33 = vand.u32 4294901760, %v3594_v24 }
 0xcf2   :  { %v4010_v42 = vand.u32 4294901760, %v4009_v41 }
 0xcf3   :  { %3650 = vmatmul.f32.vlgmr.msrb.gmra.mxu1 %v3614_v33  ;;  %v3615_v9 = vsub.f32 %v3594_v24, %v3614_v33 }
 0xcf4   :  { %3866 = vmatpush.xpose.msrb.mxu1 %v3781_v47  ;;  %3819 = vmatpush.xpose.msra.mxu3 %v3818_v2 }
 0xcf5   :  { %3676 = vmatmul.f32.vlgmr.msrb.gmra.mxu2 %v3615_v9  ;;  %v3616_v13 = vand.u32 4294901760, %v3615_v9 }
 0xcf6   :  { %3893 = vmatpush.xpose.msrb.mxu2 %v3810_v19 }
 0xcf7   :  { %3701 = vmatmul.f32.vlgmr.msrb.gmra.mxu3 %v3616_v13  ;;  %v3617_v44 = vsub.f32 %v3615_v9, %v3616_v13 }
 0xcf8   :  { %3868 = vmatpush.xpose.msrb.mxu1 %v5632_v10  ;;  %3918 = vmatpush.xpose.msrb.mxu3 %v3781_v47  ;;  %v4174_v47 = vsub.f32 %v5651_v14, %v4173_v45 }
 0xcf9   :  { %v3618_v35 = vand.u32 4294901760, %v3617_v44 }
 0xcfa   :  { %3897 = vmatpush.xpose.msrb.mxu2 %v3816_v0 }
 0xcfb   :  { %3619 = vmatmul.f32.vlgmr.msrb.gmra.mxu0 %v3618_v35  ;;  %3751 = vmatmul.f32.vlgmr.msra.gmra.mxu1 %v3614_v33 }
 0xcfc   :  { %3841 = vmatpush.xpose.msrb.mxu0 %v3809_v43  ;;  %3920 = vmatpush.xpose.msrb.mxu3 %v5632_v10  ;;  %v4175_v10 = vand.u32 4294901760, %v4174_v47  ;;  %v4119_v47 = vpop.permute.xlu1 %4118 }
 0xcfd   :  { %4005 = vmatpush.msra.mxu1 %v4004_v16  ;;  %3790 = vmatmul.f32.vlgmr.msra.gmra.mxu2 %v3789_v29 }
 0xcfe   :  { %4033 = vmatpush.msra.mxu2 %v4001_v51 }
 0xcff   :  { %4011 = vmatpush.msra.mxu1 %v4010_v42  ;;  %3821 = vmatmul.f32.vlgmr.msra.gmra.mxu3 %v5640_v6 }
 0xd00   :  { %3844 = vmatpush.xpose.msrb.mxu0 %v5636_v18  ;;  %4036 = vmatpush.msra.mxu2 %v4007_v28 }
 0xd01   :  { %4058 = vmatpush.msra.mxu3 %v3973_v20 }
 0xd03   :  { %4060 = vmatpush.msra.mxu3 %v3975_v62  ;;  %3728 = vmatmul.f32.vlgmr.msra.gmra.mxu0 %v3614_v33 }
 0xd04   :  { %3872 = vmatmul.f32.vlgmr.msrb.gmra.mxu1 %v3787_v5  ;;  %3974 = vmatpush.msra.mxu0 %v3973_v20 }
 0xd05   :  { %4110 = vmatpush.msrb.mxu1 %v3973_v20  ;;  %3899 = vmatmul.f32.vlgmr.msrb.gmra.mxu2 %v5640_v6 }
 0xd06   :  { %3976 = vmatpush.msra.mxu0 %v3975_v62  ;;  %4145 = vmatpush.xpose.msrb.mxu2 %v5647_v59 }
 0xd07   :  { %4112 = vmatpush.msrb.mxu1 %v3975_v62  ;;  %3922 = vmatmul.f32.vlgmr.msrb.gmra.mxu3 %v5640_v6 }
 0xd08   :  { %4176 = vmatpush.xpose.msrb.mxu3 %v4175_v10 }
 0xd0b   :  { %3847 = vmatmul.f32.vlgmr.msrb.gmra.mxu0 %v3786_v52 }
 0xd0c   :  { %4085 = vmatpush.msrb.mxu0 %v4002_v4 }
 0xd0e   :  { %4089 = vmatpush.msrb.mxu0 %v4008_v3 }
 0xd70   :  { %v3651_v18 = vpop.f32.mrf.mxu1 }
 0xd78   :  { %v3620_v43 = vpop.f32.mrf.mxu0  ;;  %v3677_v0 = vpop.f32.mrf.mxu2 }
 0xd79   :  { %v3752_v11 = vpop.f32.mrf.mxu1  ;;  %v3652_v24 = vadd.f32 %v3651_v18, %v3620_v43  ;;  %v4124_v43 = vsel %vm701_vm1, %v4119_v47, 0 }
 0xd7a   :  { %v3702_v55 = vpop.f32.mrf.mxu3 }
 0xd7b   :  { %v3678_v28 = vadd.f32 %v3677_v0, %v3652_v24 }
 0xd7d   :  { %v3703_v33 = vadd.f32 %v3702_v55, %v3678_v28 }
 0xd80   :  { %v3729_v19 = vpop.f32.mrf.mxu0  ;;  %v3791_v20 = vpop.f32.mrf.mxu2 }
 0xd81   :  { %v3873_v40 = vpop.f32.mrf.mxu1  ;;  %v3730_v2 = vadd.f32 %v3729_v19, %v3703_v33  ;;  %v4148_v19 = vand.u32 4294901760, %v4124_v43 }
 0xd82   :  { %v3822_v23 = vpop.f32.mrf.mxu3 }
 0xd83   :  { %v3823_v37 = vadd.f32 %v3822_v23, %v3791_v20  ;;  %v3753_v5 = vadd.f32 %v3752_v11, %v3730_v2 }
 0xd88   :  { %v3848_v61 = vpop.f32.mrf.mxu0  ;;  %v3900_v62 = vpop.f32.mrf.mxu2 }
 0xd89   :  { %v3849_v38 = vadd.f32 %v3848_v61, %v3823_v37 }
 0xd8a   :  { %v3923_v6 = vpop.f32.mrf.mxu3 }
 0xd8b   :  { %v3874_v56 = vadd.f32 %v3873_v40, %v3849_v38  ;;  %v4149_v38 = vsub.f32 %v4124_v43, %v4148_v19 }
 0xd8d   :  { %v3901_v32 = vadd.f32 %v3900_v62, %v3874_v56  ;;  %v4150_v62 = vand.u32 4294901760, %v4149_v38 }
 0xd8f   :  { %v3924_v51 = vadd.f32 %v3923_v6, %v3901_v32 }
 0xd91   :  { %v3926_v52 = vsel %vm870_vm2, %v3924_v51, -inf }
 0xd92   :  { %3927 = vmax.xlane.f32.xlu2 %v3926_v52 }
 0xdaa   :  { %4120 = vrot.lane.b32.xlu2 %v5549_v7, %s4797_s21 }
 0xdb2   :  { %4313 = vrot.lane.b32.xlu2 %v5565_v21, %s4797_s21 }
 0xdba   :  { %4482 = vrot.lane.b32.xlu2 %v3753_v5, %s4800_s9 }
 0xe05   :  { %v3928_v4 = vpop.xlane.xlu2 %3927 }
 0xe06   :  { %v3929_v12 = vsub.f32 %v3924_v51, %v3928_v4  ;;  %v4151_v51 = vsub.f32 %v4149_v38, %v4150_v62 }
 0xe08   :  { %v3930_v9 = vmul.f32 1.442695, %v3929_v12  ;;  %v4152_v28 = vand.u32 4294901760, %v4151_v51 }
 0xe0a   :  { %4770 = vpow2.f32 %v3930_v9 }
 0xe0d   :  { %v4121_v3 = vpop.permute.xlu2 %4120 }
 0xe0e   :  { %v4126_v13 = vsel %vm701_vm1, %v4121_v3, 0 }
 0xe0f   :  { %v4146_v8 = vand.u32 4294901760, %v4126_v13 }
 0xe10   :  { %v4771_v60 = vpop.eup %4770 }
 0xe11   :  { %v4178_v44 = vsub.f32 %v4126_v13, %v4146_v8  ;;  %4147 = vmatpush.xpose.msrb.mxu2 %v4146_v8  ;;  %v3932_v7 = vsel %vm870_vm2, %v4771_v60, 0.0 }
 0xe12   :  { %3933 = vadd.xlane.f32.xlu0 %v3932_v7 }
 0xe13   :  { %v4179_v35 = vand.u32 4294901760, %v4178_v44 }
 0xe15   :  { %v4180_v21 = vsub.f32 %v4178_v44, %v4179_v35 }
 0xe17   :  { %v4181_v41 = vand.u32 4294901760, %v4180_v21 }
 0xe19   :  { %4182 = vmatpush.xpose.msrb.mxu3 %v4181_v41 }
 0xe85   :  { %v3934_v29 = vpop.xlane.xlu0 %3933 }
 0xe86   :  { %4772 = vrcp.f32 %v3934_v29  ;;  %v3946_v18 = vand.u32 2147483648, %v3934_v29  ;;  %v3944_v55 = vand.u32 2147483647, %v3934_v29  ;;  %vm3940_vm3 = vweird.f32 %v3934_v29 }
 0xe88   :  { %v3947_v20 = vor.u32 1.1754944e-38, %v3946_v18  ;;  %vm3945_vm5 = vcmp.eq.f32.partialorder %v3944_v55, 8.507059e+37 }
 0xe8c   :  { %v4773_v16 = vpop.eup %4772 }
 0xe8d   :  { %v3936_v42 = vmul.f32 %v4773_v16, %v3934_v29  ;;  %vm3941_vm15 = vweird.f32 %v4773_v16 }
 0xe8e   :  { %vm3942_vm4 = vmor %vm3940_vm3, %vm3941_vm15  ;;  %vm4730_vm15 = vcmask 523264  }
 0xe8f   :  { %v3937_v10 = vsub.f32 1.0, %v3936_v42 }
 0xe91   :  { %v3938_v0 = vmul.f32 %v4773_v16, %v3937_v10 }
 0xe93   :  { %v3939_v11 = vadd.f32 %v4773_v16, %v3938_v0 }
 0xe95   :  { %v3943_v23 = vsel %vm3942_vm4, %v4773_v16, %v3939_v11  ;;  %v4314_v11 = vpop.permute.xlu2 %4313 }
 0xe96   :  { %v3948_v37 = vsel %vm3945_vm5, %v3947_v20, %v3943_v23  ;;  %v4338_v20 = vand.u32 4294901760, %v4314_v11 }
 0xe97   :  { %v3949_v61 = vmul.f32 %v4771_v60, %v3948_v37 }
 0xe98   :  { %v4370_v37 = vsub.f32 %v4314_v11, %v4338_v20 }
 0xe99   :  { %v3957_v40 = vsel %vm870_vm2, %v3949_v61, 0 }
 0xe9a   :  { %v3977_v56 = vand.u32 4294901760, %v3957_v40 }
 0xe9c   :  { %4013 = vmatmul.f32.vlgmr.msra.gmra.mxu1 %v3977_v56  ;;  %v3978_v32 = vsub.f32 %v3957_v40, %v3977_v56 }
 0xe9d   :  { %4229 = vmatpush.xpose.msra.mxu1 %v5647_v59 }
 0xe9e   :  { %4039 = vmatmul.f32.vlgmr.msra.gmra.mxu2 %v3978_v32  ;;  %v3979_v6 = vand.u32 4294901760, %v3978_v32 }
 0xe9f   :  { %4256 = vmatpush.xpose.msra.mxu2 %v4173_v45 }
 0xea0   :  { %4064 = vmatmul.f32.vlgmr.msra.gmra.mxu3 %v3979_v6  ;;  %v3980_v52 = vsub.f32 %v3978_v32, %v3979_v6 }
 0xea1   :  { %4231 = vmatpush.xpose.msra.mxu1 %v4146_v8  ;;  %4281 = vmatpush.xpose.msra.mxu3 %v5647_v59 }
 0xea2   :  { %v3981_v24 = vand.u32 4294901760, %v3980_v52 }
 0xea3   :  { %4260 = vmatpush.xpose.msra.mxu2 %v4179_v35 }
 0xea4   :  { %3982 = vmatmul.f32.vlgmr.msra.gmra.mxu0 %v3981_v24  ;;  %4114 = vmatmul.f32.vlgmr.msrb.gmra.mxu1 %v3977_v56 }
 0xea5   :  { %4204 = vmatpush.xpose.msra.mxu0 %v5651_v14  ;;  %4283 = vmatpush.xpose.msra.mxu3 %v4146_v8 }
 0xea6   :  { %4153 = vmatmul.f32.vlgmr.msrb.gmra.mxu2 %v4152_v28 }
 0xea8   :  { %4184 = vmatmul.f32.vlgmr.msrb.gmra.mxu3 %v4148_v19 }
 0xea9   :  { %4207 = vmatpush.xpose.msra.mxu0 %v4178_v44 }
 0xeac   :  { %4091 = vmatmul.f32.vlgmr.msrb.gmra.mxu0 %v3977_v56  ;;  %4235 = vmatmul.f32.vlgmr.msra.gmra.mxu1 %v4150_v62  ;;  %v4371_v62 = vand.u32 4294901760, %v4370_v37 }
 0xeae   :  { %4262 = vmatmul.f32.vlgmr.msra.gmra.mxu2 %v4148_v19  ;;  %v4372_v51 = vsub.f32 %v4370_v37, %v4371_v62 }
 0xeb0   :  { %4285 = vmatmul.f32.vlgmr.msra.gmra.mxu3 %v4148_v19  ;;  %v4373_v52 = vand.u32 4294901760, %v4372_v51 }
 0xeb4   :  { %4210 = vmatmul.f32.vlgmr.msra.gmra.mxu0 %v4149_v38 }
 0xf19   :  { %v4014_v45 = vpop.f32.mrf.mxu1 }
 0xf21   :  { %v3983_v33 = vpop.f32.mrf.mxu0  ;;  %v4040_v2 = vpop.f32.mrf.mxu2 }
 0xf22   :  { %v4115_v5 = vpop.f32.mrf.mxu1  ;;  %v4015_v29 = vadd.f32 %v4014_v45, %v3983_v33 }
 0xf23   :  { %v4065_v59 = vpop.f32.mrf.mxu3 }
 0xf24   :  { %v4041_v16 = vadd.f32 %v4040_v2, %v4015_v29 }
 0xf26   :  { %v4066_v42 = vadd.f32 %v4065_v59, %v4041_v16 }
 0xf29   :  { %v4092_v4 = vpop.f32.mrf.mxu0  ;;  %v4154_v12 = vpop.f32.mrf.mxu2 }
 0xf2a   :  { %v4236_v8 = vpop.f32.mrf.mxu1  ;;  %v4093_v47 = vadd.f32 %v4092_v4, %v4066_v42 }
 0xf2b   :  { %v4185_v9 = vpop.f32.mrf.mxu3 }
 0xf2c   :  { %v4186_v3 = vadd.f32 %v4185_v9, %v4154_v12  ;;  %v4116_v10 = vadd.f32 %v4115_v5, %v4093_v47 }
 0xf31   :  { %v4211_v13 = vpop.f32.mrf.mxu0  ;;  %v4263_v7 = vpop.f32.mrf.mxu2 }
 0xf32   :  { %v4212_v14 = vadd.f32 %v4211_v13, %v4186_v3 }
 0xf33   :  { %v4286_v35 = vpop.f32.mrf.mxu3 }
 0xf34   :  { %v4237_v60 = vadd.f32 %v4236_v8, %v4212_v14 }
 0xf36   :  { %v4264_v44 = vadd.f32 %v4263_v7, %v4237_v60 }
 0xf38   :  { %v4287_v21 = vadd.f32 %v4286_v35, %v4264_v44 }
 0xf3a   :  { %v4289_v41 = vsel %vm870_vm2, %v4287_v21, -inf }
 0xf3b   :  { %4290 = vmax.xlane.f32.xlu0 %v4289_v41 }
 0xf4f   :  { %4315 = vrot.lane.b32.xlu0 %v5567_v27, %s4797_s21  ;;  %v5689_v27 = vld [vmem:[%s5764_s0] sm:$0xff] }
 0xf50   :  { %v2365_v23 = vadd.f32 %v5689_v27, %v5539_v54 }
 0xf52   :  { %v2366_v40 = vsel %vm38_vm0, %v2365_v23, 0.0 }
 0xf57   :  { %4486 = vrot.lane.b32.xlu0 %v4116_v10, %s4799_s25 }
 0xfae   :  { %v4291_v18 = vpop.xlane.xlu0 %4290 }
 0xfaf   :  { %v4292_v43 = vsub.f32 %v4287_v21, %v4291_v18 }
 0xfb1   :  { %v4293_v0 = vmul.f32 1.442695, %v4292_v43 }
 0xfb3   :  { %4774 = vpow2.f32 %v4293_v0  ;;  %v4483_v0 = vpop.permute.xlu2 %4482 }
 0xfb4   :  { %v4493_v11 = vsel %vm701_vm1, %v5615_v22, %v4483_v0 }
 0xfb9   :  { %v5682_v55 = vpop.eup %4774 }
 0xfba   :  { %v4295_v19 = vsel %vm870_vm2, %v5682_v55, 0.0 }
 0xfbb   :  { %4296 = vadd.xlane.f32.xlu1 %v4295_v19 }
 0xfc1   :  { %v4316_v61 = vpop.permute.xlu0 %4315 }
 0xfc2   :  { %v4336_v38 = vand.u32 4294901760, %v4316_v61 }
 0xfc3   :  { %2367 = vadd.xlane.f32.xlu1 %v2366_v40 }
 0xfc4   :  { %v4364_v56 = vsub.f32 %v4316_v61, %v4336_v38  ;;  %4337 = vmatpush.msrb.mxu0 %v4336_v38  ;;  %4421 = vmatpush.msrb.mxu3 %v4336_v38 }
 0xfc6   :  { %v4365_v32 = vand.u32 4294901760, %v4364_v56  ;;  %4339 = vmatpush.msrb.mxu0 %v4338_v20  ;;  %4396 = vmatpush.msrb.mxu2 %v4364_v56 }
 0xfc7   :  { %4423 = vmatpush.msrb.mxu3 %v4338_v20 }
 0xfc8   :  { %v4366_v6 = vsub.f32 %v4364_v56, %v4365_v32  ;;  %4399 = vmatpush.msrb.mxu2 %v4370_v37  ;;  %4448 = vmatpush.msra.mxu0 %v4365_v32 }
 0xfc9   :  { %4545 = vmatpush.msra.mxu3 %v5373_v50  ;;  %v4802_v50 = vmov 32.0  }
 0xfca   :  { %4512 = vmatpush.msra.mxu2 %v5318_v31  ;;  %v4367_v54 = vand.u32 4294901760, %v4366_v6  ;;  %4452 = vmatpush.msra.mxu0 %v4371_v62  ;;  %4776 = vrcp.f32 %v4802_v50 }
 0xfcb   :  { %4551 = vmatpush.msra.mxu3 %v5392_v25 }
 0xfcc   :  { %4514 = vmatpush.msra.mxu2 %v5369_v1  ;;  %4368 = vmatpush.msrb.mxu1 %v4367_v54 }
 0xfcd   :  { %4557 = vmatpush.msra.mxu3 %v5418_v63 }
 0xfce   :  { %4516 = vmatpush.msra.mxu2 %v5390_v57  ;;  %4374 = vmatpush.msrb.mxu1 %v4373_v52 }
 0xfcf   :  { %4563 = vmatpush.msra.mxu3 %v5420_v34 }
 0xfd0   :  { %4473 = vmatpush.msra.mxu1 %v4336_v38  ;;  %4518 = vmatpush.msra.mxu2 %v5371_v30  ;;  %v4777_v24 = vpop.eup %4776 }
 0xfd1   :  { %v2370_v25 = vmul.f32 32.0, %v4777_v24  ;;  %vm2374_vm7 = vweird.f32 %v4777_v24 }
 0xfd2   :  { %4475 = vmatpush.msra.mxu1 %v4338_v20 }
 0xfd3   :  { %v2371_v28 = vsub.f32 1.0, %v2370_v25 }
 0xfd5   :  { %v2372_v45 = vmul.f32 %v4777_v24, %v2371_v28 }
 0xfd7   :  { %v2373_v63 = vadd.f32 %v4777_v24, %v2372_v45 }
 0xfd9   :  { %v5702_v2 = vsel %vm2374_vm7, %v4777_v24, %v2373_v63 }
0x102e   :  { %v4297_v33 = vpop.xlane.xlu1 %4296 }
0x102f   :  { %4778 = vrcp.f32 %v4297_v33  ;;  %v4309_v9 = vand.u32 2147483648, %v4297_v33  ;;  %v4307_v14 = vand.u32 2147483647, %v4297_v33  ;;  %vm4303_vm9 = vweird.f32 %v4297_v33 }
0x1031   :  { %v4310_v7 = vor.u32 1.1754944e-38, %v4309_v9  ;;  %vm4308_vm11 = vcmp.eq.f32.partialorder %v4307_v14, 8.507059e+37 }
0x1035   :  { %v4779_v59 = vpop.eup %4778 }
0x1036   :  { %v4299_v5 = vmul.f32 %v4779_v59, %v4297_v33  ;;  %v2368_v34 = vpop.xlane.xlu1 %2367  ;;  %vm4304_vm8 = vweird.f32 %v4779_v59 }
0x1037   :  { %v2376_v4 = vmul.f32 %v5702_v2, %v2368_v34  ;;  %vm4305_vm10 = vmor %vm4303_vm9, %vm4304_vm8 }
0x1038   :  { %v4300_v12 = vsub.f32 1.0, %v4299_v5 }
0x1039   :  { %v5705_v3 = vsub.f32 %v2365_v23, %v2376_v4 }
0x103a   :  { %v4301_v13 = vmul.f32 %v4779_v59, %v4300_v12 }
0x103b   :  { %v2378_v8 = vmul.f32 %v5705_v3, %v5705_v3 }
0x103c   :  { %v4302_v60 = vadd.f32 %v4779_v59, %v4301_v13 }
0x103d   :  { %v2379_v44 = vsel %vm38_vm0, %v2378_v8, 0.0 }
0x103e   :  { %v4306_v35 = vsel %vm4305_vm10, %v4779_v59, %v4302_v60  ;;  %2380 = vadd.xlane.f32.xlu1 %v2379_v44 }
0x103f   :  { %v4311_v21 = vsel %vm4308_vm11, %v4310_v7, %v4306_v35 }
0x1040   :  { %v4312_v41 = vmul.f32 %v5682_v55, %v4311_v21  ;;  %v4487_v55 = vpop.permute.xlu0 %4486 }
0x1041   :  { %v4494_v19 = vsel %vm870_vm2, %v4493_v11, %v4487_v55 }
0x1042   :  { %v4320_v29 = vsel %vm870_vm2, %v4312_v41, 0 }
0x1043   :  { %v4340_v16 = vand.u32 4294901760, %v4320_v29 }
0x1045   :  { %4376 = vmatmul.f32.vlgmr.msrb.gmra.mxu1 %v4340_v16  ;;  %v4341_v42 = vsub.f32 %v4320_v29, %v4340_v16 }
0x1046   :  { %4612 = vmatpush.msrb.mxu1 %v5318_v31 }
0x1047   :  { %4402 = vmatmul.f32.vlgmr.msrb.gmra.mxu2 %v4341_v42  ;;  %v4342_v47 = vand.u32 4294901760, %v4341_v42 }
0x1048   :  { %4614 = vmatpush.msrb.mxu1 %v5369_v1  ;;  %4641 = vmatpush.msrb.mxu2 %v5365_v48 }
0x1049   :  { %4427 = vmatmul.f32.vlgmr.msrb.gmra.mxu3 %v4342_v47  ;;  %v4343_v10 = vsub.f32 %v4341_v42, %v4342_v47 }
0x104a   :  { %4616 = vmatpush.msrb.mxu1 %v5390_v57  ;;  %4645 = vmatpush.msrb.mxu2 %v5385_v17 }
0x104b   :  { %4672 = vmatpush.msrb.mxu3 %v5318_v31  ;;  %v4344_v18 = vand.u32 4294901760, %v4343_v10  ;;  %v5731_v31 = vld [vmem:[%s5768_s5] sm:$0xff] }
0x104c   :  { %4618 = vmatpush.msrb.mxu1 %v5371_v30  ;;  %4649 = vmatpush.msrb.mxu2 %v5404_v53 }
0x104d   :  { %4674 = vmatpush.msrb.mxu3 %v5369_v1  ;;  %4345 = vmatmul.f32.vlgmr.msrb.gmra.mxu0 %v4344_v18 }
0x104e   :  { %4477 = vmatmul.f32.vlgmr.msra.gmra.mxu1 %v4340_v16  ;;  %4583 = vmatpush.msrb.mxu0 %v5357_v58  ;;  %v2395_v58 = vperm.slane %v5731_v31, 4 }
0x104f   :  { %4653 = vmatpush.msrb.mxu2 %v5395_v49  ;;  %4676 = vmatpush.msrb.mxu3 %v5390_v57 }
0x1050   :  { %4586 = vmatpush.msrb.mxu0 %v5376_v36 }
0x1051   :  { %4678 = vmatpush.msrb.mxu3 %v5371_v30 }
0x1052   :  { %4589 = vmatpush.msrb.mxu0 %v5398_v39 }
0x1054   :  { %4592 = vmatpush.msrb.mxu0 %v5382_v26 }
0x1055   :  { %4454 = vmatmul.f32.vlgmr.msra.gmra.mxu0 %v4340_v16 }
0x1057   :  { %4720 = vrot.lane.b32.xlu1 %v2395_v58, %s4798_s24 }
0x10b1   :  { %v2381_v14 = vpop.xlane.xlu1 %2380 }
0x10b2   :  { %v2382_v8 = vmul.f32 %v2381_v14, %v5702_v2 }
0x10b4   :  { %v2383_v60 = vadd.f32 1e-05, %v2382_v8 }
0x10b6   :  { %4780 = vrsqrt.f32 %v2383_v60  ;;  %vm2390_vm2 = vweird.f32 %v2383_v60 }
0x10bc   :  { %v4781_v7 = vpop.eup %4780 }
0x10bd   :  { %v2385_v44 = vmul.f32 %v4781_v7, %v2383_v60  ;;  %vm2391_vm1 = vweird.f32 %v4781_v7 }
0x10bf   :  { %v2386_v35 = vmul.f32 %v4781_v7, %v2385_v44 }
0x10c1   :  { %v2387_v16 = vmul.f32 0.5, %v2386_v35 }
0x10c2   :  { %v4377_v48 = vpop.f32.mrf.mxu1 }
0x10c3   :  { %v2388_v42 = vsub.f32 1.5, %v2387_v16 }
0x10c5   :  { %v2389_v10 = vmul.f32 %v4781_v7, %v2388_v42 }
0x10ca   :  { %v4346_v1 = vpop.f32.mrf.mxu0  ;;  %v4403_v30 = vpop.f32.mrf.mxu2 }
0x10cb   :  { %v4378_v36 = vadd.f32 %v4377_v48, %v4346_v1  ;;  %v4478_v53 = vpop.f32.mrf.mxu1 }
0x10cc   :  { %v4428_v57 = vpop.f32.mrf.mxu3 }
0x10cd   :  { %v4404_v17 = vadd.f32 %v4403_v30, %v4378_v36 }
0x10cf   :  { %v4429_v49 = vadd.f32 %v4428_v57, %v4404_v17 }
0x10d2   :  { %v4455_v26 = vpop.f32.mrf.mxu0 }
0x10d3   :  { %v4456_v39 = vadd.f32 %v4455_v26, %v4429_v49 }
0x10d5   :  { %v4479_v43 = vadd.f32 %v4478_v53, %v4456_v39 }
0x10d7   :  { %4490 = vrot.lane.b32.xlu2 %v4479_v43, %s4801_s1 }
0x1131   :  { %v4491_v20 = vpop.permute.xlu2 %4490 }
0x1132   :  { %v4495_v23 = vsel %vm2162_vm6, %v4494_v19, %v4491_v20  ;;  %vm2392_vm6 = vmor %vm2390_vm2, %vm2391_vm1 }
0x1133   :  { %v4497_v37 = vsel %vm38_vm0, %v4495_v23, 0  ;;  %v2393_v1 = vsel %vm2392_vm6, %v4781_v7, %v2389_v10 }
0x1134   :  { %v4519_v61 = vand.u32 4294901760, %v4497_v37  ;;  %v2394_v17 = vmul.f32 %v2393_v1, %v5705_v3 }
0x1136   :  { %v4520_v38 = vsub.f32 %v4497_v37, %v4519_v61  ;;  %4565 = vmatmul.f32.vlgmr.msra.gmra.mxu3 %v4519_v61  ;;  %v2396_v26 = vmul.f32 %v2395_v58, %v2394_v17 }
0x1138   :  { %v4521_v40 = vand.u32 4294901760, %v4520_v38  ;;  %4595 = vmatmul.f32.vlgmr.msrb.gmra.mxu0 %v4520_v38 }
0x113a   :  { %v4522_v56 = vsub.f32 %v4520_v38, %v4521_v40  ;;  %4622 = vmatmul.f32.vlgmr.msrb.gmra.mxu1 %v4521_v40 }
0x113c   :  { %v4523_v62 = vand.u32 4294901760, %v4522_v56 }
0x113e   :  { %4524 = vmatmul.f32.vlgmr.msra.gmra.mxu2 %v4523_v62  ;;  %4680 = vmatmul.f32.vlgmr.msrb.gmra.mxu3 %v4519_v61 }
0x1146   :  { %4655 = vmatmul.f32.vlgmr.msrb.gmra.mxu2 %v4519_v61 }
0x11b5   :  { %v4596_v54 = vpop.f32.mrf.mxu0 }
0x11b7   :  { %v4623_v50 = vpop.f32.mrf.mxu1 }
0x11b9   :  { %v4566_v32 = vpop.f32.mrf.mxu3 }
0x11c1   :  { %v4525_v22 = vpop.f32.mrf.mxu2  ;;  %v4681_v45 = vpop.f32.mrf.mxu3 }
0x11c2   :  { %v4526_v6 = vadd.f32 %v4525_v22, %v2164_v46  ;;  %v2397_v46 = vperm.slane %v5731_v31, 5 }
0x11c4   :  { %v4567_v51 = vadd.f32 %v4566_v32, %v4526_v6  ;;  %v2398_v0 = vadd.f32 %v2397_v46, %v2396_v26 }
0x11c6   :  { %v4597_v52 = vadd.f32 %v4596_v54, %v4567_v51 }
0x11c8   :  { %v4624_v24 = vadd.f32 %v4623_v50, %v4597_v52 }
0x11c9   :  { %v4656_v25 = vpop.f32.mrf.mxu2 }
0x11ca   :  { %v4657_v28 = vadd.f32 %v4656_v25, %v4624_v24 }
0x11cc   :  { %v4682_v33 = vadd.f32 %v4681_v45, %v4657_v28 }
0x11ce   :  { %4685 = vrot.lane.b32.xlu0 %v4682_v33, %s4798_s24 }
0x1240   :  { %v4686_v63 = vpop.permute.xlu0 %4685 }
0x1241   :  { %v4688_v59 = vadd.f32 %v5689_v27, %v4686_v63 }
0x1243   :  { %4690 = vrot.lane.b32.xlu2 %v4688_v59, %s4793_s27 }
0x129d   :  { %v4691_v5 = vpop.permute.xlu2 %4690 }
0x129e   :  { %v4693_v15 = vsel %vm38_vm0, %v4691_v5, 0.0 }
0x129f   :  { %4694 = vadd.xlane.f32.xlu0 %v4693_v15 }
0x12b3   :  { %4725 = vrot.lane.b32.xlu0 %v2397_v46, %s4798_s24 }
0x1312   :  { %v4695_v34 = vpop.xlane.xlu0 %4694 }
0x1313   :  { %v4696_v4 = vmul.f32 %v4695_v34, %v5702_v2 }
0x1315   :  { %v4697_v12 = vsub.f32 %v4688_v59, %v4696_v4 }
0x1317   :  { %v4698_v9 = vmul.f32 %v4697_v12, %v4697_v12 }
0x1319   :  { %4700 = vrot.lane.b32.xlu2 %v4698_v9, %s4793_s27 }
0x1325   :  { %v4726_v53 = vpop.permute.xlu0 %4725 }
0x1373   :  { %v4701_v13 = vpop.permute.xlu2 %4700 }
0x1374   :  { %v4703_v27 = vsel %vm38_vm0, %v4701_v13, 0.0 }
0x1375   :  { %4704 = vadd.xlane.f32.xlu2 %v4703_v27 }
0x13e8   :  { %v4705_v21 = vpop.xlane.xlu2 %4704 }
0x13e9   :  { %v4706_v41 = vmul.f32 %v4705_v21, %v5702_v2  ;;  %v4721_v2 = vpop.permute.xlu1 %4720 }
0x13eb   :  { %v4707_v29 = vadd.f32 1e-05, %v4706_v41 }
0x13ed   :  { %4782 = vrsqrt.f32 %v4707_v29  ;;  %vm4714_vm13 = vweird.f32 %v4707_v29 }
0x13f3   :  { %v4783_v47 = vpop.eup %4782 }
0x13f4   :  { %v4709_v18 = vmul.f32 %v4783_v47, %v4707_v29  ;;  %vm4715_vm12 = vweird.f32 %v4783_v47 }
0x13f5   :  { %vm4716_vm14 = vmor %vm4714_vm13, %vm4715_vm12 }
0x13f6   :  { %v4710_v48 = vmul.f32 %v4783_v47, %v4709_v18 }
0x13f8   :  { %v4711_v36 = vmul.f32 0.5, %v4710_v48 }
0x13fa   :  { %v4712_v30 = vsub.f32 1.5, %v4711_v36 }
0x13fc   :  { %v4713_v57 = vmul.f32 %v4783_v47, %v4712_v30 }
0x13fe   :  { %v4717_v49 = vsel %vm4716_vm14, %v4783_v47, %v4713_v57 }
0x13ff   :  { %v4718_v39 = vmul.f32 %v4717_v49, %v4697_v12 }
0x1401   :  { %v4723_v43 = vmul.f32 %v4721_v2, %v4718_v39 }
0x1403   :  { %v4728_v55 = vadd.f32 %v4726_v53, %v4723_v43 }
0x1405   :  { %v4729_v11 = vsel %vm38_vm0, %v2398_v0, %v4728_v55 }
0x1406   :  { %4731 = vst.msk [vmem:[%s5769_s6] sm:$0xff] %vm4730_vm15, %v4729_v11 }

</bundles_post_ra>
